<compile_context>
chip_gen: v6e
topology: v6e:2x2x1
jax: 0.10.0
libtpu: 0.0.40
codegen_flags: <defaults>
</compile_context>

<pallas_src>
import functools

import jax
import jax.numpy as jnp
import numpy as np
from jax.experimental import pallas as pl
from jax.experimental.pallas import tpu as pltpu

NEG_SLOPE = 0.01  # PyTorch LeakyReLU default


def _leaky(h):
    return jnp.where(h >= 0, h, NEG_SLOPE * h)


def _actor_kernel(a_ref, x_ref, mask_ref,
                  wc1, bc1, wc2, bc2, wc3, bc3, wc4, bc4,
                  wl1, bl1, wl2, bl2, w3t, b3,
                  out_ref, *, tile_graphs, nodes_per_graph):
    f32, bf16 = jnp.float32, jnp.bfloat16
    G, N = tile_graphs, nodes_per_graph
    M = G * N

    # Per-graph self-looped adjacencies of this tile (no (M, M) block-diagonal).
    a = a_ref[...]                                                # (G, N, N) bf16
    deg = jnp.sum(a.astype(f32), axis=-1, keepdims=True)         # (G, N, 1) f32, >= 1
    d_is = jax.lax.rsqrt(deg)                                     # D^{-1/2}, EUP slot
    d_flat = d_is.reshape(M, 1)                                   # leading-dim merge only

    def node_mm(h, w_ref):                                        # (M, Ci) @ (Ci, Co) on the MXU
        return jnp.dot(h.astype(bf16), w_ref[...], preferred_element_type=f32)

    def gcn(h, w_ref, b_ref):
        # GCNConv: D^{-1/2} (A + I) D^{-1/2} (X W) + b, then LeakyReLU.
        co = w_ref.shape[1]
        y = node_mm(h, w_ref) * d_flat                            # (M, Co): D^{-1/2} X W
        y3 = y.reshape(G, N, co).astype(bf16)                     # leading-dim split (cheap)
        z3 = jnp.einsum('gij,gjc->gic', a, y3,                    # per-graph A_hat @ (...)
                        preferred_element_type=f32)
        z = z3.reshape(M, co)
        return _leaky(z * d_flat + b_ref[...])

    h = gcn(x_ref[...], wc1, bc1)                                 # conv1
    h = gcn(h, wc2, bc2)                                          # convs[0]
    h = gcn(h, wc3, bc3)                                          # convs[1]
    h = gcn(h, wc4, bc4)                                          # convs[2]
    h = _leaky(node_mm(h, wl1) + bl1[...])                        # lin1
    h = _leaky(node_mm(h, wl2) + bl2[...])                        # lin2

    # lin3 (out_channels -> 1) as a lane reduce: logits land lane-dense (G, N).
    h3 = h.reshape(G, N, h.shape[-1])
    logits = jnp.sum(h3 * w3t[...], axis=-1) + b3[...]            # (G, N)

    # masked softmax over the nodes of each graph (lane axis)
    mask = mask_ref[...]                                          # (G, N) int32
    neg = jnp.float32(-1e30)   # finite sentinel -> no NaN for fully masked graphs
    masked = jnp.where(mask != 0, logits, neg)
    m = jnp.max(masked, axis=-1, keepdims=True)                   # (G, 1)
    ex = jnp.exp(masked - m)                                      # == 0 where masked out
    denom = jnp.sum(ex, axis=-1, keepdims=True)                   # (G, 1)
    probs = ex / denom                                            # exact normalisation

    # Pack the G graphs of this tile into a single lane-dense (1, M) row so the
    # HBM writeback is one contiguous, unmasked full-lane store per grid step.
    for g in range(G):                                            # static unroll; XLU/VPU slack
        out_ref[:, :, g * N:(g + 1) * N] = probs[None, g:g + 1, :]


def _pick_tile_graphs(B, N, target_rows=256):
    # ~256 rows per step fills the 256-wide v6e/v7x MXU (use target_rows=128 on
    # v5e: its MXU is 4x128^2 and bigger tiles only add DMA bytes).
    target = max(1, target_rows // N)
    for g in range(min(B, target), 0, -1):
        if B % g == 0 and (g == B or g % 8 == 0):
            return g
    return B


def actor_forward(node_feats, a_hat, mask, params, tile_graphs=None, target_rows=256):
    """node_feats: (B, N, Cin) f32; a_hat: (B, N, N) dense A+I (A[i,j]=1 iff edge j->i);
       mask: (B, N); params: 7 (weight, bias) pairs (conv1, conv2..4, lin1, lin2, lin3)."""
    B, N, Cin = node_feats.shape
    if tile_graphs is None:
        tile_graphs = _pick_tile_graphs(B, N, target_rows)
    G = tile_graphs
    assert B % G == 0 and (G == B or G % 8 == 0), \
        "tile_graphs must divide B and be a multiple of 8 (or == B)"
    M = G * N
    T = B // G

    # host-side preprocessing (cheap; no block-diagonal materialisation)
    cin_pad = ((Cin + 7) // 8) * 8                       # pad narrow feature dim (6 -> 8)
    x2d = node_feats.reshape(B * N, Cin).astype(jnp.bfloat16)
    if cin_pad != Cin:
        x2d = jnp.pad(x2d, ((0, 0), (0, cin_pad - Cin)))
    mask_i = mask.astype(jnp.int32)
    a_bf = a_hat.astype(jnp.bfloat16)                    # (B, N, N)

    *mm_params, (w3, b3) = params
    (wc1, bc1) = mm_params[0]
    if cin_pad != Cin:
        wc1 = jnp.pad(wc1, ((0, cin_pad - Cin), (0, 0)))  # zero rows: no effect on output
    mm_params = [(wc1, bc1)] + list(mm_params[1:])

    flat = []
    for (w, b) in mm_params:                             # conv1..4, lin1, lin2
        flat += [w.astype(jnp.bfloat16), b.reshape(1, -1).astype(jnp.float32)]
    flat += [w3.reshape(1, -1).astype(jnp.float32),      # lin3 weight as (1, out_ch) row
             b3.reshape(1, 1).astype(jnp.float32)]

    def _resident_spec(p):
        # Constant index_map -> the block stays resident across grid steps.
        # (pipeline_mode=pl.Buffered(1) would drop the unused 2nd buffer; skipped
        #  here since the weights are tiny at hidden=32.)
        zeros = (0,) * p.ndim
        return pl.BlockSpec(p.shape, lambda i, _z=zeros: _z)

    kernel = functools.partial(_actor_kernel, tile_graphs=G, nodes_per_graph=N)
    grid_spec = pltpu.PrefetchScalarGridSpec(
        num_scalar_prefetch=0,
        grid=(T,),
        in_specs=[pl.BlockSpec((G, N, N), lambda i: (i, 0, 0)),   # per-graph adjacencies
                  pl.BlockSpec((M, cin_pad), lambda i: (i, 0)),   # node features
                  pl.BlockSpec((G, N), lambda i: (i, 0)),         # mask
                  *[_resident_spec(p) for p in flat]],
        out_specs=pl.BlockSpec((1, 1, M), lambda i: (i, 0, 0)),   # lane-dense output rows
    )
    out = pl.pallas_call(
        kernel,
        out_shape=jax.ShapeDtypeStruct((T, 1, M), jnp.float32),
        grid_spec=grid_spec,
        compiler_params=pltpu.CompilerParams(
            dimension_semantics=("parallel",)),
    )(a_bf, x2d, mask_i, *flat)
    return out.reshape(B, N)


# ----------------------------- pure-JAX reference -----------------------------
def reference_forward(node_feats, edge_indices, mask, params):
    """Edge-list (PyG-style) f32 reference mirroring the PyTorch forward."""
    B, N, _ = node_feats.shape
    lrelu = lambda t: jnp.where(t >= 0, t, NEG_SLOPE * t)
    (wc1, bc1), (wc2, bc2), (wc3, bc3), (wc4, bc4), (wl1, bl1), (wl2, bl2), (w3, b3) = params

    def gcn_conv(x, src, dst, w, b):
        n = x.shape[0]
        loop = jnp.arange(n, dtype=jnp.int32)
        s = jnp.concatenate([jnp.asarray(src, jnp.int32), loop])
        d = jnp.concatenate([jnp.asarray(dst, jnp.int32), loop])
        deg = jax.ops.segment_sum(jnp.ones_like(d, jnp.float32), d, num_segments=n)
        dis = 1.0 / jnp.sqrt(deg)                      # deg >= 1 (self loops)
        xw = x @ w
        msg = (dis[s] * dis[d])[:, None] * xw[s]
        return jax.ops.segment_sum(msg, d, num_segments=n) + b

    rows = []
    for bidx in range(B):
        x = node_feats[bidx].astype(jnp.float32)
        src, dst = edge_indices[bidx][0], edge_indices[bidx][1]
        h = lrelu(gcn_conv(x, src, dst, wc1, bc1))
        h = lrelu(gcn_conv(h, src, dst, wc2, bc2))
        h = lrelu(gcn_conv(h, src, dst, wc3, bc3))
        h = lrelu(gcn_conv(h, src, dst, wc4, bc4))
        h = lrelu(h @ wl1 + bl1)
        h = lrelu(h @ wl2 + bl2)
        rows.append((h @ w3 + b3).reshape(N))
    logits = jnp.stack(rows)                            # (B, N)
    masked = jnp.where(mask != 0, logits, -jnp.inf)
    return jax.nn.softmax(masked, axis=-1)


# ----------------------------- host-side graph glue -----------------------------
def make_edges(key, num_nodes, num_extra):
    """Undirected ring + random chords, both directions, no self loops."""
    pairs = set()
    for i in range(num_nodes):
        j = (i + 1) % num_nodes
        pairs.add((i, j)); pairs.add((j, i))
    extra = np.asarray(jax.random.randint(key, (num_extra, 2), 0, num_nodes))
    for a, b in extra:
        a, b = int(a), int(b)
        if a != b:
            pairs.add((a, b)); pairs.add((b, a))
    return np.array(sorted(pairs), dtype=np.int32).T    # (2, E): row 0 = src, row 1 = dst


def edges_to_dense_ahat(edge_index, num_nodes):
    a = np.zeros((num_nodes, num_nodes), np.float32)
    a[edge_index[1], edge_index[0]] = 1.0                # A[target, source]
    a[np.arange(num_nodes), np.arange(num_nodes)] = 1.0  # self loops
    return a


def init_linear(key, fan_in, fan_out):
    """PyTorch-style Linear init: U(-1/sqrt(fan_in), 1/sqrt(fan_in))."""
    k = 1.0 / np.sqrt(fan_in)
    kw, kb = jax.random.split(key)
    w = jax.random.uniform(kw, (fan_in, fan_out), jnp.float32, -k, k)
    b = jax.random.uniform(kb, (1, fan_out), jnp.float32, -k, k)
    return w, b


if __name__ == "__main__":
    key = jax.random.PRNGKey(0)
    B, N = 32, 16                      # 32 graphs x 16 nodes
    in_channels = 6
    hidden_channels = 32
    out_channels = 8

    keys = jax.random.split(key, 10)
    params = [
        init_linear(keys[0], in_channels, hidden_channels),       # conv1
        init_linear(keys[1], hidden_channels, hidden_channels),   # convs[0]
        init_linear(keys[2], hidden_channels, hidden_channels),   # convs[1]
        init_linear(keys[3], hidden_channels, hidden_channels),   # convs[2]
        init_linear(keys[4], hidden_channels, hidden_channels),   # lin1
        init_linear(keys[5], hidden_channels, out_channels),      # lin2
        init_linear(keys[6], out_channels, 1),                    # lin3
    ]
    node_feats = jax.random.normal(keys[7], (B, N, in_channels), jnp.float32)
    mask = (jax.random.uniform(keys[8], (B, N)) > 0.3).astype(jnp.int32)
    mask = mask.at[:, 0].set(1)        # each graph keeps >= 1 valid action

    edge_keys = jax.random.split(keys[9], B)
    edge_indices = [make_edges(edge_keys[b], N, num_extra=8) for b in range(B)]
    a_hat = jnp.asarray(np.stack([edges_to_dense_ahat(e, N) for e in edge_indices]))

    # _pick_tile_graphs -> G=16 (256-row tiles for v6e/v7x), grid T=2 so both v7x
    # TensorCores get a tile.  On v5e pass target_rows=128 instead.
    probs = actor_forward(node_feats, a_hat, mask, params)
    probs = jax.block_until_ready(probs)

    ref = reference_forward(node_feats, edge_indices, mask, params)
    np.testing.assert_allclose(np.asarray(probs), np.asarray(ref),
                               rtol=4e-2, atol=4e-3)
    print("KERNEL_OK")
</pallas_src>

<mosaic_0001>
module attributes {stable_mosaic.version = 11 : i64} {
  func.func @_actor_kernel(%arg0: i32, %arg1: memref<16x16x16xbf16, #tpu.memory_space<vmem>>, %arg2: memref<256x8xbf16, #tpu.memory_space<vmem>>, %arg3: memref<16x16xi32, #tpu.memory_space<vmem>>, %arg4: memref<8x32xbf16, #tpu.memory_space<vmem>>, %arg5: memref<1x32xf32, #tpu.memory_space<vmem>>, %arg6: memref<32x32xbf16, #tpu.memory_space<vmem>>, %arg7: memref<1x32xf32, #tpu.memory_space<vmem>>, %arg8: memref<32x32xbf16, #tpu.memory_space<vmem>>, %arg9: memref<1x32xf32, #tpu.memory_space<vmem>>, %arg10: memref<32x32xbf16, #tpu.memory_space<vmem>>, %arg11: memref<1x32xf32, #tpu.memory_space<vmem>>, %arg12: memref<32x32xbf16, #tpu.memory_space<vmem>>, %arg13: memref<1x32xf32, #tpu.memory_space<vmem>>, %arg14: memref<32x8xbf16, #tpu.memory_space<vmem>>, %arg15: memref<1x8xf32, #tpu.memory_space<vmem>>, %arg16: memref<1x8xf32, #tpu.memory_space<vmem>>, %arg17: memref<1x1xf32, #tpu.memory_space<vmem>>, %arg18: memref<1x1x256xf32, #tpu.memory_space<vmem>>) attributes {dimension_semantics = [#tpu.dimension_semantics<parallel>], iteration_bounds = array<i64: 2>, scalar_prefetch = 0 : i64, scratch_operands = 0 : i64, tpu.core_type = #tpu.core_type<tc>, window_params = [{transform_indices = @transform_0, window_bounds = array<i64: 16, 16, 16>}, {transform_indices = @transform_1, window_bounds = array<i64: 256, 8>}, {transform_indices = @transform_2, window_bounds = array<i64: 16, 16>}, {pipeline_mode = #tpu.pipeline_mode<synchronous>, transform_indices = @transform_3, window_bounds = array<i64: 8, 32>}, {pipeline_mode = #tpu.pipeline_mode<synchronous>, transform_indices = @transform_4, window_bounds = array<i64: 1, 32>}, {pipeline_mode = #tpu.pipeline_mode<synchronous>, transform_indices = @transform_5, window_bounds = array<i64: 32, 32>}, {pipeline_mode = #tpu.pipeline_mode<synchronous>, transform_indices = @transform_6, window_bounds = array<i64: 1, 32>}, {pipeline_mode = #tpu.pipeline_mode<synchronous>, transform_indices = @transform_7, window_bounds = array<i64: 32, 32>}, {pipeline_mode = #tpu.pipeline_mode<synchronous>, transform_indices = @transform_8, window_bounds = array<i64: 1, 32>}, {pipeline_mode = #tpu.pipeline_mode<synchronous>, transform_indices = @transform_9, window_bounds = array<i64: 32, 32>}, {pipeline_mode = #tpu.pipeline_mode<synchronous>, transform_indices = @transform_10, window_bounds = array<i64: 1, 32>}, {pipeline_mode = #tpu.pipeline_mode<synchronous>, transform_indices = @transform_11, window_bounds = array<i64: 32, 32>}, {pipeline_mode = #tpu.pipeline_mode<synchronous>, transform_indices = @transform_12, window_bounds = array<i64: 1, 32>}, {pipeline_mode = #tpu.pipeline_mode<synchronous>, transform_indices = @transform_13, window_bounds = array<i64: 32, 8>}, {pipeline_mode = #tpu.pipeline_mode<synchronous>, transform_indices = @transform_14, window_bounds = array<i64: 1, 8>}, {pipeline_mode = #tpu.pipeline_mode<synchronous>, transform_indices = @transform_15, window_bounds = array<i64: 1, 8>}, {pipeline_mode = #tpu.pipeline_mode<synchronous>, transform_indices = @transform_16, window_bounds = array<i64: 1, 1>}, {transform_indices = @transform_17, window_bounds = array<i64: 1, 1, 256>}]} {
    %c0 = arith.constant 0 : index
    %c0_0 = arith.constant 0 : index
    %c0_1 = arith.constant 0 : index
    %0 = vector.load %arg1[%c0, %c0_0, %c0_1] : memref<16x16x16xbf16, #tpu.memory_space<vmem>>, vector<16x16x16xbf16>
    %1 = arith.extf %0 : vector<16x16x16xbf16> to vector<16x16x16xf32>
    %cst = arith.constant dense<0.000000e+00> : vector<16x16xf32>
    %2 = vector.multi_reduction <add>, %1, %cst [2] : vector<16x16x16xf32> to vector<16x16xf32>
    %3 = vector.shape_cast %2 : vector<16x16xf32> to vector<16x16x1xf32>
    %4 = math.rsqrt %3 : vector<16x16x1xf32>
    %5 = vector.shape_cast %4 : vector<16x16x1xf32> to vector<256x1xf32>
    %c0_2 = arith.constant 0 : index
    %c0_3 = arith.constant 0 : index
    %6 = vector.load %arg2[%c0_2, %c0_3] : memref<256x8xbf16, #tpu.memory_space<vmem>>, vector<256x8xbf16>
    %c0_4 = arith.constant 0 : index
    %c0_5 = arith.constant 0 : index
    %7 = vector.load %arg4[%c0_4, %c0_5] : memref<8x32xbf16, #tpu.memory_space<vmem>>, vector<8x32xbf16>
    %cst_6 = arith.constant dense<0.000000e+00> : vector<256x32xf32>
    %8 = tpu.matmul %6, %7, %cst_6 {dimension_numbers = #tpu.dot_dimension_numbers<[1], [0], [0], [1], [0, 0, 1, 1], [], []>} : vector<256x8xbf16>, vector<8x32xbf16>, vector<256x32xf32> -> vector<256x32xf32>
    %9 = vector.broadcast %5 : vector<256x1xf32> to vector<256x32xf32>
    %10 = arith.mulf %8, %9 : vector<256x32xf32>
    %11 = vector.shape_cast %10 : vector<256x32xf32> to vector<16x16x32xf32>
    %12 = arith.truncf %11 : vector<16x16x32xf32> to vector<16x16x32xbf16>
    "tpu.trace_start"() <{level = 10 : i32, message = "gij,gjc->gic"}> : () -> ()
    %cst_7 = arith.constant dense<0.000000e+00> : vector<16x16x32xf32>
    %13 = tpu.matmul %0, %12, %cst_7 {dimension_numbers = #tpu.dot_dimension_numbers<[2], [1], [1], [2], [0, 0, 0, 1, 1, 2], [0], [0]>} : vector<16x16x16xbf16>, vector<16x16x32xbf16>, vector<16x16x32xf32> -> vector<16x16x32xf32>
    "tpu.trace_stop"() : () -> ()
    %14 = vector.shape_cast %13 : vector<16x16x32xf32> to vector<256x32xf32>
    %15 = vector.broadcast %5 : vector<256x1xf32> to vector<256x32xf32>
    %16 = arith.mulf %14, %15 : vector<256x32xf32>
    %c0_8 = arith.constant 0 : index
    %c0_9 = arith.constant 0 : index
    %17 = vector.load %arg5[%c0_8, %c0_9] : memref<1x32xf32, #tpu.memory_space<vmem>>, vector<1x32xf32>
    %18 = vector.broadcast %17 : vector<1x32xf32> to vector<256x32xf32>
    %19 = arith.addf %16, %18 : vector<256x32xf32>
    %cst_10 = arith.constant 0.000000e+00 : f32
    %20 = vector.broadcast %cst_10 : f32 to vector<256x32xf32>
    %21 = arith.cmpf oge, %19, %20 : vector<256x32xf32>
    %cst_11 = arith.constant 0.00999999977 : f32
    %22 = vector.broadcast %cst_11 : f32 to vector<256x32xf32>
    %23 = arith.mulf %22, %19 : vector<256x32xf32>
    %24 = arith.select %21, %19, %23 : vector<256x32xi1>, vector<256x32xf32>
    %25 = arith.truncf %24 : vector<256x32xf32> to vector<256x32xbf16>
    %c0_12 = arith.constant 0 : index
    %c0_13 = arith.constant 0 : index
    %26 = vector.load %arg6[%c0_12, %c0_13] : memref<32x32xbf16, #tpu.memory_space<vmem>>, vector<32x32xbf16>
    %cst_14 = arith.constant dense<0.000000e+00> : vector<256x32xf32>
    %27 = tpu.matmul %25, %26, %cst_14 {dimension_numbers = #tpu.dot_dimension_numbers<[1], [0], [0], [1], [0, 0, 1, 1], [], []>} : vector<256x32xbf16>, vector<32x32xbf16>, vector<256x32xf32> -> vector<256x32xf32>
    %28 = vector.broadcast %5 : vector<256x1xf32> to vector<256x32xf32>
    %29 = arith.mulf %27, %28 : vector<256x32xf32>
    %30 = vector.shape_cast %29 : vector<256x32xf32> to vector<16x16x32xf32>
    %31 = arith.truncf %30 : vector<16x16x32xf32> to vector<16x16x32xbf16>
    "tpu.trace_start"() <{level = 10 : i32, message = "gij,gjc->gic"}> : () -> ()
    %cst_15 = arith.constant dense<0.000000e+00> : vector<16x16x32xf32>
    %32 = tpu.matmul %0, %31, %cst_15 {dimension_numbers = #tpu.dot_dimension_numbers<[2], [1], [1], [2], [0, 0, 0, 1, 1, 2], [0], [0]>} : vector<16x16x16xbf16>, vector<16x16x32xbf16>, vector<16x16x32xf32> -> vector<16x16x32xf32>
    "tpu.trace_stop"() : () -> ()
    %33 = vector.shape_cast %32 : vector<16x16x32xf32> to vector<256x32xf32>
    %34 = vector.broadcast %5 : vector<256x1xf32> to vector<256x32xf32>
    %35 = arith.mulf %33, %34 : vector<256x32xf32>
    %c0_16 = arith.constant 0 : index
    %c0_17 = arith.constant 0 : index
    %36 = vector.load %arg7[%c0_16, %c0_17] : memref<1x32xf32, #tpu.memory_space<vmem>>, vector<1x32xf32>
    %37 = vector.broadcast %36 : vector<1x32xf32> to vector<256x32xf32>
    %38 = arith.addf %35, %37 : vector<256x32xf32>
    %cst_18 = arith.constant 0.000000e+00 : f32
    %39 = vector.broadcast %cst_18 : f32 to vector<256x32xf32>
    %40 = arith.cmpf oge, %38, %39 : vector<256x32xf32>
    %cst_19 = arith.constant 0.00999999977 : f32
    %41 = vector.broadcast %cst_19 : f32 to vector<256x32xf32>
    %42 = arith.mulf %41, %38 : vector<256x32xf32>
    %43 = arith.select %40, %38, %42 : vector<256x32xi1>, vector<256x32xf32>
    %44 = arith.truncf %43 : vector<256x32xf32> to vector<256x32xbf16>
    %c0_20 = arith.constant 0 : index
    %c0_21 = arith.constant 0 : index
    %45 = vector.load %arg8[%c0_20, %c0_21] : memref<32x32xbf16, #tpu.memory_space<vmem>>, vector<32x32xbf16>
    %cst_22 = arith.constant dense<0.000000e+00> : vector<256x32xf32>
    %46 = tpu.matmul %44, %45, %cst_22 {dimension_numbers = #tpu.dot_dimension_numbers<[1], [0], [0], [1], [0, 0, 1, 1], [], []>} : vector<256x32xbf16>, vector<32x32xbf16>, vector<256x32xf32> -> vector<256x32xf32>
    %47 = vector.broadcast %5 : vector<256x1xf32> to vector<256x32xf32>
    %48 = arith.mulf %46, %47 : vector<256x32xf32>
    %49 = vector.shape_cast %48 : vector<256x32xf32> to vector<16x16x32xf32>
    %50 = arith.truncf %49 : vector<16x16x32xf32> to vector<16x16x32xbf16>
    "tpu.trace_start"() <{level = 10 : i32, message = "gij,gjc->gic"}> : () -> ()
    %cst_23 = arith.constant dense<0.000000e+00> : vector<16x16x32xf32>
    %51 = tpu.matmul %0, %50, %cst_23 {dimension_numbers = #tpu.dot_dimension_numbers<[2], [1], [1], [2], [0, 0, 0, 1, 1, 2], [0], [0]>} : vector<16x16x16xbf16>, vector<16x16x32xbf16>, vector<16x16x32xf32> -> vector<16x16x32xf32>
    "tpu.trace_stop"() : () -> ()
    %52 = vector.shape_cast %51 : vector<16x16x32xf32> to vector<256x32xf32>
    %53 = vector.broadcast %5 : vector<256x1xf32> to vector<256x32xf32>
    %54 = arith.mulf %52, %53 : vector<256x32xf32>
    %c0_24 = arith.constant 0 : index
    %c0_25 = arith.constant 0 : index
    %55 = vector.load %arg9[%c0_24, %c0_25] : memref<1x32xf32, #tpu.memory_space<vmem>>, vector<1x32xf32>
    %56 = vector.broadcast %55 : vector<1x32xf32> to vector<256x32xf32>
    %57 = arith.addf %54, %56 : vector<256x32xf32>
    %cst_26 = arith.constant 0.000000e+00 : f32
    %58 = vector.broadcast %cst_26 : f32 to vector<256x32xf32>
    %59 = arith.cmpf oge, %57, %58 : vector<256x32xf32>
    %cst_27 = arith.constant 0.00999999977 : f32
    %60 = vector.broadcast %cst_27 : f32 to vector<256x32xf32>
    %61 = arith.mulf %60, %57 : vector<256x32xf32>
    %62 = arith.select %59, %57, %61 : vector<256x32xi1>, vector<256x32xf32>
    %63 = arith.truncf %62 : vector<256x32xf32> to vector<256x32xbf16>
    %c0_28 = arith.constant 0 : index
    %c0_29 = arith.constant 0 : index
    %64 = vector.load %arg10[%c0_28, %c0_29] : memref<32x32xbf16, #tpu.memory_space<vmem>>, vector<32x32xbf16>
    %cst_30 = arith.constant dense<0.000000e+00> : vector<256x32xf32>
    %65 = tpu.matmul %63, %64, %cst_30 {dimension_numbers = #tpu.dot_dimension_numbers<[1], [0], [0], [1], [0, 0, 1, 1], [], []>} : vector<256x32xbf16>, vector<32x32xbf16>, vector<256x32xf32> -> vector<256x32xf32>
    %66 = vector.broadcast %5 : vector<256x1xf32> to vector<256x32xf32>
    %67 = arith.mulf %65, %66 : vector<256x32xf32>
    %68 = vector.shape_cast %67 : vector<256x32xf32> to vector<16x16x32xf32>
    %69 = arith.truncf %68 : vector<16x16x32xf32> to vector<16x16x32xbf16>
    "tpu.trace_start"() <{level = 10 : i32, message = "gij,gjc->gic"}> : () -> ()
    %cst_31 = arith.constant dense<0.000000e+00> : vector<16x16x32xf32>
    %70 = tpu.matmul %0, %69, %cst_31 {dimension_numbers = #tpu.dot_dimension_numbers<[2], [1], [1], [2], [0, 0, 0, 1, 1, 2], [0], [0]>} : vector<16x16x16xbf16>, vector<16x16x32xbf16>, vector<16x16x32xf32> -> vector<16x16x32xf32>
    "tpu.trace_stop"() : () -> ()
    %71 = vector.shape_cast %70 : vector<16x16x32xf32> to vector<256x32xf32>
    %72 = vector.broadcast %5 : vector<256x1xf32> to vector<256x32xf32>
    %73 = arith.mulf %71, %72 : vector<256x32xf32>
    %c0_32 = arith.constant 0 : index
    %c0_33 = arith.constant 0 : index
    %74 = vector.load %arg11[%c0_32, %c0_33] : memref<1x32xf32, #tpu.memory_space<vmem>>, vector<1x32xf32>
    %75 = vector.broadcast %74 : vector<1x32xf32> to vector<256x32xf32>
    %76 = arith.addf %73, %75 : vector<256x32xf32>
    %cst_34 = arith.constant 0.000000e+00 : f32
    %77 = vector.broadcast %cst_34 : f32 to vector<256x32xf32>
    %78 = arith.cmpf oge, %76, %77 : vector<256x32xf32>
    %cst_35 = arith.constant 0.00999999977 : f32
    %79 = vector.broadcast %cst_35 : f32 to vector<256x32xf32>
    %80 = arith.mulf %79, %76 : vector<256x32xf32>
    %81 = arith.select %78, %76, %80 : vector<256x32xi1>, vector<256x32xf32>
    %82 = arith.truncf %81 : vector<256x32xf32> to vector<256x32xbf16>
    %c0_36 = arith.constant 0 : index
    %c0_37 = arith.constant 0 : index
    %83 = vector.load %arg12[%c0_36, %c0_37] : memref<32x32xbf16, #tpu.memory_space<vmem>>, vector<32x32xbf16>
    %cst_38 = arith.constant dense<0.000000e+00> : vector<256x32xf32>
    %84 = tpu.matmul %82, %83, %cst_38 {dimension_numbers = #tpu.dot_dimension_numbers<[1], [0], [0], [1], [0, 0, 1, 1], [], []>} : vector<256x32xbf16>, vector<32x32xbf16>, vector<256x32xf32> -> vector<256x32xf32>
    %c0_39 = arith.constant 0 : index
    %c0_40 = arith.constant 0 : index
    %85 = vector.load %arg13[%c0_39, %c0_40] : memref<1x32xf32, #tpu.memory_space<vmem>>, vector<1x32xf32>
    %86 = vector.broadcast %85 : vector<1x32xf32> to vector<256x32xf32>
    %87 = arith.addf %84, %86 : vector<256x32xf32>
    %cst_41 = arith.constant 0.000000e+00 : f32
    %88 = vector.broadcast %cst_41 : f32 to vector<256x32xf32>
    %89 = arith.cmpf oge, %87, %88 : vector<256x32xf32>
    %cst_42 = arith.constant 0.00999999977 : f32
    %90 = vector.broadcast %cst_42 : f32 to vector<256x32xf32>
    %91 = arith.mulf %90, %87 : vector<256x32xf32>
    %92 = arith.select %89, %87, %91 : vector<256x32xi1>, vector<256x32xf32>
    %93 = arith.truncf %92 : vector<256x32xf32> to vector<256x32xbf16>
    %c0_43 = arith.constant 0 : index
    %c0_44 = arith.constant 0 : index
    %94 = vector.load %arg14[%c0_43, %c0_44] : memref<32x8xbf16, #tpu.memory_space<vmem>>, vector<32x8xbf16>
    %cst_45 = arith.constant dense<0.000000e+00> : vector<256x8xf32>
    %95 = tpu.matmul %93, %94, %cst_45 {dimension_numbers = #tpu.dot_dimension_numbers<[1], [0], [0], [1], [0, 0, 1, 1], [], []>} : vector<256x32xbf16>, vector<32x8xbf16>, vector<256x8xf32> -> vector<256x8xf32>
    %c0_46 = arith.constant 0 : index
    %c0_47 = arith.constant 0 : index
    %96 = vector.load %arg15[%c0_46, %c0_47] : memref<1x8xf32, #tpu.memory_space<vmem>>, vector<1x8xf32>
    %97 = vector.broadcast %96 : vector<1x8xf32> to vector<256x8xf32>
    %98 = arith.addf %95, %97 : vector<256x8xf32>
    %cst_48 = arith.constant 0.000000e+00 : f32
    %99 = vector.broadcast %cst_48 : f32 to vector<256x8xf32>
    %100 = arith.cmpf oge, %98, %99 : vector<256x8xf32>
    %cst_49 = arith.constant 0.00999999977 : f32
    %101 = vector.broadcast %cst_49 : f32 to vector<256x8xf32>
    %102 = arith.mulf %101, %98 : vector<256x8xf32>
    %103 = arith.select %100, %98, %102 : vector<256x8xi1>, vector<256x8xf32>
    %104 = vector.shape_cast %103 : vector<256x8xf32> to vector<16x16x8xf32>
    %c0_50 = arith.constant 0 : index
    %c0_51 = arith.constant 0 : index
    %105 = vector.load %arg16[%c0_50, %c0_51] : memref<1x8xf32, #tpu.memory_space<vmem>>, vector<1x8xf32>
    %106 = vector.shape_cast %105 : vector<1x8xf32> to vector<1x1x8xf32>
    %107 = vector.broadcast %106 : vector<1x1x8xf32> to vector<16x16x8xf32>
    %108 = arith.mulf %104, %107 : vector<16x16x8xf32>
    %cst_52 = arith.constant dense<0.000000e+00> : vector<16x16xf32>
    %109 = vector.multi_reduction <add>, %108, %cst_52 [2] : vector<16x16x8xf32> to vector<16x16xf32>
    %c0_53 = arith.constant 0 : index
    %c0_54 = arith.constant 0 : index
    %110 = vector.load %arg17[%c0_53, %c0_54] : memref<1x1xf32, #tpu.memory_space<vmem>>, vector<1x1xf32>
    %111 = vector.broadcast %110 : vector<1x1xf32> to vector<16x16xf32>
    %112 = arith.addf %109, %111 : vector<16x16xf32>
    %c0_55 = arith.constant 0 : index
    %c0_56 = arith.constant 0 : index
    %113 = vector.load %arg3[%c0_55, %c0_56] : memref<16x16xi32, #tpu.memory_space<vmem>>, vector<16x16xi32>
    %c0_i32 = arith.constant 0 : i32
    %114 = vector.broadcast %c0_i32 : i32 to vector<16x16xi32>
    %115 = arith.cmpi ne, %113, %114 : vector<16x16xi32>
    %cst_57 = arith.constant -1.000000e+30 : f32
    %116 = vector.broadcast %cst_57 : f32 to vector<16x16xf32>
    %117 = arith.select %115, %112, %116 : vector<16x16xi1>, vector<16x16xf32>
    %cst_58 = arith.constant dense<0xFF800000> : vector<16xf32>
    %118 = vector.multi_reduction <maximumf>, %117, %cst_58 [1] : vector<16x16xf32> to vector<16xf32>
    %119 = vector.shape_cast %118 : vector<16xf32> to vector<16x1xf32>
    %120 = vector.broadcast %119 : vector<16x1xf32> to vector<16x16xf32>
    %121 = arith.subf %117, %120 : vector<16x16xf32>
    %122 = math.exp %121 : vector<16x16xf32>
    %cst_59 = arith.constant dense<0.000000e+00> : vector<16xf32>
    %123 = vector.multi_reduction <add>, %122, %cst_59 [1] : vector<16x16xf32> to vector<16xf32>
    %124 = vector.shape_cast %123 : vector<16xf32> to vector<16x1xf32>
    %125 = vector.broadcast %124 : vector<16x1xf32> to vector<16x16xf32>
    %126 = arith.divf %122, %125 : vector<16x16xf32>
    %127 = vector.extract_strided_slice %126 {offsets = [0, 0], sizes = [1, 16], strides = [1, 1]} : vector<16x16xf32> to vector<1x16xf32>
    %128 = vector.shape_cast %127 : vector<1x16xf32> to vector<1x1x16xf32>
    %c0_60 = arith.constant 0 : index
    %c0_61 = arith.constant 0 : index
    %c0_62 = arith.constant 0 : index
    %129 = vector.load %arg18[%c0_60, %c0_61, %c0_62] : memref<1x1x256xf32, #tpu.memory_space<vmem>>, vector<1x1x16xf32>
    tpu.vector_store %arg18[%c0_60, %c0_61, %c0_62], %128 {strides = array<i32>} : memref<1x1x256xf32, #tpu.memory_space<vmem>>, vector<1x1x16xf32>,
    %130 = vector.extract_strided_slice %126 {offsets = [1, 0], sizes = [1, 16], strides = [1, 1]} : vector<16x16xf32> to vector<1x16xf32>
    %131 = vector.shape_cast %130 : vector<1x16xf32> to vector<1x1x16xf32>
    %c0_63 = arith.constant 0 : index
    %c0_64 = arith.constant 0 : index
    %c16 = arith.constant 16 : index
    %132 = vector.load %arg18[%c0_63, %c0_64, %c16] : memref<1x1x256xf32, #tpu.memory_space<vmem>>, vector<1x1x16xf32>
    tpu.vector_store %arg18[%c0_63, %c0_64, %c16], %131 {strides = array<i32>} : memref<1x1x256xf32, #tpu.memory_space<vmem>>, vector<1x1x16xf32>,
    %133 = vector.extract_strided_slice %126 {offsets = [2, 0], sizes = [1, 16], strides = [1, 1]} : vector<16x16xf32> to vector<1x16xf32>
    %134 = vector.shape_cast %133 : vector<1x16xf32> to vector<1x1x16xf32>
    %c0_65 = arith.constant 0 : index
    %c0_66 = arith.constant 0 : index
    %c32 = arith.constant 32 : index
    %135 = vector.load %arg18[%c0_65, %c0_66, %c32] : memref<1x1x256xf32, #tpu.memory_space<vmem>>, vector<1x1x16xf32>
    tpu.vector_store %arg18[%c0_65, %c0_66, %c32], %134 {strides = array<i32>} : memref<1x1x256xf32, #tpu.memory_space<vmem>>, vector<1x1x16xf32>,
    %136 = vector.extract_strided_slice %126 {offsets = [3, 0], sizes = [1, 16], strides = [1, 1]} : vector<16x16xf32> to vector<1x16xf32>
    %137 = vector.shape_cast %136 : vector<1x16xf32> to vector<1x1x16xf32>
    %c0_67 = arith.constant 0 : index
    %c0_68 = arith.constant 0 : index
    %c48 = arith.constant 48 : index
    %138 = vector.load %arg18[%c0_67, %c0_68, %c48] : memref<1x1x256xf32, #tpu.memory_space<vmem>>, vector<1x1x16xf32>
    tpu.vector_store %arg18[%c0_67, %c0_68, %c48], %137 {strides = array<i32>} : memref<1x1x256xf32, #tpu.memory_space<vmem>>, vector<1x1x16xf32>,
    %139 = vector.extract_strided_slice %126 {offsets = [4, 0], sizes = [1, 16], strides = [1, 1]} : vector<16x16xf32> to vector<1x16xf32>
    %140 = vector.shape_cast %139 : vector<1x16xf32> to vector<1x1x16xf32>
    %c0_69 = arith.constant 0 : index
    %c0_70 = arith.constant 0 : index
    %c64 = arith.constant 64 : index
    %141 = vector.load %arg18[%c0_69, %c0_70, %c64] : memref<1x1x256xf32, #tpu.memory_space<vmem>>, vector<1x1x16xf32>
    tpu.vector_store %arg18[%c0_69, %c0_70, %c64], %140 {strides = array<i32>} : memref<1x1x256xf32, #tpu.memory_space<vmem>>, vector<1x1x16xf32>,
    %142 = vector.extract_strided_slice %126 {offsets = [5, 0], sizes = [1, 16], strides = [1, 1]} : vector<16x16xf32> to vector<1x16xf32>
    %143 = vector.shape_cast %142 : vector<1x16xf32> to vector<1x1x16xf32>
    %c0_71 = arith.constant 0 : index
    %c0_72 = arith.constant 0 : index
    %c80 = arith.constant 80 : index
    %144 = vector.load %arg18[%c0_71, %c0_72, %c80] : memref<1x1x256xf32, #tpu.memory_space<vmem>>, vector<1x1x16xf32>
    tpu.vector_store %arg18[%c0_71, %c0_72, %c80], %143 {strides = array<i32>} : memref<1x1x256xf32, #tpu.memory_space<vmem>>, vector<1x1x16xf32>,
    %145 = vector.extract_strided_slice %126 {offsets = [6, 0], sizes = [1, 16], strides = [1, 1]} : vector<16x16xf32> to vector<1x16xf32>
    %146 = vector.shape_cast %145 : vector<1x16xf32> to vector<1x1x16xf32>
    %c0_73 = arith.constant 0 : index
    %c0_74 = arith.constant 0 : index
    %c96 = arith.constant 96 : index
    %147 = vector.load %arg18[%c0_73, %c0_74, %c96] : memref<1x1x256xf32, #tpu.memory_space<vmem>>, vector<1x1x16xf32>
    tpu.vector_store %arg18[%c0_73, %c0_74, %c96], %146 {strides = array<i32>} : memref<1x1x256xf32, #tpu.memory_space<vmem>>, vector<1x1x16xf32>,
    %148 = vector.extract_strided_slice %126 {offsets = [7, 0], sizes = [1, 16], strides = [1, 1]} : vector<16x16xf32> to vector<1x16xf32>
    %149 = vector.shape_cast %148 : vector<1x16xf32> to vector<1x1x16xf32>
    %c0_75 = arith.constant 0 : index
    %c0_76 = arith.constant 0 : index
    %c112 = arith.constant 112 : index
    %150 = vector.load %arg18[%c0_75, %c0_76, %c112] : memref<1x1x256xf32, #tpu.memory_space<vmem>>, vector<1x1x16xf32>
    tpu.vector_store %arg18[%c0_75, %c0_76, %c112], %149 {strides = array<i32>} : memref<1x1x256xf32, #tpu.memory_space<vmem>>, vector<1x1x16xf32>,
    %151 = vector.extract_strided_slice %126 {offsets = [8, 0], sizes = [1, 16], strides = [1, 1]} : vector<16x16xf32> to vector<1x16xf32>
    %152 = vector.shape_cast %151 : vector<1x16xf32> to vector<1x1x16xf32>
    %c0_77 = arith.constant 0 : index
    %c0_78 = arith.constant 0 : index
    %c128 = arith.constant 128 : index
    %153 = vector.load %arg18[%c0_77, %c0_78, %c128] : memref<1x1x256xf32, #tpu.memory_space<vmem>>, vector<1x1x16xf32>
    tpu.vector_store %arg18[%c0_77, %c0_78, %c128], %152 {strides = array<i32>} : memref<1x1x256xf32, #tpu.memory_space<vmem>>, vector<1x1x16xf32>,
    %154 = vector.extract_strided_slice %126 {offsets = [9, 0], sizes = [1, 16], strides = [1, 1]} : vector<16x16xf32> to vector<1x16xf32>
    %155 = vector.shape_cast %154 : vector<1x16xf32> to vector<1x1x16xf32>
    %c0_79 = arith.constant 0 : index
    %c0_80 = arith.constant 0 : index
    %c144 = arith.constant 144 : index
    %156 = vector.load %arg18[%c0_79, %c0_80, %c144] : memref<1x1x256xf32, #tpu.memory_space<vmem>>, vector<1x1x16xf32>
    tpu.vector_store %arg18[%c0_79, %c0_80, %c144], %155 {strides = array<i32>} : memref<1x1x256xf32, #tpu.memory_space<vmem>>, vector<1x1x16xf32>,
    %157 = vector.extract_strided_slice %126 {offsets = [10, 0], sizes = [1, 16], strides = [1, 1]} : vector<16x16xf32> to vector<1x16xf32>
    %158 = vector.shape_cast %157 : vector<1x16xf32> to vector<1x1x16xf32>
    %c0_81 = arith.constant 0 : index
    %c0_82 = arith.constant 0 : index
    %c160 = arith.constant 160 : index
    %159 = vector.load %arg18[%c0_81, %c0_82, %c160] : memref<1x1x256xf32, #tpu.memory_space<vmem>>, vector<1x1x16xf32>
    tpu.vector_store %arg18[%c0_81, %c0_82, %c160], %158 {strides = array<i32>} : memref<1x1x256xf32, #tpu.memory_space<vmem>>, vector<1x1x16xf32>,
    %160 = vector.extract_strided_slice %126 {offsets = [11, 0], sizes = [1, 16], strides = [1, 1]} : vector<16x16xf32> to vector<1x16xf32>
    %161 = vector.shape_cast %160 : vector<1x16xf32> to vector<1x1x16xf32>
    %c0_83 = arith.constant 0 : index
    %c0_84 = arith.constant 0 : index
    %c176 = arith.constant 176 : index
    %162 = vector.load %arg18[%c0_83, %c0_84, %c176] : memref<1x1x256xf32, #tpu.memory_space<vmem>>, vector<1x1x16xf32>
    tpu.vector_store %arg18[%c0_83, %c0_84, %c176], %161 {strides = array<i32>} : memref<1x1x256xf32, #tpu.memory_space<vmem>>, vector<1x1x16xf32>,
    %163 = vector.extract_strided_slice %126 {offsets = [12, 0], sizes = [1, 16], strides = [1, 1]} : vector<16x16xf32> to vector<1x16xf32>
    %164 = vector.shape_cast %163 : vector<1x16xf32> to vector<1x1x16xf32>
    %c0_85 = arith.constant 0 : index
    %c0_86 = arith.constant 0 : index
    %c192 = arith.constant 192 : index
    %165 = vector.load %arg18[%c0_85, %c0_86, %c192] : memref<1x1x256xf32, #tpu.memory_space<vmem>>, vector<1x1x16xf32>
    tpu.vector_store %arg18[%c0_85, %c0_86, %c192], %164 {strides = array<i32>} : memref<1x1x256xf32, #tpu.memory_space<vmem>>, vector<1x1x16xf32>,
    %166 = vector.extract_strided_slice %126 {offsets = [13, 0], sizes = [1, 16], strides = [1, 1]} : vector<16x16xf32> to vector<1x16xf32>
    %167 = vector.shape_cast %166 : vector<1x16xf32> to vector<1x1x16xf32>
    %c0_87 = arith.constant 0 : index
    %c0_88 = arith.constant 0 : index
    %c208 = arith.constant 208 : index
    %168 = vector.load %arg18[%c0_87, %c0_88, %c208] : memref<1x1x256xf32, #tpu.memory_space<vmem>>, vector<1x1x16xf32>
    tpu.vector_store %arg18[%c0_87, %c0_88, %c208], %167 {strides = array<i32>} : memref<1x1x256xf32, #tpu.memory_space<vmem>>, vector<1x1x16xf32>,
    %169 = vector.extract_strided_slice %126 {offsets = [14, 0], sizes = [1, 16], strides = [1, 1]} : vector<16x16xf32> to vector<1x16xf32>
    %170 = vector.shape_cast %169 : vector<1x16xf32> to vector<1x1x16xf32>
    %c0_89 = arith.constant 0 : index
    %c0_90 = arith.constant 0 : index
    %c224 = arith.constant 224 : index
    %171 = vector.load %arg18[%c0_89, %c0_90, %c224] : memref<1x1x256xf32, #tpu.memory_space<vmem>>, vector<1x1x16xf32>
    tpu.vector_store %arg18[%c0_89, %c0_90, %c224], %170 {strides = array<i32>} : memref<1x1x256xf32, #tpu.memory_space<vmem>>, vector<1x1x16xf32>,
    %172 = vector.extract_strided_slice %126 {offsets = [15, 0], sizes = [1, 16], strides = [1, 1]} : vector<16x16xf32> to vector<1x16xf32>
    %173 = vector.shape_cast %172 : vector<1x16xf32> to vector<1x1x16xf32>
    %c0_91 = arith.constant 0 : index
    %c0_92 = arith.constant 0 : index
    %c240 = arith.constant 240 : index
    %174 = vector.load %arg18[%c0_91, %c0_92, %c240] : memref<1x1x256xf32, #tpu.memory_space<vmem>>, vector<1x1x16xf32>
    tpu.vector_store %arg18[%c0_91, %c0_92, %c240], %173 {strides = array<i32>} : memref<1x1x256xf32, #tpu.memory_space<vmem>>, vector<1x1x16xf32>,
    return
  }
  func.func @transform_0(%arg0: i32) -> (i32, i32, i32) {
    %c0_i32 = arith.constant 0 : i32
    %c0_i32_0 = arith.constant 0 : i32
    %c0_i32_1 = arith.constant 0 : i32
    return %arg0, %c0_i32, %c0_i32_0 : i32, i32, i32
  }
  func.func @transform_1(%arg0: i32) -> (i32, i32) {
    %c0_i32 = arith.constant 0 : i32
    %c0_i32_0 = arith.constant 0 : i32
    return %arg0, %c0_i32 : i32, i32
  }
  func.func @transform_2(%arg0: i32) -> (i32, i32) {
    %c0_i32 = arith.constant 0 : i32
    %c0_i32_0 = arith.constant 0 : i32
    return %arg0, %c0_i32 : i32, i32
  }
  func.func @transform_3(%arg0: i32) -> (i32, i32) {
    %c0_i32 = arith.constant 0 : i32
    %c0_i32_0 = arith.constant 0 : i32
    %c0_i32_1 = arith.constant 0 : i32
    return %c0_i32, %c0_i32_0 : i32, i32
  }
  func.func @transform_4(%arg0: i32) -> (i32, i32) {
    %c0_i32 = arith.constant 0 : i32
    %c0_i32_0 = arith.constant 0 : i32
    %c0_i32_1 = arith.constant 0 : i32
    return %c0_i32, %c0_i32_0 : i32, i32
  }
  func.func @transform_5(%arg0: i32) -> (i32, i32) {
    %c0_i32 = arith.constant 0 : i32
    %c0_i32_0 = arith.constant 0 : i32
    %c0_i32_1 = arith.constant 0 : i32
    return %c0_i32, %c0_i32_0 : i32, i32
  }
  func.func @transform_6(%arg0: i32) -> (i32, i32) {
    %c0_i32 = arith.constant 0 : i32
    %c0_i32_0 = arith.constant 0 : i32
    %c0_i32_1 = arith.constant 0 : i32
    return %c0_i32, %c0_i32_0 : i32, i32
  }
  func.func @transform_7(%arg0: i32) -> (i32, i32) {
    %c0_i32 = arith.constant 0 : i32
    %c0_i32_0 = arith.constant 0 : i32
    %c0_i32_1 = arith.constant 0 : i32
    return %c0_i32, %c0_i32_0 : i32, i32
  }
  func.func @transform_8(%arg0: i32) -> (i32, i32) {
    %c0_i32 = arith.constant 0 : i32
    %c0_i32_0 = arith.constant 0 : i32
    %c0_i32_1 = arith.constant 0 : i32
    return %c0_i32, %c0_i32_0 : i32, i32
  }
  func.func @transform_9(%arg0: i32) -> (i32, i32) {
    %c0_i32 = arith.constant 0 : i32
    %c0_i32_0 = arith.constant 0 : i32
    %c0_i32_1 = arith.constant 0 : i32
    return %c0_i32, %c0_i32_0 : i32, i32
  }
  func.func @transform_10(%arg0: i32) -> (i32, i32) {
    %c0_i32 = arith.constant 0 : i32
    %c0_i32_0 = arith.constant 0 : i32
    %c0_i32_1 = arith.constant 0 : i32
    return %c0_i32, %c0_i32_0 : i32, i32
  }
  func.func @transform_11(%arg0: i32) -> (i32, i32) {
    %c0_i32 = arith.constant 0 : i32
    %c0_i32_0 = arith.constant 0 : i32
    %c0_i32_1 = arith.constant 0 : i32
    return %c0_i32, %c0_i32_0 : i32, i32
  }
  func.func @transform_12(%arg0: i32) -> (i32, i32) {
    %c0_i32 = arith.constant 0 : i32
    %c0_i32_0 = arith.constant 0 : i32
    %c0_i32_1 = arith.constant 0 : i32
    return %c0_i32, %c0_i32_0 : i32, i32
  }
  func.func @transform_13(%arg0: i32) -> (i32, i32) {
    %c0_i32 = arith.constant 0 : i32
    %c0_i32_0 = arith.constant 0 : i32
    %c0_i32_1 = arith.constant 0 : i32
    return %c0_i32, %c0_i32_0 : i32, i32
  }
  func.func @transform_14(%arg0: i32) -> (i32, i32) {
    %c0_i32 = arith.constant 0 : i32
    %c0_i32_0 = arith.constant 0 : i32
    %c0_i32_1 = arith.constant 0 : i32
    return %c0_i32, %c0_i32_0 : i32, i32
  }
  func.func @transform_15(%arg0: i32) -> (i32, i32) {
    %c0_i32 = arith.constant 0 : i32
    %c0_i32_0 = arith.constant 0 : i32
    %c0_i32_1 = arith.constant 0 : i32
    return %c0_i32, %c0_i32_0 : i32, i32
  }
  func.func @transform_16(%arg0: i32) -> (i32, i32) {
    %c0_i32 = arith.constant 0 : i32
    %c0_i32_0 = arith.constant 0 : i32
    %c0_i32_1 = arith.constant 0 : i32
    return %c0_i32, %c0_i32_0 : i32, i32
  }
  func.func @transform_17(%arg0: i32) -> (i32, i32, i32) {
    %c0_i32 = arith.constant 0 : i32
    %c0_i32_0 = arith.constant 0 : i32
    %c0_i32_1 = arith.constant 0 : i32
    return %arg0, %c0_i32, %c0_i32_0 : i32, i32, i32
  }
}

</mosaic_0001>

<bundles_post_ra>
// kernel: tpu_custom_call.1
= control target key start
LH: loop header
LB: loop body
LE: loop exit
PB: predicated region body
PF: predicated region fallthrough
CT: control target
= control target key end

     0   :  { %s9977_s0 = inlined_call_operand.vmem [shape: bf16[32,16,16], index: 0, kind: input, shape index: {}]   ;;  %s9978_s1 = inlined_call_operand.vmem [shape: bf16[512,8], index: 1, kind: input, shape index: {}]   ;;  %s9979_s2 = inlined_call_operand.vmem [shape: s32[32,16], index: 2, kind: input, shape index: {}]   ;;  %s9980_s3 = inlined_call_operand.vmem [shape: bf16[8,32], index: 3, kind: input, shape index: {}]   ;;  %s9981_s4 = inlined_call_operand.vmem [shape: f32[1,32], index: 4, kind: input, shape index: {}]   ;;  %s9982_s5 = inlined_call_operand.vmem [shape: bf16[32,32], index: 5, kind: input, shape index: {}]   ;;  %s9983_s6 = inlined_call_operand.vmem [shape: f32[1,32], index: 6, kind: input, shape index: {}]   ;;  %s9984_s7 = inlined_call_operand.vmem [shape: bf16[32,32], index: 7, kind: input, shape index: {}]   ;;  %s9985_s8 = inlined_call_operand.vmem [shape: f32[1,32], index: 8, kind: input, shape index: {}]   ;;  %s9986_s9 = inlined_call_operand.vmem [shape: bf16[32,32], index: 9, kind: input, shape index: {}]   ;;  %s9987_s10 = inlined_call_operand.vmem [shape: f32[1,32], index: 10, kind: input, shape index: {}]   ;;  %s9988_s11 = inlined_call_operand.vmem [shape: bf16[32,32], index: 11, kind: input, shape index: {}]   ;;  %s9989_s12 = inlined_call_operand.vmem [shape: f32[1,32], index: 12, kind: input, shape index: {}]   ;;  %s9990_s13 = inlined_call_operand.vmem [shape: bf16[32,8], index: 13, kind: input, shape index: {}]   ;;  %s9991_s14 = inlined_call_operand.vmem [shape: f32[1,8], index: 14, kind: input, shape index: {}]   ;;  %s9992_s15 = inlined_call_operand.vmem [shape: f32[1,8], index: 15, kind: input, shape index: {}]   ;;  %s9993_s16 = inlined_call_operand.<no memory space> [shape: f32[1,1], index: 16, kind: input, shape index: {}]   ;;  %s9994_s17 = inlined_call_operand.hbm [shape: f32[2,1,256], index: 17, kind: output, shape index: {}]  }
   0x1   :  { %10038 = sst [smem:[#allocation23_spill]] %s9977_s0  ;;  %v22_v0 = vstv %s9993_s16 }
   0x2   :  { %10039 = sst [smem:[#allocation24_spill]] %s9978_s1  ;;  %23 = vst [vmem:[#allocation2] sm:$0x1] %v22_v0 }
   0x3   :  { %10040 = sst [smem:[#allocation25_spill]] %s9979_s2 }
   0x4   :  { %10041 = sst [smem:[#allocation26_spill]] %s9980_s3 }
   0x5   :  { %24 = vsyncpa [#allocation4], 0 }
   0x6   :  { %26 = vsyncpa [#allocation4 + $0x1], 0  ;;  %s8243_s26 = smov 0   ;;  %s8245_s27 = smov 0  }
   0x7   :  { %s8247_s28 = smov 0   ;;  %s8249_s29 = smov 0  }
   0x8 LB: > { %10042 = sst [smem:[#allocation6_spill]] %s8132_s28  ;;  %s8264_s16 = sadd.s32 4294967295, %s8136_s29   ;;  %s8136_s29 = sphi %s8249_s29, %s10143_s29   ;;  %s8132_s28 = sphi %s8247_s28, %s10140_s28   ;;  %s8128_s27 = sphi %s8245_s27, %s10142_s27   ;;  %s8124_s26 = sphi %s8243_s26, %s10141_s26  }
   0x9   : > { %s6832_s0 = sadd.s32 4294967294, %s8136_s29   ;;  %s8268_s30 = sadd.s32 1, %s8136_s29  }
   0xa   : > { %s411_s18 = sadd.s32 1, %s8132_s28  ;;  %s408_s19 = ssub.s32 %s8136_s29, %s8268_s30 }
   0xb   : > { %p421_p0 = scmp.ne.s32.totalorder %s8132_s28, %s8128_s27  ;;  %p409_p1 = scmp.eq.s32.totalorder %s408_s19, 0 }
   0xc   : > { %p422_p2 = scmp.eq.s32.totalorder %s8264_s16, 1  ;;  %p427_p3 = scmp.ne.s32.totalorder %s8128_s27, %s8124_s26 }
   0xd   : > { %p428_p4 = scmp.eq.s32.totalorder %s6832_s0, 1  ;;  %p6835_p7 = scmp.ge.s32.totalorder %s8136_s29, 1 }
   0xe   : > { %s8279_s1 = scalar_select %p409_p1, %s8132_s28, %s411_s18  }
   0xf   : > { %p8281_p5 = por %p422_p2, %p421_p0  ;;  %p8285_p6 = por %p428_p4, %p427_p3 }
  0x10   : > { %10043 = sst [smem:[#allocation7_spill]] %s8279_s1  ;;  %p516_p8 = scmp.lt.s32.totalorder %s8136_s29, 3 }
  0x12   : > { %p517_p9 = pnand %p6835_p7, %p516_p8 }
  0x14   : > { %520 = sbr.rel (%p517_p9) target bundleno = 2853 (0xb25), region = 88 }
  0x19   : > { %s10046_s3 = sld [smem:[#allocation26_spill]]  ;;  %vm954_vm0 = vcmask 1043456   ;;  %s8295_s24 = sshll.u32 %s8264_s16, 5  ;;  %vm905_vm1 = vcmask 64512   ;;  %vm663_vm2 = vcmask 130048   ;;  %vm8139_vm3 = vmmov 0  }
  0x1a   : > { %p587_p10 = scmp.lt.s32.totalorder %s8295_s24, 63  ;;  %s6837_s25 = sshll.u32 %s8264_s16, 4  ;;  %vm2150_vm6 = vcmask 261120  }
  0x1b   : > { %p580_p11 = scmp.lt.s32.totalorder %s6837_s25, 31  ;;  %s10047_s28 = sld [smem:[#allocation24_spill]] }
  0x1c   : > { %s588_s0 = scalar_select %p587_p10, %s8295_s24, 63 }
  0x1d   : > { %s10145_s25 = smov (!%p580_p11, %s6837_s25), 31  ;;  %s10102_s2 = sld [smem:[#allocation25_spill]] }
  0x1e   : > { %s6841_s18 = sshll.u32 %s588_s0, 2  ;;  %s7059_s1 = sshll.u32 %s10145_s25, 3 }
  0x1f   : > { %v824_v1 = vld [vmem:[%s10046_s3] sm:$0xf]  ;;  %s10048_s0 = sld [smem:[#allocation23_spill]]  ;;  %s8142_s19 = smov 64  }
  0x20   : > { %7894 = vmatprep.subr.msk.bf16.mxu0 %vm954_vm0, %v824_v1  ;;  %v956_v2 = vsel %vm954_vm0, %v824_v1, 0 }
  0x21   : > { %7297 = vmatpush3.bf16.msra.mxu0 %v956_v2  ;;  %s8303_s22 = scalar_lea.vmem %s10047_s28, %s6841_s18  ;;  %s8146_s28 = smov 80  }
  0x22   : > { %v7946_v3 = vld [vmem:[%s8303_s22] sm:$0xff]   ;;  %v7947_v4 = vld [vmem:[%s8303_s22 + $0x8] sm:$0xff]   ;;  %v7948_v5 = vld [vmem:[%s8303_s22 + $0x10] sm:$0xff]  }
  0x23   : > { %7298 = vmatprep.mubr.msk.bf16.mxu0 %vm905_vm1, %v7946_v3  ;;  %v7949_v6 = vld [vmem:[%s8303_s22 + $0x18] sm:$0xff]   ;;  %v7950_v7 = vld [vmem:[%s8303_s22 + $0x20] sm:$0xff]   ;;  %v7951_v15 = vld [vmem:[%s8303_s22 + $0x28] sm:$0xff]  }
  0x24   : > { %7299 = vmatmul.mubr.msk.bf16.vlgmr.msra.gmra.mxu0 %vm905_vm1, %v7947_v4  ;;  %v7952_v18 = vld [vmem:[%s8303_s22 + $0x30] sm:$0xff]   ;;  %v7953_v29 = vld [vmem:[%s8303_s22 + $0x38] sm:$0xff]   ;;  %v7954_v30 = vld [vmem:[%s8303_s22 + $0x40] sm:$0xff]  }
  0x25   : > { %7302 = vmatprep.mubr.msk.bf16.mxu0 %vm905_vm1, %v7948_v5  ;;  %s8316_s18 = scalar_lea.vmem %s10048_s0, %s7059_s1  ;;  %v7955_v41 = vld [vmem:[%s8303_s22 + $0x48] sm:$0xff]   ;;  %v7956_v42 = vld [vmem:[%s8303_s22 + $0x50] sm:$0xff]   ;;  %v7957_v53 = vld [vmem:[%s8303_s22 + $0x58] sm:$0xff]   ;;  %s576_s0 = sand.u32 1, %s8128_s27  }
  0x26   : > { %v8321_v8 = vld [vmem:[%s8316_s18 + $0x8] sm:$0xff]   ;;  %v8324_v9 = vld [vmem:[%s8316_s18] sm:$0xff]   ;;  %v8331_v14 = vld [vmem:[%s8316_s18 + $0x10] sm:$0xff]  }
  0x27   : > { %v633_v10 = vunpack.c.l.bf16 %v8321_v8  ;;  %v631_v11 = vunpack.c.l.bf16 %v8324_v9  ;;  %v634_v12 = vunpack.c.h.bf16 %v8321_v8  ;;  %v632_v13 = vunpack.c.h.bf16 %v8324_v9  ;;  %v8342_v23 = vld [vmem:[%s8316_s18 + $0x18] sm:$0xff]   ;;  %v8351_v28 = vld [vmem:[%s8316_s18 + $0x20] sm:$0xff]   ;;  %v8360_v35 = vld [vmem:[%s8316_s18 + $0x28] sm:$0xff]  }
  0x28   : > { %v636_v20 = vunpack.c.h.bf16 %v8331_v14  ;;  %v635_v22 = vunpack.c.l.bf16 %v8331_v14  ;;  %v638_v25 = vunpack.c.h.bf16 %v8342_v23  ;;  %v637_v27 = vunpack.c.l.bf16 %v8342_v23  ;;  %v8369_v40 = vld [vmem:[%s8316_s18 + $0x30] sm:$0xff]   ;;  %v8378_v47 = vld [vmem:[%s8316_s18 + $0x38] sm:$0xff]   ;;  %v8387_v52 = vld [vmem:[%s8316_s18 + $0x40] sm:$0xff]  }
  0x29   : > { %v670_v16 = vsel %vm663_vm2, %v633_v10, 0.0  ;;  %v664_v17 = vsel %vm663_vm2, %v631_v11, 0.0  ;;  %v673_v19 = vsel %vm663_vm2, %v634_v12, 0.0  ;;  %v667_v21 = vsel %vm663_vm2, %v632_v13, 0.0  ;;  %10049 = vst [vmem:[#allocation8_spill] sm:$0xff] %v8369_v40  ;;  %10050 = vst [vmem:[#allocation9_spill] sm:$0xff] %v8378_v47 }
  0x2a   : > { %671 = vadd.xlane.f32.xlu1 %v670_v16  ;;  %665 = vadd.xlane.f32.xlu0 %v664_v17  ;;  %v679_v24 = vsel %vm663_vm2, %v636_v20, 0.0  ;;  %v676_v26 = vsel %vm663_vm2, %v635_v22, 0.0  ;;  %v685_v31 = vsel %vm663_vm2, %v638_v25, 0.0  ;;  %v640_v32 = vunpack.c.h.bf16 %v8351_v28  ;;  %10051 = vst [vmem:[#allocation10_spill] sm:$0xff] %v8387_v52  ;;  %v7959_v54 = vld [vmem:[%s8303_s22 + $0x60] sm:$0xff]   ;;  %v8396_v59 = vld [vmem:[%s8316_s18 + $0x48] sm:$0xff]  }
  0x2b   : > { %v682_v33 = vsel %vm663_vm2, %v637_v27, 0.0  ;;  %v639_v34 = vunpack.c.l.bf16 %v8351_v28  ;;  %v642_v37 = vunpack.c.h.bf16 %v8360_v35  ;;  %v641_v39 = vunpack.c.l.bf16 %v8360_v35  ;;  %10052 = vst [vmem:[#allocation11_spill] sm:$0xff] %v8396_v59  ;;  %v8405_v0 = vld [vmem:[%s8316_s18 + $0x50] sm:$0xff]   ;;  %v7961_v1 = vld [vmem:[%s8303_s22 + $0x68] sm:$0xff]   ;;  %v7964_v16 = vld [vmem:[%s8303_s22 + $0x78] sm:$0xff]  }
  0x2c   : > { %7303 = vmatmul.mubr.msk.bf16.gmra.mxu0 %vm905_vm1, %v7949_v6  ;;  %v691_v36 = vsel %vm663_vm2, %v640_v32, 0.0  ;;  %v644_v44 = vunpack.c.h.bf16 %v8369_v40  ;;  %v643_v46 = vunpack.c.l.bf16 %v8369_v40  ;;  %v646_v49 = vunpack.c.h.bf16 %v8378_v47  ;;  %10053 = vst [vmem:[#allocation12_spill] sm:$0xff] %v8405_v0  ;;  %v7963_v2 = vld [vmem:[%s8303_s22 + $0x70] sm:$0xff]   ;;  %s6842_s22 = sshll.u32 %s8264_s16, 1  ;;  %s8145_s16 = smov 48  }
  0x2d   : > { %7306 = vmatprep.mubr.msk.bf16.mxu0 %vm905_vm1, %v7950_v7  ;;  %v688_v38 = vsel %vm663_vm2, %v639_v34, 0.0  ;;  %v697_v43 = vsel %vm663_vm2, %v642_v37, 0.0  ;;  %v694_v45 = vsel %vm663_vm2, %v641_v39, 0.0  ;;  %v645_v51 = vunpack.c.l.bf16 %v8378_v47  ;;  %v8414_v7 = vld [vmem:[%s8316_s18 + $0x58] sm:$0xff]   ;;  %v8439_v27 = vld [vmem:[%s8316_s18 + $0x70] sm:$0xff]   ;;  %p593_p12 = scmp.lt.s32.totalorder %s6842_s22, 3 }
  0x2e   : > { %674 = vadd.xlane.f32.xlu1 %v673_v19  ;;  %668 = vadd.xlane.f32.xlu0 %v667_v21  ;;  %v703_v48 = vsel %vm663_vm2, %v644_v44, 0.0  ;;  %v700_v50 = vsel %vm663_vm2, %v643_v46, 0.0  ;;  %v709_v55 = vsel %vm663_vm2, %v646_v49, 0.0  ;;  %v648_v56 = vunpack.c.h.bf16 %v8387_v52  ;;  %10054 = vst [vmem:[#allocation13_spill] sm:$0xff] %v8414_v7  ;;  %v8431_v21 = vld [vmem:[%s8316_s18 + $0x68] sm:$0xff]   ;;  %10057 = vst [vmem:[#allocation16_spill] sm:$0xff] %v8439_v27 }
  0x2f   : > { %v706_v57 = vsel %vm663_vm2, %v645_v51, 0.0  ;;  %v647_v58 = vunpack.c.l.bf16 %v8387_v52  ;;  %v650_v61 = vunpack.c.h.bf16 %v8396_v59  ;;  %v649_v63 = vunpack.c.l.bf16 %v8396_v59  ;;  %10056 = vst [vmem:[#allocation15_spill] sm:$0xff] %v8431_v21  ;;  %s10147_s22 = smov (!%p593_p12, %s6842_s22), 3 }
  0x30   : > { %v715_v60 = vsel %vm663_vm2, %v648_v56, 0.0  ;;  %v652_v4 = vunpack.c.h.bf16 %v8405_v0  ;;  %v651_v6 = vunpack.c.l.bf16 %v8405_v0  ;;  %v654_v11 = vunpack.c.h.bf16 %v8414_v7  ;;  %s6843_s1 = sshll.u32 %s10147_s22, 3  ;;  %s8143_s22 = smov 16  }
  0x31   : > { %v712_v62 = vsel %vm663_vm2, %v647_v58, 0.0  ;;  %v721_v3 = vsel %vm663_vm2, %v650_v61, 0.0  ;;  %v718_v5 = vsel %vm663_vm2, %v649_v63, 0.0  ;;  %v653_v13 = vunpack.c.l.bf16 %v8414_v7  ;;  %s9613_s23 = scalar_lea.vmem %s10102_s2, %s6843_s1  ;;  %s8144_s1 = smov 32  }
  0x32   : > { %680 = vadd.xlane.f32.xlu1 %v679_v24  ;;  %677 = vadd.xlane.f32.xlu0 %v676_v26  ;;  %v727_v10 = vsel %vm663_vm2, %v652_v4, 0.0  ;;  %v724_v12 = vsel %vm663_vm2, %v651_v6, 0.0  ;;  %v733_v17 = vsel %vm663_vm2, %v654_v11, 0.0  ;;  %v658_v24 = vunpack.c.h.bf16 %v8431_v21 }
  0x33   : > { %v730_v19 = vsel %vm663_vm2, %v653_v13, 0.0  ;;  %v657_v26 = vunpack.c.l.bf16 %v8431_v21  ;;  %v659_v32 = vunpack.c.l.bf16 %v8439_v27 }
  0x34   : > { %7307 = vmatmul.mubr.msk.bf16.gmra.mxu0 %vm905_vm1, %v7951_v15  ;;  %v8423_v15 = vld [vmem:[%s8316_s18 + $0x60] sm:$0xff]  }
  0x35   : > { %7310 = vmatprep.mubr.msk.bf16.mxu0 %vm905_vm1, %v7952_v18  ;;  %10055 = vst [vmem:[#allocation14_spill] sm:$0xff] %v8423_v15  ;;  %v656_v18 = vunpack.c.h.bf16 %v8423_v15  ;;  %v655_v20 = vunpack.c.l.bf16 %v8423_v15  ;;  %v748_v37 = vsel %vm663_vm2, %v659_v32, 0.0 }
  0x36   : > { %686 = vadd.xlane.f32.xlu1 %v685_v31  ;;  %683 = vadd.xlane.f32.xlu0 %v682_v33  ;;  %v742_v31 = vsel %vm663_vm2, %v657_v26, 0.0  ;;  %v8446_v33 = vld [vmem:[%s8316_s18 + $0x78] sm:$0xff]   ;;  %s6836_s18 = sshll.u32 %s576_s0, 1 }
  0x37   : > { %v739_v22 = vsel %vm663_vm2, %v656_v18, 0.0  ;;  %v736_v25 = vsel %vm663_vm2, %v655_v20, 0.0  ;;  %10058 = vst [vmem:[#allocation17_spill] sm:$0xff] %v8446_v33  ;;  %s9743_s25 = scalar_lea.vmem [#allocation3], %s6836_s18  ;;  %s8148_s18 = smov 112  }
  0x3a   : > { %692 = vadd.xlane.f32.xlu1 %v691_v36  ;;  %689 = vadd.xlane.f32.xlu0 %v688_v38  ;;  %v662_v36 = vunpack.c.h.bf16 %v8446_v33  ;;  %v661_v38 = vunpack.c.l.bf16 %v8446_v33 }
  0x3c   : > { %7311 = vmatmul.mubr.msk.bf16.gmra.mxu0 %vm905_vm1, %v7953_v29  ;;  %v745_v29 = vsel %vm663_vm2, %v658_v24, 0.0  ;;  %v757_v39 = vsel %vm663_vm2, %v662_v36, 0.0 }
  0x3d   : > { %7314 = vmatprep.mubr.msk.bf16.mxu0 %vm905_vm1, %v7954_v30  ;;  %v660_v30 = vunpack.c.h.bf16 %v8439_v27 }
  0x3e   : > { %698 = vadd.xlane.f32.xlu1 %v697_v43  ;;  %695 = vadd.xlane.f32.xlu0 %v694_v45 }
  0x3f   : > { %v751_v34 = vsel %vm663_vm2, %v660_v30, 0.0 }
  0x42   : > { %704 = vadd.xlane.f32.xlu1 %v703_v48  ;;  %701 = vadd.xlane.f32.xlu0 %v700_v50 }
  0x44   : > { %7315 = vmatmul.mubr.msk.bf16.gmra.mxu0 %vm905_vm1, %v7955_v41  ;;  %v754_v41 = vsel %vm663_vm2, %v661_v38, 0.0 }
  0x45   : > { %7318 = vmatprep.mubr.msk.bf16.mxu0 %vm905_vm1, %v7956_v42  ;;  %v9996_v42 = vmov 0.0  }
  0x46   : > { %710 = vadd.xlane.f32.xlu1 %v709_v55  ;;  %707 = vadd.xlane.f32.xlu0 %v706_v57 }
  0x47   : > { %7330 = vmatprep.subr.bf16.mxu1 %v9996_v42  ;;  %7378 = vmatprep.subr.bf16.mxu0 %v9996_v42 }
  0x48   : > { %7332 = vmatprep.mubr.msk.bf16.mxu1 %vm8139_vm3, %v9996_v42 }
  0x4a   : > { %716 = vadd.xlane.f32.xlu1 %v715_v60  ;;  %713 = vadd.xlane.f32.xlu0 %v712_v62 }
  0x4c   : > { %7319 = vmatmul.mubr.msk.bf16.gmra.mxu0 %vm905_vm1, %v7957_v53 }
  0x4d   : > { %7322 = vmatprep.mubr.msk.bf16.mxu0 %vm905_vm1, %v7959_v54 }
  0x4e   : > { %722 = vadd.xlane.f32.xlu1 %v721_v3  ;;  %719 = vadd.xlane.f32.xlu0 %v718_v5 }
  0x52   : > { %728 = vadd.xlane.f32.xlu1 %v727_v10  ;;  %725 = vadd.xlane.f32.xlu0 %v724_v12 }
  0x54   : > { %7323 = vmatmul.mubr.msk.bf16.gmra.mxu0 %vm905_vm1, %v7961_v1 }
  0x55   : > { %7326 = vmatprep.mubr.msk.bf16.mxu0 %vm905_vm1, %v7963_v2 }
  0x56   : > { %734 = vadd.xlane.f32.xlu1 %v733_v17  ;;  %731 = vadd.xlane.f32.xlu0 %v730_v19 }
  0x5a   : > { %740 = vadd.xlane.f32.xlu1 %v739_v22  ;;  %737 = vadd.xlane.f32.xlu0 %v736_v25 }
  0x5c   : > { %7327 = vmatmul.mubr.msk.bf16.gmra.mxu0 %vm905_vm1, %v7964_v16 }
  0x5d   : > { %7380 = vmatprep.mubr.msk.bf16.mxu0 %vm8139_vm3, %v9996_v42 }
  0x5e   : > { %746 = vadd.xlane.f32.xlu1 %v745_v29  ;;  %743 = vadd.xlane.f32.xlu0 %v742_v31 }
  0x62   : > { %752 = vadd.xlane.f32.xlu1 %v751_v34  ;;  %749 = vadd.xlane.f32.xlu0 %v748_v37 }
  0x66   : > { %758 = vadd.xlane.f32.xlu1 %v757_v39  ;;  %755 = vadd.xlane.f32.xlu0 %v754_v41 }
  0xb3   : > { %v666_v43 = vpop.xlane.xlu0 %665  ;;  %v672_v44 = vpop.xlane.xlu1 %671 }
  0xb4   : > { %8004 = vrsqrt.f32 %v666_v43 }
  0xb7   : > { %v669_v45 = vpop.xlane.xlu0 %668  ;;  %v675_v46 = vpop.xlane.xlu1 %674 }
  0xb8   : > { %8006 = vrsqrt.f32 %v669_v45 }
  0xb9   : > { %8008 = vrsqrt.f32 %v675_v46 }
  0xba   : > { %8010 = vrsqrt.f32 %v672_v44 }
  0xbb   : > { %v678_v48 = vpop.xlane.xlu0 %677  ;;  %v681_v49 = vpop.xlane.xlu1 %680 }
  0xbc   : > { %8012 = vrsqrt.f32 %v681_v49 }
  0xbd   : > { %8014 = vrsqrt.f32 %v678_v48 }
  0xbf   : > { %v684_v50 = vpop.xlane.xlu0 %683  ;;  %v687_v51 = vpop.xlane.xlu1 %686 }
  0xc0   : > { %8016 = vrsqrt.f32 %v687_v51 }
  0xc1   : > { %v8470_v1 = vpop.eup %8004  ;;  %8018 = vrsqrt.f32 %v684_v50 }
  0xc3   : > { %v690_v53 = vpop.xlane.xlu0 %689  ;;  %v693_v54 = vpop.xlane.xlu1 %692 }
  0xc4   : > { %8020 = vrsqrt.f32 %v693_v54 }
  0xc5   : > { %v8472_v2 = vpop.eup %8006  ;;  %8022 = vrsqrt.f32 %v690_v53 }
  0xc6   : > { %v8474_v4 = vpop.eup %8008 }
  0xc7   : > { %v8460_v55 = vpop.xlane.xlu0 %695  ;;  %v699_v56 = vpop.xlane.xlu1 %698 }
  0xc8   : > { %v8478_v12 = vpop.eup %8010 }
  0xc9   : > { %v8481_v20 = vpop.eup %8012 }
  0xca   : > { %v8484_v24 = vpop.eup %8014 }
  0xcb   : > { %v8462_v57 = vpop.xlane.xlu0 %701  ;;  %v8464_v58 = vpop.xlane.xlu1 %704 }
  0xcd   : > { %v8500_v44 = vpop.eup %8016 }
  0xce   : > { %v8502_v45 = vpop.eup %8018 }
  0xcf   : > { %v8466_v61 = vpop.xlane.xlu0 %707  ;;  %v8468_v63 = vpop.xlane.xlu1 %710 }
  0xd3   : > { %v714_v6 = vpop.xlane.xlu0 %713  ;;  %v717_v16 = vpop.xlane.xlu1 %716 }
  0xd4   : > { %8024 = vrsqrt.f32 %v714_v6 }
  0xd5   : > { %8026 = vrsqrt.f32 %v717_v16 }
  0xd6   : > { %8028 = vrsqrt.f32 %v699_v56 }
  0xd7   : > { %v8487_v26 = vpop.xlane.xlu0 %719  ;;  %v8491_v31 = vpop.xlane.xlu1 %722  ;;  %8030 = vrsqrt.f32 %v8460_v55 }
  0xd8   : > { %8032 = vrsqrt.f32 %v8464_v58 }
  0xdb   : > { %v726_v38 = vpop.xlane.xlu0 %725  ;;  %v729_v43 = vpop.xlane.xlu1 %728 }
  0xdc   : > { %8034 = vrsqrt.f32 %v726_v38 }
  0xdd   : > { %8036 = vrsqrt.f32 %v8462_v57 }
  0xde   : > { %8038 = vrsqrt.f32 %v729_v43 }
  0xdf   : > { %v8511_v49 = vpop.xlane.xlu0 %731  ;;  %v8516_v54 = vpop.xlane.xlu1 %734 }
  0xe3   : > { %v738_v55 = vpop.xlane.xlu0 %737 }
  0xe4   : > { %v7300_v60 = vpop.f32.mrf.mxu0  ;;  %8040 = vrsqrt.f32 %v738_v55 }
  0xe5   : > { %v1121_v22 = vmul.f32 %v8478_v12, %v7300_v60  ;;  %v8518_v60 = vpop.eup %8020 }
  0xe6   : > { %v992_v62 = vpop.f32.mrf.mxu0 }
  0xe7   : > { %v1119_v10 = vmul.f32 %v8470_v1, %v992_v62  ;;  %v8520_v62 = vpop.eup %8022 }
  0xe8   : > { %v7301_v3 = vpop.f32.mrf.mxu0  ;;  %v8535_v57 = vpop.eup %8024 }
  0xe9   : > { %v1122_v17 = vmul.f32 %v8474_v4, %v7301_v3  ;;  %10059 = vst [vmem:[#allocation18_spill] sm:$0xff] %v8535_v57 }
  0xea   : > { %v995_v5 = vpop.f32.mrf.mxu0 }
  0xeb   : > { %v1120_v11 = vmul.f32 %v8472_v2, %v995_v5  ;;  %v1152_v29 = vpack.c.bf16 %v1122_v17, %v1121_v22  ;;  %v8537_v17 = vpop.eup %8026 }
  0xec   : > { %v7304_v13 = vpop.f32.mrf.mxu0  ;;  %10060 = vst [vmem:[#allocation19_spill] sm:$0xff] %v8537_v17  ;;  %v8543_v22 = vpop.eup %8028 }
  0xed   : > { %v1151_v18 = vpack.c.bf16 %v1120_v11, %v1119_v10  ;;  %v1125_v50 = vmul.f32 %v8502_v45, %v7304_v13  ;;  %v741_v11 = vpop.xlane.xlu1 %740 }
  0xee   : > { %v1008_v19 = vpop.f32.mrf.mxu0  ;;  %8042 = vrsqrt.f32 %v741_v11 }
  0xef   : > { %7331 = vmatpush3.bf16.msra.mxu1 %v1151_v18  ;;  %v1123_v32 = vmul.f32 %v8484_v24, %v1008_v19  ;;  %v8541_v19 = vpop.xlane.xlu0 %743  ;;  %8044 = vrsqrt.f32 %v8468_v63 }
  0xf0   : > { %v7305_v25 = vpop.f32.mrf.mxu0  ;;  %7336 = vmatprep.subr.bf16.mxu1 %v9996_v42  ;;  %8046 = vrsqrt.f32 %v8466_v61 }
  0xf1   : > { %v1126_v51 = vmul.f32 %v8500_v44, %v7305_v25  ;;  %8048 = vrsqrt.f32 %v8491_v31 }
  0xf2   : > { %v1011_v30 = vpop.f32.mrf.mxu0  ;;  %7333 = vmatmul.mubr.msk.bf16.vlgmr.msra.gmra.mxu1 %vm663_vm2, %v8324_v9 }
  0xf3   : > { %v1124_v34 = vmul.f32 %v8481_v20, %v1011_v30  ;;  %7337 = vmatpush3.bf16.msra.mxu1 %v1152_v29  ;;  %7338 = vmatprep.mubr.msk.bf16.mxu1 %vm8139_vm3, %v9996_v42  ;;  %v1154_v3 = vpack.c.bf16 %v1126_v51, %v1125_v50  ;;  %v8546_v29 = vpop.eup %8030 }
  0xf4   : > { %v8497_v36 = vpop.f32.mrf.mxu0  ;;  %7342 = vmatprep.subr.bf16.mxu1 %v9996_v42  ;;  %v8559_v38 = vpop.eup %8032 }
  0xf5   : > { %v1153_v39 = vpack.c.bf16 %v1124_v34, %v1123_v32  ;;  %v8550_v32 = vpop.xlane.xlu1 %746  ;;  %v8565_v50 = vpop.eup %8034 }
  0xf6   : > { %v1024_v37 = vpop.f32.mrf.mxu0  ;;  %10061 = vst [vmem:[#allocation20_spill] sm:$0xff] %v8565_v50  ;;  %v8567_v55 = vpop.eup %8036 }
  0xf7   : > { %v1127_v6 = vmul.f32 %v8520_v62, %v1024_v37  ;;  %v8569_v63 = vpop.eup %8038 }
  0xf8   : > { %v7309_v41 = vpop.f32.mrf.mxu0  ;;  %10062 = vst [vmem:[#allocation21_spill] sm:$0xff] %v8569_v63 }
  0xf9   : > { %v1130_v43 = vmul.f32 %v8543_v22, %v7309_v41 }
  0xfa   : > { %v1027_v46 = vpop.f32.mrf.mxu0  ;;  %7339 = vmatmul.mubr.msk.bf16.vlgmr.msra.gmra.mxu1 %vm663_vm2, %v8321_v8 }
  0xfb   : > { %7343 = vmatpush3.bf16.msra.mxu1 %v1153_v39  ;;  %7344 = vmatprep.mubr.msk.bf16.mxu1 %vm8139_vm3, %v9996_v42  ;;  %v1128_v10 = vmul.f32 %v8518_v60, %v1027_v46  ;;  %v1129_v39 = vmul.f32 %v8546_v29, %v8497_v36 }
  0xfc   : > { %v8508_v48 = vpop.f32.mrf.mxu0  ;;  %7348 = vmatprep.subr.bf16.mxu1 %v9996_v42 }
  0xfd   : > { %v1155_v16 = vpack.c.bf16 %v1128_v10, %v1127_v6  ;;  %v753_v10 = vpop.xlane.xlu1 %752  ;;  %v1156_v36 = vpack.c.bf16 %v1130_v43, %v1129_v39 }
  0xfe   : > { %v1040_v53 = vpop.f32.mrf.mxu0 }
  0xff   : > { %v1131_v31 = vmul.f32 %v8567_v55, %v1040_v53 }
 0x100   : > { %v8523_v56 = vpop.f32.mrf.mxu0 }
 0x102   : > { %v1043_v5 = vpop.f32.mrf.mxu0  ;;  %7345 = vmatmul.mubr.msk.bf16.vlgmr.msra.gmra.mxu1 %vm663_vm2, %v8331_v14 }
 0x103   : > { %7349 = vmatpush3.bf16.msra.mxu1 %v1154_v3  ;;  %7350 = vmatprep.mubr.msk.bf16.mxu1 %vm8139_vm3, %v9996_v42  ;;  %v750_v3 = vpop.xlane.xlu0 %749  ;;  %v1132_v11 = vmul.f32 %v8559_v38, %v1043_v5 }
 0x104   : > { %v8532_v58 = vpop.f32.mrf.mxu0  ;;  %7354 = vmatprep.subr.bf16.mxu1 %v9996_v42  ;;  %8050 = vrsqrt.f32 %v750_v3 }
 0x105   : > { %8052 = vrsqrt.f32 %v8487_v26 }
 0x106   : > { %v1056_v13 = vpop.f32.mrf.mxu0  ;;  %8054 = vrsqrt.f32 %v753_v10 }
 0x107   : > { %v1135_v25 = vmul.f32 %v8535_v57, %v1056_v13  ;;  %8056 = vrsqrt.f32 %v8516_v54 }
 0x108   : > { %v8539_v18 = vpop.f32.mrf.mxu0  ;;  %8058 = vrsqrt.f32 %v8511_v49 }
 0x109   : > { %8060 = vrsqrt.f32 %v8550_v32 }
 0x10a   : > { %v1059_v30 = vpop.f32.mrf.mxu0  ;;  %7351 = vmatmul.mubr.msk.bf16.vlgmr.msra.gmra.mxu1 %vm663_vm2, %v8342_v23  ;;  %8062 = vrsqrt.f32 %v8541_v19  ;;  %v756_v19 = vpop.xlane.xlu0 %755 }
 0x10b   : > { %v1136_v34 = vmul.f32 %v8537_v17, %v1059_v30  ;;  %7355 = vmatpush3.bf16.msra.mxu1 %v1155_v16  ;;  %7356 = vmatprep.mubr.msk.bf16.mxu1 %vm8139_vm3, %v9996_v42  ;;  %v1157_v30 = vpack.c.bf16 %v1132_v11, %v1131_v31 }
 0x10c   : > { %v8556_v37 = vpop.f32.mrf.mxu0  ;;  %7360 = vmatprep.subr.bf16.mxu1 %v9996_v42 }
 0x10d   : > { %v1159_v46 = vpack.c.bf16 %v1136_v34, %v1135_v25  ;;  %v8591_v25 = vpop.eup %8040 }
 0x10e   : > { %v1072_v51 = vpop.f32.mrf.mxu0  ;;  %v8593_v5 = vpop.eup %8042 }
 0x10f   : > { %7379 = vmatpush3.bf16.msra.mxu0 %v1159_v46  ;;  %v1139_v61 = vmul.f32 %v8565_v50, %v1072_v51  ;;  %v8596_v39 = vpop.eup %8044 }
 0x110   : > { %v8572_v6 = vpop.f32.mrf.mxu0  ;;  %7390 = vmatprep.subr.bf16.mxu0 %v9996_v42  ;;  %v8599_v46 = vpop.eup %8046  ;;  %v1134_v49 = vmul.f32 %v8596_v39, %v8523_v56 }
 0x111   : > { %v8613_v54 = vpop.eup %8048 }
 0x112   : > { %v1075_v41 = vpop.f32.mrf.mxu0  ;;  %7357 = vmatmul.mubr.msk.bf16.vlgmr.msra.gmra.mxu1 %vm663_vm2, %v8351_v28  ;;  %7381 = vmatmul.mubr.msk.bf16.vlgmr.msra.gmra.mxu0 %vm663_vm2, %v8387_v52 }
 0x113   : > { %v1140_v13 = vmul.f32 %v8569_v63, %v1075_v41  ;;  %7361 = vmatpush3.bf16.msra.mxu1 %v1156_v36  ;;  %7362 = vmatprep.mubr.msk.bf16.mxu1 %vm8139_vm3, %v9996_v42  ;;  %v1133_v36 = vmul.f32 %v8599_v46, %v8508_v48  ;;  %v8619_v41 = vpop.eup %8050 }
 0x114   : > { %v8586_v16 = vpop.f32.mrf.mxu0  ;;  %7366 = vmatprep.subr.bf16.mxu1 %v9996_v42  ;;  %7392 = vmatprep.mubr.msk.bf16.mxu0 %vm8139_vm3, %v9996_v42  ;;  %v8621_v11 = vpop.eup %8052 }
 0x115   : > { %v1161_v26 = vpack.c.bf16 %v1140_v13, %v1139_v61  ;;  %10063 = vst [vmem:[#allocation22_spill] sm:$0xff] %v8621_v11  ;;  %v8623_v13 = vpop.eup %8054  ;;  %v1137_v56 = vmul.f32 %v8621_v11, %v8532_v58 }
 0x116   : > { %v1088_v53 = vpop.f32.mrf.mxu0 }
 0x117   : > { %7391 = vmatpush3.bf16.msra.mxu0 %v1161_v26  ;;  %v1143_v43 = vmul.f32 %v8591_v25, %v1088_v53  ;;  %v1158_v53 = vpack.c.bf16 %v1134_v49, %v1133_v36  ;;  %v759_v36 = vpop.xlane.xlu1 %758 }
 0x118   : > { %v7325_v34 = vpop.f32.mrf.mxu0  ;;  %7402 = vmatprep.subr.bf16.mxu0 %v9996_v42  ;;  %8064 = vrsqrt.f32 %v759_v36 }
 0x119   : > { %8066 = vrsqrt.f32 %v756_v19 }
 0x11a   : > { %v1091_v51 = vpop.f32.mrf.mxu0  ;;  %7363 = vmatmul.mubr.msk.bf16.vlgmr.msra.gmra.mxu1 %vm663_vm2, %v8360_v35  ;;  %7393 = vmatmul.mubr.msk.bf16.vlgmr.msra.gmra.mxu0 %vm663_vm2, %v8405_v0 }
 0x11b   : > { %v1144_v3 = vmul.f32 %v8593_v5, %v1091_v51  ;;  %7367 = vmatpush3.bf16.msra.mxu1 %v1157_v30  ;;  %7368 = vmatprep.mubr.msk.bf16.mxu1 %vm8139_vm3, %v9996_v42 }
 0x11c   : > { %v7328_v10 = vpop.f32.mrf.mxu0  ;;  %7372 = vmatprep.subr.bf16.mxu1 %v9996_v42  ;;  %7404 = vmatprep.mubr.msk.bf16.mxu0 %vm8139_vm3, %v9996_v42 }
 0x11d   : > { %v1163_v61 = vpack.c.bf16 %v1144_v3, %v1143_v43  ;;  %v1138_v43 = vmul.f32 %v8613_v54, %v8539_v18  ;;  %v8643_v3 = vpop.eup %8056 }
 0x11e   : > { %v1104_v31 = vpop.f32.mrf.mxu0  ;;  %v8645_v18 = vpop.eup %8058 }
 0x11f   : > { %7403 = vmatpush3.bf16.msra.mxu0 %v1163_v61  ;;  %v1147_v30 = vmul.f32 %v8619_v41, %v1104_v31  ;;  %v1160_v58 = vpack.c.bf16 %v1138_v43, %v1137_v56  ;;  %v1141_v49 = vmul.f32 %v8645_v18, %v8556_v37  ;;  %v1142_v61 = vmul.f32 %v8643_v3, %v8572_v6  ;;  %v8658_v31 = vpop.eup %8060 }
 0x120   : > { %v7329_v26 = vpop.f32.mrf.mxu0  ;;  %7414 = vmatprep.subr.bf16.mxu0 %v9996_v42  ;;  %v1146_v6 = vmul.f32 %v8658_v31, %v7325_v34 }
 0x122   : > { %v1107_v48 = vpop.f32.mrf.mxu0  ;;  %7369 = vmatmul.mubr.msk.bf16.vlgmr.msra.gmra.mxu1 %vm663_vm2, %v8369_v40  ;;  %7405 = vmatmul.mubr.msk.bf16.vlgmr.msra.gmra.mxu0 %vm663_vm2, %v8423_v15 }
 0x123   : > { %v1148_v51 = vmul.f32 %v8623_v13, %v1107_v48  ;;  %7373 = vmatpush3.bf16.msra.mxu1 %v1158_v53  ;;  %7374 = vmatprep.mubr.msk.bf16.mxu1 %vm8139_vm3, %v9996_v42  ;;  %v1162_v53 = vpack.c.bf16 %v1142_v61, %v1141_v49 }
 0x124   : > { %7416 = vmatprep.mubr.msk.bf16.mxu0 %vm8139_vm3, %v9996_v42  ;;  %7384 = vmatprep.subr.bf16.mxu1 %v9996_v42 }
 0x125   : > { %v1165_v32 = vpack.c.bf16 %v1148_v51, %v1147_v30  ;;  %v8660_v30 = vpop.eup %8062 }
 0x126   : > { %v1145_v37 = vmul.f32 %v8660_v30, %v8586_v16  ;;  %v8670_v48 = vpop.eup %8064 }
 0x127   : > { %7415 = vmatpush3.bf16.msra.mxu0 %v1165_v32  ;;  %v8672_v43 = vpop.eup %8066  ;;  %v1150_v34 = vmul.f32 %v8670_v48, %v7329_v26  ;;  %v7978_v32 = vld [vmem:[%s9982_s5 + $0x8] sm:$0xff]  }
 0x128   : > { %v1164_v56 = vpack.c.bf16 %v1146_v6, %v1145_v37  ;;  %v1149_v16 = vmul.f32 %v8672_v43, %v7328_v10  ;;  %7426 = vmatprep.subr.bf16.mxu0 %v7978_v32  ;;  %v7979_v10 = vld [vmem:[%s9982_s5] sm:$0xff]  }
 0x12a   : > { %7375 = vmatmul.mubr.msk.bf16.vlgmr.msra.gmra.mxu1 %vm663_vm2, %v8378_v47  ;;  %7417 = vmatmul.mubr.msk.bf16.vlgmr.msra.gmra.mxu0 %vm663_vm2, %v8439_v27  ;;  %v1166_v51 = vpack.c.bf16 %v1150_v34, %v1149_v16 }
 0x12b   : > { %7385 = vmatpush3.bf16.msra.mxu1 %v1160_v58  ;;  %7386 = vmatprep.mubr.msk.bf16.mxu1 %vm8139_vm3, %v9996_v42  ;;  %v8700_v58 = vld [vmem:[%s9981_s4] ss:$0 sm:$0xff] }
 0x12c   : > { %7396 = vmatprep.subr.bf16.mxu1 %v9996_v42  ;;  %7427 = vmatpush3.bf16.msra.mxu0 %v7978_v32 }
 0x12d   : > { %7428 = vmatprep.subr.bf16.mxu0 %v7979_v10 }
 0x130   : > { %7429 = vmatpush3.bf16.msra.mxu0 %v7979_v10 }
 0x131   : > { %7510 = vmatprep.subr.bf16.mxu0 %v9996_v42 }
 0x132   : > { %7387 = vmatmul.mubr.msk.bf16.vlgmr.msra.gmra.mxu1 %vm663_vm2, %v8396_v59 }
 0x133   : > { %7397 = vmatpush3.bf16.msra.mxu1 %v1162_v53  ;;  %7398 = vmatprep.mubr.msk.bf16.mxu1 %vm8139_vm3, %v9996_v42 }
 0x134   : > { %7408 = vmatprep.subr.bf16.mxu1 %v9996_v42 }
 0x13a   : > { %7399 = vmatmul.mubr.msk.bf16.vlgmr.msra.gmra.mxu1 %vm663_vm2, %v8414_v7 }
 0x13b   : > { %7409 = vmatpush3.bf16.msra.mxu1 %v1164_v56  ;;  %7410 = vmatprep.mubr.msk.bf16.mxu1 %vm8139_vm3, %v9996_v42 }
 0x13c   : > { %7420 = vmatprep.subr.bf16.mxu1 %v9996_v42 }
 0x142   : > { %7411 = vmatmul.mubr.msk.bf16.vlgmr.msra.gmra.mxu1 %vm663_vm2, %v8431_v21 }
 0x143   : > { %7421 = vmatpush3.bf16.msra.mxu1 %v1166_v51  ;;  %7422 = vmatprep.mubr.msk.bf16.mxu1 %vm8139_vm3, %v9996_v42 }
 0x144   : > { %7462 = vmatprep.subr.bf16.mxu1 %v9996_v42 }
 0x14a   : > { %7423 = vmatmul.mubr.msk.bf16.vlgmr.msra.gmra.mxu1 %vm663_vm2, %v8446_v33 }
 0x14b   : > { %7464 = vmatprep.mubr.msk.bf16.mxu1 %vm8139_vm3, %v9996_v42 }
 0x1b2   : > { %v1209_v26 = vpop.f32.mrf.mxu1 }
 0x1b3   : > { %v1951_v36 = vmul.f32 %v8470_v1, %v1209_v26 }
 0x1b4   : > { %v7334_v19 = vpop.f32.mrf.mxu1 }
 0x1b5   : > { %v1990_v49 = vadd.f32 %v8700_v58, %v1951_v36 }
 0x1b6   : > { %v1212_v61 = vpop.f32.mrf.mxu1 }
 0x1b7   : > { %v1952_v53 = vmul.f32 %v8472_v2, %v1212_v61  ;;  %v2054_v6 = vmul.f32 0.01, %v1990_v49  ;;  %vm2022_vm4 = vcmp.ge.f32.partialorder %v1990_v49, 0.0 }
 0x1b8   : > { %v7335_v37 = vpop.f32.mrf.mxu1 }
 0x1b9   : > { %v1991_v56 = vadd.f32 %v8700_v58, %v1952_v53  ;;  %v2086_v10 = vsel %vm2022_vm4, %v1990_v49, %v2054_v6 }
 0x1ba   : > { %v1258_v16 = vpop.f32.mrf.mxu1 }
 0x1bb   : > { %vm2023_vm5 = vcmp.ge.f32.partialorder %v1991_v56, 0.0  ;;  %v2055_v34 = vmul.f32 0.01, %v1991_v56  ;;  %v1953_v51 = vmul.f32 %v8478_v12, %v1258_v16 }
 0x1bc   : > { %v7340_v32 = vpop.f32.mrf.mxu1 }
 0x1bd   : > { %v2087_v42 = vsel %vm2023_vm5, %v1991_v56, %v2055_v34  ;;  %v1992_v26 = vadd.f32 %v8700_v58, %v1953_v51 }
 0x1be   : > { %v1261_v36 = vpop.f32.mrf.mxu1  ;;  %v2118_v19 = vpack.c.bf16 %v2087_v42, %v2086_v10 }
 0x1bf   : > { %v1954_v61 = vmul.f32 %v8474_v4, %v1261_v36  ;;  %v2056_v53 = vmul.f32 0.01, %v1992_v26  ;;  %vm2024_vm7 = vcmp.ge.f32.partialorder %v1992_v26, 0.0 }
 0x1c0   : > { %v7341_v37 = vpop.f32.mrf.mxu1  ;;  %7430 = vmatprep.mubr.msk.bf16.mxu0 %vm2150_vm6, %v2118_v19 }
 0x1c1   : > { %v1993_v33 = vadd.f32 %v8700_v58, %v1954_v61  ;;  %v2088_v56 = vsel %vm2024_vm7, %v1992_v26, %v2056_v53 }
 0x1c2   : > { %v1307_v21 = vpop.f32.mrf.mxu1 }
 0x1c3   : > { %vm2025_vm8 = vcmp.ge.f32.partialorder %v1993_v33, 0.0  ;;  %v2057_v16 = vmul.f32 0.01, %v1993_v33  ;;  %v1955_v49 = vmul.f32 %v8484_v24, %v1307_v21 }
 0x1c4   : > { %v7346_v6 = vpop.f32.mrf.mxu1 }
 0x1c5   : > { %v2089_v34 = vsel %vm2025_vm8, %v1993_v33, %v2057_v16  ;;  %v1994_v51 = vadd.f32 %v8700_v58, %v1955_v49 }
 0x1c6   : > { %v2119_v42 = vpack.c.bf16 %v2089_v34, %v2088_v56  ;;  %v1310_v32 = vpop.f32.mrf.mxu1 }
 0x1c7   : > { %v1956_v10 = vmul.f32 %v8481_v20, %v1310_v32  ;;  %v2058_v19 = vmul.f32 0.01, %v1994_v51  ;;  %vm2026_vm9 = vcmp.ge.f32.partialorder %v1994_v51, 0.0 }
 0x1c8   : > { %v7347_v36 = vpop.f32.mrf.mxu1  ;;  %7431 = vmatmul.mubr.msk.bf16.vlgmr.msra.gmra.mxu0 %vm2150_vm6, %v2119_v42 }
 0x1c9   : > { %v1995_v61 = vadd.f32 %v8700_v58, %v1956_v10  ;;  %v2090_v33 = vsel %vm2026_vm9, %v1994_v51, %v2058_v19 }
 0x1ca   : > { %v1356_v37 = vpop.f32.mrf.mxu1 }
 0x1cb   : > { %vm2027_vm10 = vcmp.ge.f32.partialorder %v1995_v61, 0.0  ;;  %v2059_v27 = vmul.f32 0.01, %v1995_v61  ;;  %v1957_v21 = vmul.f32 %v8502_v45, %v1356_v37 }
 0x1cc   : > { %v7352_v26 = vpop.f32.mrf.mxu1 }
 0x1cd   : > { %v2091_v53 = vsel %vm2027_vm10, %v1995_v61, %v2059_v27  ;;  %v1996_v16 = vadd.f32 %v8700_v58, %v1957_v21 }
 0x1ce   : > { %v1359_v49 = vpop.f32.mrf.mxu1  ;;  %v2120_v6 = vpack.c.bf16 %v2091_v53, %v2090_v33 }
 0x1cf   : > { %v1958_v56 = vmul.f32 %v8500_v44, %v1359_v49  ;;  %v2060_v42 = vmul.f32 0.01, %v1996_v16  ;;  %vm2028_vm11 = vcmp.ge.f32.partialorder %v1996_v16, 0.0 }
 0x1d0   : > { %v7353_v34 = vpop.f32.mrf.mxu1  ;;  %7434 = vmatprep.mubr.msk.bf16.mxu0 %vm2150_vm6, %v2120_v6 }
 0x1d1   : > { %v1997_v32 = vadd.f32 %v8700_v58, %v1958_v56  ;;  %v2092_v61 = vsel %vm2028_vm11, %v1996_v16, %v2060_v42 }
 0x1d2   : > { %v1405_v10 = vpop.f32.mrf.mxu1  ;;  %v1601_v36 = vpop.f32.mrf.mxu0 }
 0x1d3   : > { %vm2029_vm12 = vcmp.ge.f32.partialorder %v1997_v32, 0.0  ;;  %v2061_v37 = vmul.f32 0.01, %v1997_v32  ;;  %v1959_v51 = vmul.f32 %v8520_v62, %v1405_v10 }
 0x1d4   : > { %v7358_v27 = vpop.f32.mrf.mxu1  ;;  %v7382_v19 = vpop.f32.mrf.mxu0 }
 0x1d5   : > { %v2093_v21 = vsel %vm2029_vm12, %v1997_v32, %v2061_v37  ;;  %v1998_v49 = vadd.f32 %v8700_v58, %v1959_v51 }
 0x1d6   : > { %v1408_v26 = vpop.f32.mrf.mxu1  ;;  %v1604_v33 = vpop.f32.mrf.mxu0  ;;  %v2121_v53 = vpack.c.bf16 %v2093_v21, %v2092_v61 }
 0x1d7   : > { %v1960_v6 = vmul.f32 %v8518_v60, %v1408_v26  ;;  %v2062_v10 = vmul.f32 0.01, %v1998_v49  ;;  %vm2030_vm13 = vcmp.ge.f32.partialorder %v1998_v49, 0.0  ;;  %v1968_v47 = vmul.f32 %v8537_v17, %v1604_v33 }
 0x1d8   : > { %v7359_v34 = vpop.f32.mrf.mxu1  ;;  %v7383_v56 = vpop.f32.mrf.mxu0  ;;  %7435 = vmatmul.mubr.msk.bf16.gmra.mxu0 %vm2150_vm6, %v2121_v53 }
 0x1d9   : > { %v1999_v7 = vadd.f32 %v8700_v58, %v1960_v6  ;;  %v2094_v61 = vsel %vm2030_vm13, %v1998_v49, %v2062_v10 }
 0x1da   : > { %v1454_v15 = vpop.f32.mrf.mxu1  ;;  %v8726_v59 = vpop.f32.mrf.mxu0 }
 0x1db   : > { %v1961_v16 = vmul.f32 %v8546_v29, %v1454_v15  ;;  %vm2031_vm14 = vcmp.ge.f32.partialorder %v1999_v7, 0.0  ;;  %v2063_v42 = vmul.f32 0.01, %v1999_v7 }
 0x1dc   : > { %v7364_v32 = vpop.f32.mrf.mxu1  ;;  %v7394_v37 = vpop.f32.mrf.mxu0 }
 0x1dd   : > { %v2095_v51 = vsel %vm2031_vm14, %v1999_v7, %v2063_v42  ;;  %v2000_v21 = vadd.f32 %v8700_v58, %v1961_v16 }
 0x1de   : > { %v1457_v27 = vpop.f32.mrf.mxu1  ;;  %v1702_v19 = vpop.f32.mrf.mxu0  ;;  %v2122_v34 = vpack.c.bf16 %v2095_v51, %v2094_v61 }
 0x1df   : > { %v1962_v26 = vmul.f32 %v8543_v22, %v1457_v27  ;;  %v2064_v32 = vmul.f32 0.01, %v2000_v21  ;;  %vm2032_vm15 = vcmp.ge.f32.partialorder %v2000_v21, 0.0 }
 0x1e0   : > { %v7365_v53 = vpop.f32.mrf.mxu1  ;;  %v7395_v6 = vpop.f32.mrf.mxu0  ;;  %7438 = vmatprep.mubr.msk.bf16.mxu0 %vm2150_vm6, %v2122_v34 }
 0x1e1   : > { %v2001_v56 = vadd.f32 %v8700_v58, %v1962_v26  ;;  %v2096_v53 = vsel %vm2032_vm15, %v2000_v21, %v2064_v32 }
 0x1e2   : > { %v1503_v15 = vpop.f32.mrf.mxu1  ;;  %v8733_v0 = vpop.f32.mrf.mxu0 }
 0x1e3   : > { %v1963_v7 = vmul.f32 %v8567_v55, %v1503_v15  ;;  %vm2033_vm0 = vcmp.ge.f32.partialorder %v2001_v56, 0.0  ;;  %v2065_v49 = vmul.f32 0.01, %v2001_v56 }
 0x1e4   : > { %v7370_v10 = vpop.f32.mrf.mxu1  ;;  %v7406_v16 = vpop.f32.mrf.mxu0 }
 0x1e5   : > { %v2097_v42 = vsel %vm2033_vm0, %v2001_v56, %v2065_v49  ;;  %v2002_v51 = vadd.f32 %v8700_v58, %v1963_v7  ;;  %v1967_v56 = vmul.f32 %v8535_v57, %v1601_v36 }
 0x1e6   : > { %v1506_v37 = vpop.f32.mrf.mxu1  ;;  %v1800_v27 = vpop.f32.mrf.mxu0  ;;  %v2123_v34 = vpack.c.bf16 %v2097_v42, %v2096_v53  ;;  %v2007_v42 = vadd.f32 %v8700_v58, %v1968_v47 }
 0x1e7   : > { %v1964_v61 = vmul.f32 %v8559_v38, %v1506_v37  ;;  %v2066_v49 = vmul.f32 0.01, %v2002_v51  ;;  %vm2034_vm4 = vcmp.ge.f32.partialorder %v2002_v51, 0.0 }
 0x1e8   : > { %v7371_v26 = vpop.f32.mrf.mxu1  ;;  %v7407_v6 = vpop.f32.mrf.mxu0  ;;  %7439 = vmatmul.mubr.msk.bf16.gmra.mxu0 %vm2150_vm6, %v2123_v34  ;;  %v2071_v17 = vmul.f32 0.01, %v2007_v42  ;;  %vm2039_vm7 = vcmp.ge.f32.partialorder %v2007_v42, 0.0 }
 0x1e9   : > { %v2003_v15 = vadd.f32 %v8700_v58, %v1964_v61  ;;  %v2006_v26 = vadd.f32 %v8700_v58, %v1967_v56  ;;  %v2098_v6 = vsel %vm2034_vm4, %v2002_v51, %v2066_v49  ;;  %v1971_v56 = vmul.f32 %v8565_v50, %v8726_v59 }
 0x1ea   : > { %v1552_v52 = vpop.f32.mrf.mxu1  ;;  %v8741_v10 = vpop.f32.mrf.mxu0 }
 0x1eb   : > { %v1965_v21 = vmul.f32 %v8599_v46, %v1552_v52  ;;  %vm2035_vm5 = vcmp.ge.f32.partialorder %v2003_v15, 0.0  ;;  %v2067_v32 = vmul.f32 0.01, %v2003_v15  ;;  %vm2038_vm9 = vcmp.ge.f32.partialorder %v2006_v26, 0.0 }
 0x1ec   : > { %v7376_v7 = vpop.f32.mrf.mxu1  ;;  %v7418_v16 = vpop.f32.mrf.mxu0 }
 0x1ed   : > { %v2099_v33 = vsel %vm2035_vm5, %v2003_v15, %v2067_v32  ;;  %v2004_v37 = vadd.f32 %v8700_v58, %v1965_v21  ;;  %v1972_v7 = vmul.f32 %v8569_v63, %v1702_v19  ;;  %v2070_v21 = vmul.f32 0.01, %v2006_v26 }
 0x1ee   : > { %v1555_v53 = vpop.f32.mrf.mxu1  ;;  %v8747_v61 = vpop.f32.mrf.mxu0  ;;  %v2124_v52 = vpack.c.bf16 %v2099_v33, %v2098_v6  ;;  %v2103_v32 = vsel %vm2039_vm7, %v2007_v42, %v2071_v17  ;;  %v1975_v42 = vmul.f32 %v8591_v25, %v8733_v0 }
 0x1ef   : > { %v1966_v36 = vmul.f32 %v8596_v39, %v1555_v53  ;;  %v2068_v16 = vmul.f32 0.01, %v2004_v37  ;;  %vm2036_vm8 = vcmp.ge.f32.partialorder %v2004_v37, 0.0  ;;  %v2011_v19 = vadd.f32 %v8700_v58, %v1972_v7 }
 0x1f0   : > { %v7377_v34 = vpop.f32.mrf.mxu1  ;;  %v7419_v40 = vpop.f32.mrf.mxu0  ;;  %7442 = vmatprep.mubr.msk.bf16.mxu0 %vm2150_vm6, %v2124_v52  ;;  %v2010_v52 = vadd.f32 %v8700_v58, %v1971_v56  ;;  %v2014_v0 = vadd.f32 %v8700_v58, %v1975_v42 }
 0x1f1   : > { %v2005_v47 = vadd.f32 %v8700_v58, %v1966_v36  ;;  %v2100_v53 = vsel %vm2036_vm8, %v2004_v37, %v2068_v16  ;;  %v2102_v34 = vsel %vm2038_vm9, %v2006_v26, %v2070_v21  ;;  %v2075_v57 = vmul.f32 0.01, %v2011_v19 }
 0x1f2   : > { %v1650_v15 = vpop.f32.mrf.mxu1  ;;  %vm2043_vm11 = vcmp.ge.f32.partialorder %v2011_v19, 0.0  ;;  %v2074_v26 = vmul.f32 0.01, %v2010_v52  ;;  %vm2042_vm14 = vcmp.ge.f32.partialorder %v2010_v52, 0.0  ;;  %vm2046_vm5 = vcmp.ge.f32.partialorder %v2014_v0, 0.0 }
 0x1f3   : > { %v1969_v51 = vmul.f32 %v8621_v11, %v1650_v15  ;;  %vm2037_vm10 = vcmp.ge.f32.partialorder %v2005_v47, 0.0  ;;  %v2069_v40 = vmul.f32 0.01, %v2005_v47  ;;  %v1976_v15 = vmul.f32 %v8593_v5, %v1800_v27 }
 0x1f4   : > { %v7388_v49 = vpop.f32.mrf.mxu1  ;;  %v2126_v11 = vpack.c.bf16 %v2103_v32, %v2102_v34  ;;  %v1980_v34 = vmul.f32 %v8623_v13, %v8747_v61 }
 0x1f5   : > { %v2008_v33 = vadd.f32 %v8700_v58, %v1969_v51  ;;  %v2101_v6 = vsel %vm2037_vm10, %v2005_v47, %v2069_v40  ;;  %v2015_v27 = vadd.f32 %v8700_v58, %v1976_v15  ;;  %v2107_v47 = vsel %vm2043_vm11, %v2011_v19, %v2075_v57 }
 0x1f6   : > { %v1653_v36 = vpop.f32.mrf.mxu1  ;;  %v2125_v63 = vpack.c.bf16 %v2101_v6, %v2100_v53  ;;  %v2078_v19 = vmul.f32 0.01, %v2014_v0  ;;  %v2019_v42 = vadd.f32 %v8700_v58, %v1980_v34 }
 0x1f7   : > { %v1970_v59 = vmul.f32 %v8613_v54, %v1653_v36  ;;  %v2072_v49 = vmul.f32 0.01, %v2008_v33  ;;  %vm2040_vm12 = vcmp.ge.f32.partialorder %v2008_v33, 0.0  ;;  %v2079_v53 = vmul.f32 0.01, %v2015_v27 }
 0x1f8   : > { %v7389_v50 = vpop.f32.mrf.mxu1  ;;  %7443 = vmatmul.mubr.msk.bf16.gmra.mxu0 %vm2150_vm6, %v2125_v63  ;;  %vm2047_vm15 = vcmp.ge.f32.partialorder %v2015_v27, 0.0  ;;  %vm2051_vm7 = vcmp.ge.f32.partialorder %v2019_v42, 0.0 }
 0x1f9   : > { %v2009_v17 = vadd.f32 %v8700_v58, %v1970_v59  ;;  %7446 = vmatprep.mubr.msk.bf16.mxu0 %vm2150_vm6, %v2126_v11  ;;  %v2104_v21 = vsel %vm2040_vm12, %v2008_v33, %v2072_v49  ;;  %v2106_v11 = vsel %vm2042_vm14, %v2010_v52, %v2074_v26  ;;  %v1979_v52 = vmul.f32 %v8619_v41, %v8741_v10 }
 0x1fa   : > { %v1748_v37 = vpop.f32.mrf.mxu1  ;;  %v2128_v36 = vpack.c.bf16 %v2107_v47, %v2106_v11  ;;  %v2110_v47 = vsel %vm2046_vm5, %v2014_v0, %v2078_v19 }
 0x1fb   : > { %vm2041_vm13 = vcmp.ge.f32.partialorder %v2009_v17, 0.0  ;;  %v2073_v7 = vmul.f32 0.01, %v2009_v17  ;;  %v1973_v50 = vmul.f32 %v8645_v18, %v1748_v37 }
 0x1fc   : > { %v7400_v16 = vpop.f32.mrf.mxu1 }
 0x1fd   : > { %v2105_v63 = vsel %vm2041_vm13, %v2009_v17, %v2073_v7  ;;  %v2012_v56 = vadd.f32 %v8700_v58, %v1973_v50  ;;  %v2111_v17 = vsel %vm2047_vm15, %v2015_v27, %v2079_v53 }
 0x1fe   : > { %v1751_v51 = vpop.f32.mrf.mxu1  ;;  %v2127_v40 = vpack.c.bf16 %v2105_v63, %v2104_v21  ;;  %v2018_v21 = vadd.f32 %v8700_v58, %v1979_v52 }
 0x1ff   : > { %v1974_v32 = vmul.f32 %v8643_v3, %v1751_v51  ;;  %v2076_v59 = vmul.f32 0.01, %v2012_v56  ;;  %vm2044_vm0 = vcmp.ge.f32.partialorder %v2012_v56, 0.0  ;;  %v2130_v51 = vpack.c.bf16 %v2111_v17, %v2110_v47 }
 0x200   : > { %v7401_v6 = vpop.f32.mrf.mxu1  ;;  %7447 = vmatmul.mubr.msk.bf16.gmra.mxu0 %vm2150_vm6, %v2127_v40  ;;  %v2083_v40 = vmul.f32 0.01, %v2019_v42  ;;  %vm2050_vm10 = vcmp.ge.f32.partialorder %v2018_v21, 0.0 }
 0x201   : > { %v2013_v57 = vadd.f32 %v8700_v58, %v1974_v32  ;;  %7450 = vmatprep.mubr.msk.bf16.mxu0 %vm2150_vm6, %v2128_v36  ;;  %v2108_v37 = vsel %vm2044_vm0, %v2012_v56, %v2076_v59  ;;  %v2082_v32 = vmul.f32 0.01, %v2018_v21 }
 0x202   : > { %v1846_v33 = vpop.f32.mrf.mxu1  ;;  %v2115_v36 = vsel %vm2051_vm7, %v2019_v42, %v2083_v40 }
 0x203   : > { %vm2045_vm4 = vcmp.ge.f32.partialorder %v2013_v57, 0.0  ;;  %v2077_v15 = vmul.f32 0.01, %v2013_v57  ;;  %v1977_v49 = vmul.f32 %v8660_v30, %v1846_v33  ;;  %v2114_v52 = vsel %vm2050_vm10, %v2018_v21, %v2082_v32 }
 0x204   : > { %v7412_v61 = vpop.f32.mrf.mxu1 }
 0x205   : > { %v2109_v26 = vsel %vm2045_vm4, %v2013_v57, %v2077_v15  ;;  %v2016_v7 = vadd.f32 %v8700_v58, %v1977_v49  ;;  %v2132_v49 = vpack.c.bf16 %v2115_v36, %v2114_v52 }
 0x206   : > { %v1849_v50 = vpop.f32.mrf.mxu1  ;;  %v2129_v16 = vpack.c.bf16 %v2109_v26, %v2108_v37 }
 0x207   : > { %v1978_v10 = vmul.f32 %v8658_v31, %v1849_v50  ;;  %v2080_v11 = vmul.f32 0.01, %v2016_v7  ;;  %vm2048_vm8 = vcmp.ge.f32.partialorder %v2016_v7, 0.0 }
 0x208   : > { %v7413_v63 = vpop.f32.mrf.mxu1  ;;  %7451 = vmatmul.mubr.msk.bf16.gmra.mxu0 %vm2150_vm6, %v2129_v16  ;;  %v10064_v16 = vmov 0.0  }
 0x209   : > { %v2017_v27 = vadd.f32 %v8700_v58, %v1978_v10  ;;  %7454 = vmatprep.mubr.msk.bf16.mxu0 %vm2150_vm6, %v2130_v51  ;;  %v2112_v34 = vsel %vm2048_vm8, %v2016_v7, %v2080_v11 }
 0x20a   : > { %v1944_v56 = vpop.f32.mrf.mxu1 }
 0x20b   : > { %vm2049_vm9 = vcmp.ge.f32.partialorder %v2017_v27, 0.0  ;;  %v2081_v0 = vmul.f32 0.01, %v2017_v27  ;;  %v1981_v53 = vmul.f32 %v8672_v43, %v1944_v56 }
 0x20c   : > { %v7424_v6 = vpop.f32.mrf.mxu1 }
 0x20d   : > { %v2113_v59 = vsel %vm2049_vm9, %v2017_v27, %v2081_v0  ;;  %v2020_v57 = vadd.f32 %v8700_v58, %v1981_v53 }
 0x20e   : > { %v1947_v19 = vpop.f32.mrf.mxu1  ;;  %v2131_v33 = vpack.c.bf16 %v2113_v59, %v2112_v34 }
 0x20f   : > { %v1982_v15 = vmul.f32 %v8670_v48, %v1947_v19  ;;  %v2084_v61 = vmul.f32 0.01, %v2020_v57  ;;  %vm2052_vm11 = vcmp.ge.f32.partialorder %v2020_v57, 0.0 }
 0x210   : > { %v7425_v17 = vpop.f32.mrf.mxu1  ;;  %7455 = vmatmul.mubr.msk.bf16.gmra.mxu0 %vm2150_vm6, %v2131_v33 }
 0x211   : > { %v2021_v37 = vadd.f32 %v8700_v58, %v1982_v15  ;;  %7458 = vmatprep.mubr.msk.bf16.mxu0 %vm2150_vm6, %v2132_v49  ;;  %v2116_v26 = vsel %vm2052_vm11, %v2020_v57, %v2084_v61 }
 0x213   : > { %vm2053_vm12 = vcmp.ge.f32.partialorder %v2021_v37, 0.0  ;;  %v2085_v42 = vmul.f32 0.01, %v2021_v37 }
 0x215   : > { %v2117_v7 = vsel %vm2053_vm12, %v2021_v37, %v2085_v42 }
 0x216   : > { %v2133_v50 = vpack.c.bf16 %v2117_v7, %v2116_v26 }
 0x218   : > { %7459 = vmatmul.mubr.msk.bf16.gmra.mxu0 %vm2150_vm6, %v2133_v50 }
 0x219   : > { %7512 = vmatprep.mubr.msk.bf16.mxu0 %vm8139_vm3, %v10064_v16 }
 0x288   : > { %v7432_v47 = vpop.f32.mrf.mxu0 }
 0x289   : > { %v2362_v27 = vmul.f32 %v8478_v12, %v7432_v47 }
 0x28a   : > { %v2233_v21 = vpop.f32.mrf.mxu0 }
 0x28b   : > { %v2360_v58 = vmul.f32 %v8470_v1, %v2233_v21 }
 0x28c   : > { %v7433_v10 = vpop.f32.mrf.mxu0 }
 0x28d   : > { %v2363_v40 = vmul.f32 %v8474_v4, %v7433_v10 }
 0x28e   : > { %v2236_v63 = vpop.f32.mrf.mxu0 }
 0x28f   : > { %v2361_v51 = vmul.f32 %v8472_v2, %v2236_v63  ;;  %v2393_v56 = vpack.c.bf16 %v2363_v40, %v2362_v27 }
 0x291   : > { %v2392_v11 = vpack.c.bf16 %v2361_v51, %v2360_v58 }
 0x293   : > { %7463 = vmatpush3.bf16.msra.mxu1 %v2392_v11 }
 0x294   : > { %7468 = vmatprep.subr.bf16.mxu1 %v10064_v16 }
 0x296   : > { %7465 = vmatmul.mubr.msk.bf16.vlgmr.msra.gmra.mxu1 %vm663_vm2, %v8324_v9 }
 0x297   : > { %7469 = vmatpush3.bf16.msra.mxu1 %v2393_v56  ;;  %7470 = vmatprep.mubr.msk.bf16.mxu1 %vm8139_vm3, %v10064_v16 }
 0x298   : > { %v7436_v32 = vpop.f32.mrf.mxu0  ;;  %7474 = vmatprep.subr.bf16.mxu1 %v10064_v16 }
 0x299   : > { %v2366_v19 = vmul.f32 %v8502_v45, %v7436_v32 }
 0x29a   : > { %v2249_v0 = vpop.f32.mrf.mxu0 }
 0x29b   : > { %v2364_v36 = vmul.f32 %v8484_v24, %v2249_v0 }
 0x29c   : > { %v7437_v53 = vpop.f32.mrf.mxu0 }
 0x29d   : > { %v2367_v59 = vmul.f32 %v8500_v44, %v7437_v53 }
 0x29e   : > { %v2252_v6 = vpop.f32.mrf.mxu0  ;;  %7471 = vmatmul.mubr.msk.bf16.vlgmr.msra.gmra.mxu1 %vm663_vm2, %v8321_v8 }
 0x29f   : > { %v2365_v34 = vmul.f32 %v8481_v20, %v2252_v6  ;;  %7476 = vmatprep.mubr.msk.bf16.mxu1 %vm8139_vm3, %v10064_v16  ;;  %v2395_v33 = vpack.c.bf16 %v2367_v59, %v2366_v19  ;;  %v10066_v59 = vld [vmem:[#allocation19_spill] sm:$0xff]  ;;  %v10067_v19 = vld [vmem:[#allocation8_spill] sm:$0xff] }
 0x2a1   : > { %v2394_v57 = vpack.c.bf16 %v2365_v34, %v2364_v36  ;;  %v10065_v36 = vld [vmem:[#allocation18_spill] sm:$0xff] }
 0x2a3   : > { %7475 = vmatpush3.bf16.msra.mxu1 %v2394_v57 }
 0x2a4   : > { %7480 = vmatprep.subr.bf16.mxu1 %v10064_v16 }
 0x2a6   : > { %7477 = vmatmul.mubr.msk.bf16.vlgmr.msra.gmra.mxu1 %vm663_vm2, %v8331_v14 }
 0x2a7   : > { %7481 = vmatpush3.bf16.msra.mxu1 %v2395_v33  ;;  %7482 = vmatprep.mubr.msk.bf16.mxu1 %vm8139_vm3, %v10064_v16 }
 0x2a8   : > { %7486 = vmatprep.subr.bf16.mxu1 %v10064_v16  ;;  %v7440_v52 = vpop.f32.mrf.mxu0 }
 0x2a9   : > { %v2370_v7 = vmul.f32 %v8546_v29, %v7440_v52 }
 0x2aa   : > { %v2265_v15 = vpop.f32.mrf.mxu0 }
 0x2ab   : > { %v2368_v61 = vmul.f32 %v8520_v62, %v2265_v15 }
 0x2ac   : > { %v7441_v49 = vpop.f32.mrf.mxu0 }
 0x2ad   : > { %v2371_v42 = vmul.f32 %v8543_v22, %v7441_v49 }
 0x2ae   : > { %7483 = vmatmul.mubr.msk.bf16.vlgmr.msra.gmra.mxu1 %vm663_vm2, %v8342_v23  ;;  %v2268_v17 = vpop.f32.mrf.mxu0 }
 0x2af   : > { %7488 = vmatprep.mubr.msk.bf16.mxu1 %vm8139_vm3, %v10064_v16  ;;  %v2369_v37 = vmul.f32 %v8518_v60, %v2268_v17  ;;  %v2397_v50 = vpack.c.bf16 %v2371_v42, %v2370_v7  ;;  %v10068_v17 = vld [vmem:[#allocation22_spill] sm:$0xff] }
 0x2b0   : > { %v10069_v7 = vld [vmem:[#allocation10_spill] sm:$0xff] }
 0x2b1   : > { %v2396_v26 = vpack.c.bf16 %v2369_v37, %v2368_v61 }
 0x2b3   : > { %7487 = vmatpush3.bf16.msra.mxu1 %v2396_v26 }
 0x2b4   : > { %7492 = vmatprep.subr.bf16.mxu1 %v10064_v16 }
 0x2b6   : > { %7489 = vmatmul.mubr.msk.bf16.vlgmr.msra.gmra.mxu1 %vm663_vm2, %v8351_v28 }
 0x2b7   : > { %7493 = vmatpush3.bf16.msra.mxu1 %v2397_v50  ;;  %7494 = vmatprep.mubr.msk.bf16.mxu1 %vm8139_vm3, %v10064_v16  ;;  %v10070_v50 = vld [vmem:[#allocation20_spill] sm:$0xff] }
 0x2b8   : > { %v7444_v47 = vpop.f32.mrf.mxu0  ;;  %7498 = vmatprep.subr.bf16.mxu1 %v10064_v16 }
 0x2b9   : > { %v2374_v32 = vmul.f32 %v8599_v46, %v7444_v47 }
 0x2ba   : > { %v2281_v21 = vpop.f32.mrf.mxu0 }
 0x2bb   : > { %v2372_v58 = vmul.f32 %v8567_v55, %v2281_v21  ;;  %v10071_v21 = vld [vmem:[#allocation21_spill] sm:$0xff] }
 0x2bc   : > { %v7445_v10 = vpop.f32.mrf.mxu0 }
 0x2bd   : > { %v2375_v27 = vmul.f32 %v8596_v39, %v7445_v10 }
 0x2be   : > { %v2284_v63 = vpop.f32.mrf.mxu0  ;;  %7495 = vmatmul.mubr.msk.bf16.vlgmr.msra.gmra.mxu1 %vm663_vm2, %v8360_v35 }
 0x2bf   : > { %v2373_v51 = vmul.f32 %v8559_v38, %v2284_v63  ;;  %7500 = vmatprep.mubr.msk.bf16.mxu1 %vm8139_vm3, %v10064_v16  ;;  %v2399_v53 = vpack.c.bf16 %v2375_v27, %v2374_v32  ;;  %v10072_v63 = vld [vmem:[#allocation9_spill] sm:$0xff] }
 0x2c0   : > { %v7448_v40 = vpop.f32.mrf.mxu0 }
 0x2c1   : > { %v2398_v11 = vpack.c.bf16 %v2373_v51, %v2372_v58  ;;  %v2378_v61 = vmul.f32 %v10068_v17, %v7448_v40 }
 0x2c2   : > { %v2297_v56 = vpop.f32.mrf.mxu0 }
 0x2c3   : > { %7499 = vmatpush3.bf16.msra.mxu1 %v2398_v11  ;;  %v2376_v34 = vmul.f32 %v10065_v36, %v2297_v56 }
 0x2c4   : > { %v7449_v0 = vpop.f32.mrf.mxu0  ;;  %7504 = vmatprep.subr.bf16.mxu1 %v10064_v16 }
 0x2c5   : > { %v2379_v15 = vmul.f32 %v8613_v54, %v7449_v0 }
 0x2c6   : > { %v2300_v6 = vpop.f32.mrf.mxu0  ;;  %7501 = vmatmul.mubr.msk.bf16.vlgmr.msra.gmra.mxu1 %vm663_vm2, %v10067_v19 }
 0x2c7   : > { %v2377_v57 = vmul.f32 %v10066_v59, %v2300_v6  ;;  %7505 = vmatpush3.bf16.msra.mxu1 %v2399_v53  ;;  %7506 = vmatprep.mubr.msk.bf16.mxu1 %vm8139_vm3, %v10064_v16  ;;  %v2401_v42 = vpack.c.bf16 %v2379_v15, %v2378_v61  ;;  %v10073_v53 = vld [vmem:[#allocation12_spill] sm:$0xff] }
 0x2c8   : > { %v7452_v33 = vpop.f32.mrf.mxu0  ;;  %7516 = vmatprep.subr.bf16.mxu1 %v10064_v16 }
 0x2c9   : > { %v2400_v52 = vpack.c.bf16 %v2377_v57, %v2376_v34  ;;  %v2382_v27 = vmul.f32 %v8645_v18, %v7452_v33  ;;  %v10074_v57 = vld [vmem:[#allocation11_spill] sm:$0xff] }
 0x2ca   : > { %v2313_v49 = vpop.f32.mrf.mxu0 }
 0x2cb   : > { %7511 = vmatpush3.bf16.msra.mxu0 %v2400_v52  ;;  %v2380_v47 = vmul.f32 %v10070_v50, %v2313_v49 }
 0x2cc   : > { %v7453_v37 = vpop.f32.mrf.mxu0  ;;  %7522 = vmatprep.subr.bf16.mxu0 %v10064_v16 }
 0x2cd   : > { %v2383_v40 = vmul.f32 %v8643_v3, %v7453_v37 }
 0x2ce   : > { %v2316_v26 = vpop.f32.mrf.mxu0  ;;  %7513 = vmatmul.mubr.msk.bf16.vlgmr.msra.gmra.mxu0 %vm663_vm2, %v10069_v7  ;;  %7507 = vmatmul.mubr.msk.bf16.vlgmr.msra.gmra.mxu1 %vm663_vm2, %v10072_v63 }
 0x2cf   : > { %v2381_v10 = vmul.f32 %v10071_v21, %v2316_v26  ;;  %7524 = vmatprep.mubr.msk.bf16.mxu0 %vm8139_vm3, %v10064_v16  ;;  %7517 = vmatpush3.bf16.msra.mxu1 %v2401_v42  ;;  %v2403_v32 = vpack.c.bf16 %v2383_v40, %v2382_v27  ;;  %v10076_v40 = vld [vmem:[#allocation13_spill] sm:$0xff] }
 0x2d0   : > { %v7456_v58 = vpop.f32.mrf.mxu0  ;;  %7518 = vmatprep.mubr.msk.bf16.mxu1 %vm8139_vm3, %v10064_v16  ;;  %7528 = vmatprep.subr.bf16.mxu1 %v10064_v16 }
 0x2d1   : > { %v2402_v51 = vpack.c.bf16 %v2381_v10, %v2380_v47  ;;  %v2386_v61 = vmul.f32 %v8660_v30, %v7456_v58  ;;  %v10075_v47 = vld [vmem:[#allocation14_spill] sm:$0xff] }
 0x2d2   : > { %v2329_v11 = vpop.f32.mrf.mxu0 }
 0x2d3   : > { %7523 = vmatpush3.bf16.msra.mxu0 %v2402_v51  ;;  %v2384_v6 = vmul.f32 %v8591_v25, %v2329_v11 }
 0x2d4   : > { %v7457_v56 = vpop.f32.mrf.mxu0  ;;  %7534 = vmatprep.subr.bf16.mxu0 %v10064_v16 }
 0x2d5   : > { %v2387_v15 = vmul.f32 %v8658_v31, %v7457_v56  ;;  %v7980_v56 = vld [vmem:[%s9984_s7 + $0x8] sm:$0xff]  }
 0x2d6   : > { %v2332_v0 = vpop.f32.mrf.mxu0  ;;  %7525 = vmatmul.mubr.msk.bf16.vlgmr.msra.gmra.mxu0 %vm663_vm2, %v10073_v53  ;;  %7519 = vmatmul.mubr.msk.bf16.vlgmr.msra.gmra.mxu1 %vm663_vm2, %v10074_v57 }
 0x2d7   : > { %v2385_v34 = vmul.f32 %v8593_v5, %v2332_v0  ;;  %7536 = vmatprep.mubr.msk.bf16.mxu0 %vm8139_vm3, %v10064_v16  ;;  %7529 = vmatpush3.bf16.msra.mxu1 %v2403_v32  ;;  %v2405_v42 = vpack.c.bf16 %v2387_v15, %v2386_v61  ;;  %v10077_v0 = vld [vmem:[#allocation16_spill] sm:$0xff]  ;;  %v8915_v15 = vld [vmem:[%s9983_s6] ss:$0 sm:$0xff] }
 0x2d8   : > { %v7460_v33 = vpop.f32.mrf.mxu0  ;;  %7530 = vmatprep.mubr.msk.bf16.mxu1 %vm8139_vm3, %v10064_v16  ;;  %7540 = vmatprep.subr.bf16.mxu1 %v10064_v16 }
 0x2d9   : > { %v2404_v52 = vpack.c.bf16 %v2385_v34, %v2384_v6  ;;  %v2390_v27 = vmul.f32 %v8672_v43, %v7460_v33  ;;  %v10078_v6 = vld [vmem:[#allocation15_spill] sm:$0xff]  ;;  %v10079_v33 = vld [vmem:[#allocation17_spill] sm:$0xff] }
 0x2da   : > { %v2345_v49 = vpop.f32.mrf.mxu0  ;;  %v7981_v34 = vld [vmem:[%s9984_s7] sm:$0xff]  }
 0x2db   : > { %7535 = vmatpush3.bf16.msra.mxu0 %v2404_v52  ;;  %v2388_v10 = vmul.f32 %v8619_v41, %v2345_v49 }
 0x2dc   : > { %v7461_v37 = vpop.f32.mrf.mxu0  ;;  %7546 = vmatprep.subr.bf16.mxu0 %v10064_v16 }
 0x2dd   : > { %v2391_v11 = vmul.f32 %v8670_v48, %v7461_v37 }
 0x2de   : > { %v2348_v26 = vpop.f32.mrf.mxu0  ;;  %7537 = vmatmul.mubr.msk.bf16.vlgmr.msra.gmra.mxu0 %vm663_vm2, %v10075_v47  ;;  %7531 = vmatmul.mubr.msk.bf16.vlgmr.msra.gmra.mxu1 %vm663_vm2, %v10076_v40 }
 0x2df   : > { %v2389_v51 = vmul.f32 %v8623_v13, %v2348_v26  ;;  %7548 = vmatprep.mubr.msk.bf16.mxu0 %vm8139_vm3, %v10064_v16  ;;  %7541 = vmatpush3.bf16.msra.mxu1 %v2405_v42  ;;  %v2407_v32 = vpack.c.bf16 %v2391_v11, %v2390_v27 }
 0x2e0   : > { %7542 = vmatprep.mubr.msk.bf16.mxu1 %vm8139_vm3, %v10064_v16  ;;  %7552 = vmatprep.subr.bf16.mxu1 %v10064_v16 }
 0x2e1   : > { %v2406_v58 = vpack.c.bf16 %v2389_v51, %v2388_v10 }
 0x2e3   : > { %7547 = vmatpush3.bf16.msra.mxu0 %v2406_v58 }
 0x2e4   : > { %7558 = vmatprep.subr.bf16.mxu0 %v7980_v56 }
 0x2e6   : > { %7549 = vmatmul.mubr.msk.bf16.vlgmr.msra.gmra.mxu0 %vm663_vm2, %v10077_v0  ;;  %7543 = vmatmul.mubr.msk.bf16.vlgmr.msra.gmra.mxu1 %vm663_vm2, %v10078_v6 }
 0x2e7   : > { %7559 = vmatpush3.bf16.msra.mxu0 %v7980_v56  ;;  %7553 = vmatpush3.bf16.msra.mxu1 %v2407_v32 }
 0x2e8   : > { %7554 = vmatprep.mubr.msk.bf16.mxu1 %vm8139_vm3, %v10064_v16  ;;  %7594 = vmatprep.subr.bf16.mxu1 %v10064_v16 }
 0x2e9   : > { %7560 = vmatprep.subr.bf16.mxu0 %v7981_v34 }
 0x2eb   : > { %7561 = vmatpush3.bf16.msra.mxu0 %v7981_v34 }
 0x2ec   : > { %7642 = vmatprep.subr.bf16.mxu0 %v10064_v16 }
 0x2ee   : > { %7555 = vmatmul.mubr.msk.bf16.vlgmr.msra.gmra.mxu1 %vm663_vm2, %v10079_v33 }
 0x2ef   : > { %7596 = vmatprep.mubr.msk.bf16.mxu1 %vm8139_vm3, %v10064_v16 }
 0x356   : > { %v2442_v52 = vpop.f32.mrf.mxu1 }
 0x357   : > { %v3064_v49 = vmul.f32 %v8470_v1, %v2442_v52 }
 0x358   : > { %v7466_v61 = vpop.f32.mrf.mxu1 }
 0x359   : > { %v3103_v37 = vadd.f32 %v8915_v15, %v3064_v49 }
 0x35a   : > { %v2445_v42 = vpop.f32.mrf.mxu1 }
 0x35b   : > { %v3065_v26 = vmul.f32 %v8472_v2, %v2445_v42  ;;  %v3167_v51 = vmul.f32 0.01, %v3103_v37  ;;  %vm3135_vm13 = vcmp.ge.f32.partialorder %v3103_v37, 0.0 }
 0x35c   : > { %v7467_v10 = vpop.f32.mrf.mxu1 }
 0x35d   : > { %v3104_v58 = vadd.f32 %v8915_v15, %v3065_v26  ;;  %v3199_v34 = vsel %vm3135_vm13, %v3103_v37, %v3167_v51 }
 0x35e   : > { %v2483_v11 = vpop.f32.mrf.mxu1 }
 0x35f   : > { %vm3136_vm14 = vcmp.ge.f32.partialorder %v3104_v58, 0.0  ;;  %v3168_v27 = vmul.f32 0.01, %v3104_v58  ;;  %v3066_v56 = vmul.f32 %v8478_v12, %v2483_v11 }
 0x360   : > { %v7472_v32 = vpop.f32.mrf.mxu1 }
 0x361   : > { %v3200_v33 = vsel %vm3136_vm14, %v3104_v58, %v3168_v27  ;;  %v3105_v52 = vadd.f32 %v8915_v15, %v3066_v56 }
 0x362   : > { %v2486_v61 = vpop.f32.mrf.mxu1  ;;  %v3231_v49 = vpack.c.bf16 %v3200_v33, %v3199_v34 }
 0x363   : > { %v3067_v0 = vmul.f32 %v8474_v4, %v2486_v61  ;;  %v3169_v10 = vmul.f32 0.01, %v3105_v52  ;;  %vm3137_vm15 = vcmp.ge.f32.partialorder %v3105_v52, 0.0 }
 0x364   : > { %v7473_v42 = vpop.f32.mrf.mxu1  ;;  %7562 = vmatprep.mubr.msk.bf16.mxu0 %vm2150_vm6, %v3231_v49 }
 0x365   : > { %v3106_v26 = vadd.f32 %v8915_v15, %v3067_v0  ;;  %v3201_v51 = vsel %vm3137_vm15, %v3105_v52, %v3169_v10 }
 0x366   : > { %v2524_v6 = vpop.f32.mrf.mxu1 }
 0x367   : > { %vm3138_vm0 = vcmp.ge.f32.partialorder %v3106_v26, 0.0  ;;  %v3170_v47 = vmul.f32 0.01, %v3106_v26  ;;  %v3068_v11 = vmul.f32 %v8484_v24, %v2524_v6 }
 0x368   : > { %v7478_v37 = vpop.f32.mrf.mxu1 }
 0x369   : > { %v3202_v58 = vsel %vm3138_vm0, %v3106_v26, %v3170_v47  ;;  %v3107_v27 = vadd.f32 %v8915_v15, %v3068_v11 }
 0x36a   : > { %v3232_v33 = vpack.c.bf16 %v3202_v58, %v3201_v51  ;;  %v2527_v56 = vpop.f32.mrf.mxu1 }
 0x36b   : > { %v3069_v32 = vmul.f32 %v8481_v20, %v2527_v56  ;;  %v3171_v61 = vmul.f32 0.01, %v3107_v27  ;;  %vm3139_vm4 = vcmp.ge.f32.partialorder %v3107_v27, 0.0 }
 0x36c   : > { %v7479_v34 = vpop.f32.mrf.mxu1  ;;  %7563 = vmatmul.mubr.msk.bf16.vlgmr.msra.gmra.mxu0 %vm2150_vm6, %v3232_v33 }
 0x36d   : > { %v3108_v0 = vadd.f32 %v8915_v15, %v3069_v32  ;;  %v3203_v47 = vsel %vm3139_vm4, %v3107_v27, %v3171_v61 }
 0x36e   : > { %v2565_v49 = vpop.f32.mrf.mxu1 }
 0x36f   : > { %vm3140_vm5 = vcmp.ge.f32.partialorder %v3108_v0, 0.0  ;;  %v3172_v42 = vmul.f32 0.01, %v3108_v0  ;;  %v3070_v6 = vmul.f32 %v8502_v45, %v2565_v49 }
 0x370   : > { %v7484_v52 = vpop.f32.mrf.mxu1 }
 0x371   : > { %v3204_v10 = vsel %vm3140_vm5, %v3108_v0, %v3172_v42  ;;  %v3109_v26 = vadd.f32 %v8915_v15, %v3070_v6 }
 0x372   : > { %v2568_v11 = vpop.f32.mrf.mxu1  ;;  %v3233_v37 = vpack.c.bf16 %v3204_v10, %v3203_v47 }
 0x373   : > { %v3071_v51 = vmul.f32 %v8500_v44, %v2568_v11  ;;  %v3173_v33 = vmul.f32 0.01, %v3109_v26  ;;  %vm3141_vm7 = vcmp.ge.f32.partialorder %v3109_v26, 0.0 }
 0x374   : > { %v7485_v58 = vpop.f32.mrf.mxu1  ;;  %7566 = vmatprep.mubr.msk.bf16.mxu0 %vm2150_vm6, %v3233_v37 }
 0x375   : > { %v3110_v56 = vadd.f32 %v8915_v15, %v3071_v51  ;;  %v3205_v49 = vsel %vm3141_vm7, %v3109_v26, %v3173_v33 }
 0x376   : > { %v2606_v34 = vpop.f32.mrf.mxu1 }
 0x377   : > { %vm3142_vm8 = vcmp.ge.f32.partialorder %v3110_v56, 0.0  ;;  %v3174_v32 = vmul.f32 0.01, %v3110_v56  ;;  %v3072_v27 = vmul.f32 %v8520_v62, %v2606_v34 }
 0x378   : > { %v7490_v61 = vpop.f32.mrf.mxu1 }
 0x379   : > { %v3206_v52 = vsel %vm3142_vm8, %v3110_v56, %v3174_v32  ;;  %v3111_v42 = vadd.f32 %v8915_v15, %v3072_v27 }
 0x37a   : > { %v3234_v0 = vpack.c.bf16 %v3206_v52, %v3205_v49  ;;  %v2609_v6 = vpop.f32.mrf.mxu1 }
 0x37b   : > { %v3073_v47 = vmul.f32 %v8518_v60, %v2609_v6  ;;  %v3175_v11 = vmul.f32 0.01, %v3111_v42  ;;  %vm3143_vm9 = vcmp.ge.f32.partialorder %v3111_v42, 0.0 }
 0x37c   : > { %7567 = vmatmul.mubr.msk.bf16.gmra.mxu0 %vm2150_vm6, %v3234_v0  ;;  %v7491_v10 = vpop.f32.mrf.mxu1 }
 0x37d   : > { %v3112_v37 = vadd.f32 %v8915_v15, %v3073_v47  ;;  %v3207_v56 = vsel %vm3143_vm9, %v3111_v42, %v3175_v11 }
 0x37e   : > { %v2647_v51 = vpop.f32.mrf.mxu1 }
 0x37f   : > { %vm3144_vm10 = vcmp.ge.f32.partialorder %v3112_v37, 0.0  ;;  %v3176_v26 = vmul.f32 0.01, %v3112_v37  ;;  %v3074_v58 = vmul.f32 %v8546_v29, %v2647_v51 }
 0x380   : > { %v7496_v33 = vpop.f32.mrf.mxu1 }
 0x381   : > { %v3208_v32 = vsel %vm3144_vm10, %v3112_v37, %v3176_v26  ;;  %v3113_v34 = vadd.f32 %v8915_v15, %v3074_v58 }
 0x382   : > { %v2650_v49 = vpop.f32.mrf.mxu1  ;;  %v3235_v52 = vpack.c.bf16 %v3208_v32, %v3207_v56 }
 0x383   : > { %v3075_v27 = vmul.f32 %v8543_v22, %v2650_v49  ;;  %v3177_v0 = vmul.f32 0.01, %v3113_v34  ;;  %vm3145_vm11 = vcmp.ge.f32.partialorder %v3113_v34, 0.0 }
 0x384   : > { %v7497_v61 = vpop.f32.mrf.mxu1  ;;  %7570 = vmatprep.mubr.msk.bf16.mxu0 %vm2150_vm6, %v3235_v52 }
 0x385   : > { %v3114_v6 = vadd.f32 %v8915_v15, %v3075_v27  ;;  %v3209_v11 = vsel %vm3145_vm11, %v3113_v34, %v3177_v0 }
 0x386   : > { %v2688_v47 = vpop.f32.mrf.mxu1 }
 0x387   : > { %vm3146_vm12 = vcmp.ge.f32.partialorder %v3114_v6, 0.0  ;;  %v3178_v10 = vmul.f32 0.01, %v3114_v6  ;;  %v3076_v51 = vmul.f32 %v8567_v55, %v2688_v47 }
 0x388   : > { %v7502_v42 = vpop.f32.mrf.mxu1 }
 0x389   : > { %v3210_v37 = vsel %vm3146_vm12, %v3114_v6, %v3178_v10  ;;  %v3115_v26 = vadd.f32 %v8915_v15, %v3076_v51 }
 0x38a   : > { %v2691_v58 = vpop.f32.mrf.mxu1  ;;  %v3236_v33 = vpack.c.bf16 %v3210_v37, %v3209_v11 }
 0x38b   : > { %v3077_v56 = vmul.f32 %v8559_v38, %v2691_v58  ;;  %v3179_v49 = vmul.f32 0.01, %v3115_v26  ;;  %vm3147_vm13 = vcmp.ge.f32.partialorder %v3115_v26, 0.0 }
 0x38c   : > { %v7503_v32 = vpop.f32.mrf.mxu1  ;;  %7571 = vmatmul.mubr.msk.bf16.gmra.mxu0 %vm2150_vm6, %v3236_v33 }
 0x38d   : > { %v3116_v52 = vadd.f32 %v8915_v15, %v3077_v56  ;;  %v3211_v42 = vsel %vm3147_vm13, %v3115_v26, %v3179_v49 }
 0x38e   : > { %v2770_v27 = vpop.f32.mrf.mxu0  ;;  %v2729_v61 = vpop.f32.mrf.mxu1 }
 0x38f   : > { %v3080_v47 = vmul.f32 %v10065_v36, %v2770_v27  ;;  %vm3148_vm14 = vcmp.ge.f32.partialorder %v3116_v52, 0.0  ;;  %v3180_v34 = vmul.f32 0.01, %v3116_v52  ;;  %v3078_v0 = vmul.f32 %v8599_v46, %v2729_v61 }
 0x390   : > { %v7514_v6 = vpop.f32.mrf.mxu0  ;;  %v7508_v51 = vpop.f32.mrf.mxu1 }
 0x391   : > { %v3119_v10 = vadd.f32 %v8915_v15, %v3080_v47  ;;  %v3212_v11 = vsel %vm3148_vm14, %v3116_v52, %v3180_v34  ;;  %v3117_v37 = vadd.f32 %v8915_v15, %v3078_v0 }
 0x392   : > { %v2773_v58 = vpop.f32.mrf.mxu0  ;;  %v2732_v33 = vpop.f32.mrf.mxu1  ;;  %v3237_v32 = vpack.c.bf16 %v3212_v11, %v3211_v42 }
 0x393   : > { %v3081_v56 = vmul.f32 %v10066_v59, %v2773_v58  ;;  %v3079_v40 = vmul.f32 %v8596_v39, %v2732_v33  ;;  %v3183_v53 = vmul.f32 0.01, %v3119_v10  ;;  %v3181_v47 = vmul.f32 0.01, %v3117_v37 }
 0x394   : > { %v7515_v27 = vpop.f32.mrf.mxu0  ;;  %v7509_v61 = vpop.f32.mrf.mxu1  ;;  %7574 = vmatprep.mubr.msk.bf16.mxu0 %vm2150_vm6, %v3237_v32  ;;  %vm3151_vm15 = vcmp.ge.f32.partialorder %v3119_v10, 0.0  ;;  %vm3149_vm0 = vcmp.ge.f32.partialorder %v3117_v37, 0.0 }
 0x395   : > { %v3120_v57 = vadd.f32 %v8915_v15, %v3081_v56  ;;  %v3118_v26 = vadd.f32 %v8915_v15, %v3079_v40  ;;  %v3215_v11 = vsel %vm3151_vm15, %v3119_v10, %v3183_v53  ;;  %v3213_v32 = vsel %vm3149_vm0, %v3117_v37, %v3181_v47 }
 0x396   : > { %v2852_v49 = vpop.f32.mrf.mxu0  ;;  %v2811_v34 = vpop.f32.mrf.mxu1 }
 0x397   : > { %vm3152_vm4 = vcmp.ge.f32.partialorder %v3120_v57, 0.0  ;;  %v3184_v52 = vmul.f32 0.01, %v3120_v57  ;;  %v3084_v0 = vmul.f32 %v10070_v50, %v2852_v49  ;;  %vm3150_vm5 = vcmp.ge.f32.partialorder %v3118_v26, 0.0 }
 0x398   : > { %v3182_v6 = vmul.f32 0.01, %v3118_v26  ;;  %v3082_v51 = vmul.f32 %v10068_v17, %v2811_v34  ;;  %v7526_v42 = vpop.f32.mrf.mxu0  ;;  %v7520_v56 = vpop.f32.mrf.mxu1 }
 0x399   : > { %v3216_v58 = vsel %vm3152_vm4, %v3120_v57, %v3184_v52  ;;  %v3123_v33 = vadd.f32 %v8915_v15, %v3084_v0 }
 0x39a   : > { %v3214_v27 = vsel %vm3150_vm5, %v3118_v26, %v3182_v6  ;;  %v3121_v40 = vadd.f32 %v8915_v15, %v3082_v51  ;;  %v2855_v61 = vpop.f32.mrf.mxu0  ;;  %v3239_v7 = vpack.c.bf16 %v3216_v58, %v3215_v11  ;;  %v2814_v63 = vpop.f32.mrf.mxu1 }
 0x39b   : > { %v3085_v59 = vmul.f32 %v10071_v21, %v2855_v61  ;;  %v3238_v49 = vpack.c.bf16 %v3214_v27, %v3213_v32  ;;  %v3083_v50 = vmul.f32 %v8613_v54, %v2814_v63  ;;  %v3187_v34 = vmul.f32 0.01, %v3123_v33 }
 0x39c   : > { %v7527_v36 = vpop.f32.mrf.mxu0  ;;  %v7521_v57 = vpop.f32.mrf.mxu1  ;;  %v3185_v10 = vmul.f32 0.01, %v3121_v40  ;;  %vm3155_vm7 = vcmp.ge.f32.partialorder %v3123_v33, 0.0  ;;  %vm3153_vm8 = vcmp.ge.f32.partialorder %v3121_v40, 0.0 }
 0x39d   : > { %v3124_v53 = vadd.f32 %v8915_v15, %v3085_v59  ;;  %7575 = vmatmul.mubr.msk.bf16.gmra.mxu0 %vm2150_vm6, %v3238_v49  ;;  %v3122_v37 = vadd.f32 %v8915_v15, %v3083_v50  ;;  %v3219_v6 = vsel %vm3155_vm7, %v3123_v33, %v3187_v34 }
 0x39e   : > { %7578 = vmatprep.mubr.msk.bf16.mxu0 %vm2150_vm6, %v3239_v7  ;;  %v2934_v47 = vpop.f32.mrf.mxu0  ;;  %v2893_v52 = vpop.f32.mrf.mxu1  ;;  %v3217_v50 = vsel %vm3153_vm8, %v3121_v40, %v3185_v10 }
 0x39f   : > { %vm3156_vm9 = vcmp.ge.f32.partialorder %v3124_v53, 0.0  ;;  %v3188_v26 = vmul.f32 0.01, %v3124_v53  ;;  %v3088_v63 = vmul.f32 %v8591_v25, %v2934_v47  ;;  %vm3154_vm10 = vcmp.ge.f32.partialorder %v3122_v37, 0.0 }
 0x3a0   : > { %v3186_v36 = vmul.f32 0.01, %v3122_v37  ;;  %v3086_v59 = vmul.f32 %v8645_v18, %v2893_v52  ;;  %v7538_v0 = vpop.f32.mrf.mxu0  ;;  %v7532_v11 = vpop.f32.mrf.mxu1 }
 0x3a1   : > { %v3220_v51 = vsel %vm3156_vm9, %v3124_v53, %v3188_v26  ;;  %v3127_v42 = vadd.f32 %v8915_v15, %v3088_v63 }
 0x3a2   : > { %v3218_v58 = vsel %vm3154_vm10, %v3122_v37, %v3186_v36  ;;  %v3125_v7 = vadd.f32 %v8915_v15, %v3086_v59  ;;  %v2937_v56 = vpop.f32.mrf.mxu0  ;;  %v3241_v32 = vpack.c.bf16 %v3220_v51, %v3219_v6  ;;  %v2896_v61 = vpop.f32.mrf.mxu1 }
 0x3a3   : > { %v3240_v27 = vpack.c.bf16 %v3218_v58, %v3217_v50  ;;  %v3089_v49 = vmul.f32 %v8593_v5, %v2937_v56  ;;  %v3087_v57 = vmul.f32 %v8643_v3, %v2896_v61  ;;  %v3191_v52 = vmul.f32 0.01, %v3127_v42 }
 0x3a4   : > { %v7539_v47 = vpop.f32.mrf.mxu0  ;;  %v7533_v34 = vpop.f32.mrf.mxu1  ;;  %v3189_v53 = vmul.f32 0.01, %v3125_v7  ;;  %vm3159_vm11 = vcmp.ge.f32.partialorder %v3127_v42, 0.0  ;;  %vm3157_vm12 = vcmp.ge.f32.partialorder %v3125_v7, 0.0 }
 0x3a5   : > { %v3128_v33 = vadd.f32 %v8915_v15, %v3089_v49  ;;  %7579 = vmatmul.mubr.msk.bf16.gmra.mxu0 %vm2150_vm6, %v3240_v27  ;;  %v3126_v40 = vadd.f32 %v8915_v15, %v3087_v57  ;;  %v3223_v6 = vsel %vm3159_vm11, %v3127_v42, %v3191_v52 }
 0x3a6   : > { %7582 = vmatprep.mubr.msk.bf16.mxu0 %vm2150_vm6, %v3241_v32  ;;  %v3016_v10 = vpop.f32.mrf.mxu0  ;;  %v2975_v26 = vpop.f32.mrf.mxu1  ;;  %v3221_v58 = vsel %vm3157_vm12, %v3125_v7, %v3189_v53 }
 0x3a7   : > { %vm3160_vm13 = vcmp.ge.f32.partialorder %v3128_v33, 0.0  ;;  %v3192_v37 = vmul.f32 0.01, %v3128_v33  ;;  %v3092_v63 = vmul.f32 %v8619_v41, %v3016_v10  ;;  %vm3158_vm14 = vcmp.ge.f32.partialorder %v3126_v40, 0.0 }
 0x3a8   : > { %v3190_v36 = vmul.f32 0.01, %v3126_v40  ;;  %v3090_v59 = vmul.f32 %v8660_v30, %v2975_v26  ;;  %v7550_v0 = vpop.f32.mrf.mxu0  ;;  %v7544_v50 = vpop.f32.mrf.mxu1 }
 0x3a9   : > { %v3224_v51 = vsel %vm3160_vm13, %v3128_v33, %v3192_v37  ;;  %v3131_v11 = vadd.f32 %v8915_v15, %v3092_v63 }
 0x3aa   : > { %v3222_v56 = vsel %vm3158_vm14, %v3126_v40, %v3190_v36  ;;  %v3129_v32 = vadd.f32 %v8915_v15, %v3090_v59  ;;  %v3019_v27 = vpop.f32.mrf.mxu0  ;;  %v3243_v61 = vpack.c.bf16 %v3224_v51, %v3223_v6  ;;  %v2978_v57 = vpop.f32.mrf.mxu1 }
 0x3ab   : > { %v3242_v49 = vpack.c.bf16 %v3222_v56, %v3221_v58  ;;  %v3093_v47 = vmul.f32 %v8623_v13, %v3019_v27  ;;  %v3091_v34 = vmul.f32 %v8658_v31, %v2978_v57  ;;  %v3195_v26 = vmul.f32 0.01, %v3131_v11 }
 0x3ac   : > { %v7551_v10 = vpop.f32.mrf.mxu0  ;;  %v7545_v52 = vpop.f32.mrf.mxu1  ;;  %v3193_v33 = vmul.f32 0.01, %v3129_v32  ;;  %vm3163_vm15 = vcmp.ge.f32.partialorder %v3131_v11, 0.0  ;;  %vm3161_vm0 = vcmp.ge.f32.partialorder %v3129_v32, 0.0 }
 0x3ad   : > { %v3132_v42 = vadd.f32 %v8915_v15, %v3093_v47  ;;  %7583 = vmatmul.mubr.msk.bf16.gmra.mxu0 %vm2150_vm6, %v3242_v49  ;;  %v3130_v7 = vadd.f32 %v8915_v15, %v3091_v34  ;;  %v3227_v36 = vsel %vm3163_vm15, %v3131_v11, %v3195_v26 }
 0x3ae   : > { %7586 = vmatprep.mubr.msk.bf16.mxu0 %vm2150_vm6, %v3243_v61  ;;  %v3057_v40 = vpop.f32.mrf.mxu1  ;;  %v3225_v6 = vsel %vm3161_vm0, %v3129_v32, %v3193_v33 }
 0x3af   : > { %vm3164_vm4 = vcmp.ge.f32.partialorder %v3132_v42, 0.0  ;;  %v3196_v53 = vmul.f32 0.01, %v3132_v42  ;;  %vm3162_vm5 = vcmp.ge.f32.partialorder %v3130_v7, 0.0  ;;  %v3194_v37 = vmul.f32 0.01, %v3130_v7 }
 0x3b0   : > { %v3094_v63 = vmul.f32 %v8672_v43, %v3057_v40  ;;  %v7556_v0 = vpop.f32.mrf.mxu1 }
 0x3b1   : > { %v3228_v59 = vsel %vm3164_vm4, %v3132_v42, %v3196_v53  ;;  %v3226_v51 = vsel %vm3162_vm5, %v3130_v7, %v3194_v37 }
 0x3b2   : > { %v3133_v50 = vadd.f32 %v8915_v15, %v3094_v63  ;;  %v3245_v58 = vpack.c.bf16 %v3228_v59, %v3227_v36  ;;  %v3244_v56 = vpack.c.bf16 %v3226_v51, %v3225_v6  ;;  %v3060_v27 = vpop.f32.mrf.mxu1 }
 0x3b3   : > { %v3095_v61 = vmul.f32 %v8670_v48, %v3060_v27 }
 0x3b4   : > { %v7557_v49 = vpop.f32.mrf.mxu1  ;;  %v3197_v57 = vmul.f32 0.01, %v3133_v50  ;;  %vm3165_vm7 = vcmp.ge.f32.partialorder %v3133_v50, 0.0 }
 0x3b5   : > { %7587 = vmatmul.mubr.msk.bf16.gmra.mxu0 %vm2150_vm6, %v3244_v56  ;;  %v3134_v47 = vadd.f32 %v8915_v15, %v3095_v61 }
 0x3b6   : > { %7590 = vmatprep.mubr.msk.bf16.mxu0 %vm2150_vm6, %v3245_v58  ;;  %v3229_v32 = vsel %vm3165_vm7, %v3133_v50, %v3197_v57 }
 0x3b7   : > { %vm3166_vm8 = vcmp.ge.f32.partialorder %v3134_v47, 0.0  ;;  %v3198_v11 = vmul.f32 0.01, %v3134_v47 }
 0x3b9   : > { %v3230_v34 = vsel %vm3166_vm8, %v3134_v47, %v3198_v11 }
 0x3ba   : > { %v3246_v10 = vpack.c.bf16 %v3230_v34, %v3229_v32 }
 0x3bd   : > { %7591 = vmatmul.mubr.msk.bf16.gmra.mxu0 %vm2150_vm6, %v3246_v10 }
 0x3be   : > { %7644 = vmatprep.mubr.msk.bf16.mxu0 %vm8139_vm3, %v10064_v16 }
 0x42c   : > { %v7564_v26 = vpop.f32.mrf.mxu0 }
 0x42d   : > { %v3474_v37 = vmul.f32 %v8478_v12, %v7564_v26 }
 0x42e   : > { %v3345_v42 = vpop.f32.mrf.mxu0 }
 0x42f   : > { %v3472_v7 = vmul.f32 %v8470_v1, %v3345_v42 }
 0x430   : > { %v7565_v52 = vpop.f32.mrf.mxu0 }
 0x431   : > { %v3475_v53 = vmul.f32 %v8474_v4, %v7565_v52 }
 0x432   : > { %v3348_v33 = vpop.f32.mrf.mxu0 }
 0x433   : > { %v3473_v15 = vmul.f32 %v8472_v2, %v3348_v33  ;;  %v3505_v63 = vpack.c.bf16 %v3475_v53, %v3474_v37 }
 0x435   : > { %v3504_v40 = vpack.c.bf16 %v3473_v15, %v3472_v7 }
 0x437   : > { %7595 = vmatpush3.bf16.msra.mxu1 %v3504_v40 }
 0x438   : > { %7600 = vmatprep.subr.bf16.mxu1 %v10064_v16 }
 0x43a   : > { %7597 = vmatmul.mubr.msk.bf16.vlgmr.msra.gmra.mxu1 %vm663_vm2, %v8324_v9 }
 0x43b   : > { %7601 = vmatpush3.bf16.msra.mxu1 %v3505_v63  ;;  %7602 = vmatprep.mubr.msk.bf16.mxu1 %vm8139_vm3, %v10064_v16 }
 0x43c   : > { %v7568_v36 = vpop.f32.mrf.mxu0  ;;  %7606 = vmatprep.subr.bf16.mxu1 %v10064_v16 }
 0x43d   : > { %v3478_v27 = vmul.f32 %v8502_v45, %v7568_v36 }
 0x43e   : > { %v3361_v59 = vpop.f32.mrf.mxu0 }
 0x43f   : > { %v3476_v51 = vmul.f32 %v8484_v24, %v3361_v59 }
 0x440   : > { %v7569_v0 = vpop.f32.mrf.mxu0 }
 0x441   : > { %v3479_v58 = vmul.f32 %v8500_v44, %v7569_v0 }
 0x442   : > { %v3364_v6 = vpop.f32.mrf.mxu0  ;;  %7603 = vmatmul.mubr.msk.bf16.vlgmr.msra.gmra.mxu1 %vm663_vm2, %v8321_v8 }
 0x443   : > { %v3477_v50 = vmul.f32 %v8481_v20, %v3364_v6  ;;  %7608 = vmatprep.mubr.msk.bf16.mxu1 %vm8139_vm3, %v10064_v16  ;;  %v3507_v61 = vpack.c.bf16 %v3479_v58, %v3478_v27 }
 0x445   : > { %v3506_v56 = vpack.c.bf16 %v3477_v50, %v3476_v51 }
 0x447   : > { %7607 = vmatpush3.bf16.msra.mxu1 %v3506_v56  ;;  %v10080_v56 = vld [vmem:[#allocation18_spill] sm:$0xff] }
 0x448   : > { %7612 = vmatprep.subr.bf16.mxu1 %v10064_v16 }
 0x44a   : > { %7609 = vmatmul.mubr.msk.bf16.vlgmr.msra.gmra.mxu1 %vm663_vm2, %v8331_v14 }
 0x44b   : > { %7613 = vmatpush3.bf16.msra.mxu1 %v3507_v61  ;;  %7614 = vmatprep.mubr.msk.bf16.mxu1 %vm8139_vm3, %v10064_v16  ;;  %v10081_v61 = vld [vmem:[#allocation19_spill] sm:$0xff] }
 0x44c   : > { %7618 = vmatprep.subr.bf16.mxu1 %v10064_v16  ;;  %v7572_v49 = vpop.f32.mrf.mxu0 }
 0x44d   : > { %v3482_v42 = vmul.f32 %v8546_v29, %v7572_v49 }
 0x44e   : > { %v3377_v57 = vpop.f32.mrf.mxu0 }
 0x44f   : > { %v3480_v32 = vmul.f32 %v8520_v62, %v3377_v57 }
 0x450   : > { %v7573_v47 = vpop.f32.mrf.mxu0 }
 0x451   : > { %v3483_v10 = vmul.f32 %v8543_v22, %v7573_v47 }
 0x452   : > { %7615 = vmatmul.mubr.msk.bf16.vlgmr.msra.gmra.mxu1 %vm663_vm2, %v8342_v23  ;;  %v3380_v11 = vpop.f32.mrf.mxu0 }
 0x453   : > { %7620 = vmatprep.mubr.msk.bf16.mxu1 %vm8139_vm3, %v10064_v16  ;;  %v3481_v34 = vmul.f32 %v8518_v60, %v3380_v11  ;;  %v3509_v52 = vpack.c.bf16 %v3483_v10, %v3482_v42 }
 0x455   : > { %v3508_v26 = vpack.c.bf16 %v3481_v34, %v3480_v32 }
 0x457   : > { %7619 = vmatpush3.bf16.msra.mxu1 %v3508_v26 }
 0x458   : > { %7624 = vmatprep.subr.bf16.mxu1 %v10064_v16 }
 0x45a   : > { %7621 = vmatmul.mubr.msk.bf16.vlgmr.msra.gmra.mxu1 %vm663_vm2, %v8351_v28 }
 0x45b   : > { %7625 = vmatpush3.bf16.msra.mxu1 %v3509_v52  ;;  %7626 = vmatprep.mubr.msk.bf16.mxu1 %vm8139_vm3, %v10064_v16  ;;  %v10082_v52 = vld [vmem:[#allocation9_spill] sm:$0xff] }
 0x45c   : > { %7630 = vmatprep.subr.bf16.mxu1 %v10064_v16 }
 0x45d   : > { %v7576_v33 = vpop.f32.mrf.mxu0 }
 0x45e   : > { %v3486_v6 = vmul.f32 %v8599_v46, %v7576_v33  ;;  %v10083_v33 = vld [vmem:[#allocation10_spill] sm:$0xff] }
 0x45f   : > { %v3393_v7 = vpop.f32.mrf.mxu0 }
 0x460   : > { %v3484_v40 = vmul.f32 %v8567_v55, %v3393_v7  ;;  %v10084_v7 = vld [vmem:[#allocation20_spill] sm:$0xff] }
 0x461   : > { %v7577_v15 = vpop.f32.mrf.mxu0 }
 0x462   : > { %7627 = vmatmul.mubr.msk.bf16.vlgmr.msra.gmra.mxu1 %vm663_vm2, %v8360_v35  ;;  %v3487_v36 = vmul.f32 %v8596_v39, %v7577_v15 }
 0x463   : > { %v3396_v53 = vpop.f32.mrf.mxu0  ;;  %7632 = vmatprep.mubr.msk.bf16.mxu1 %vm8139_vm3, %v10064_v16 }
 0x464   : > { %v3485_v37 = vmul.f32 %v8559_v38, %v3396_v53  ;;  %v3511_v50 = vpack.c.bf16 %v3487_v36, %v3486_v6 }
 0x465   : > { %v7580_v63 = vpop.f32.mrf.mxu0 }
 0x466   : > { %v3510_v59 = vpack.c.bf16 %v3485_v37, %v3484_v40  ;;  %v3490_v34 = vmul.f32 %v10068_v17, %v7580_v63 }
 0x467   : > { %v3409_v0 = vpop.f32.mrf.mxu0 }
 0x468   : > { %7631 = vmatpush3.bf16.msra.mxu1 %v3510_v59  ;;  %v3488_v27 = vmul.f32 %v10080_v56, %v3409_v0 }
 0x469   : > { %v7581_v51 = vpop.f32.mrf.mxu0  ;;  %7636 = vmatprep.subr.bf16.mxu1 %v10064_v16 }
 0x46a   : > { %v3491_v47 = vmul.f32 %v8613_v54, %v7581_v51 }
 0x46b   : > { %v3412_v58 = vpop.f32.mrf.mxu0  ;;  %7633 = vmatmul.mubr.msk.bf16.vlgmr.msra.gmra.mxu1 %vm663_vm2, %v10067_v19 }
 0x46c   : > { %v3489_v49 = vmul.f32 %v10081_v61, %v3412_v58  ;;  %7637 = vmatpush3.bf16.msra.mxu1 %v3511_v50  ;;  %7638 = vmatprep.mubr.msk.bf16.mxu1 %vm8139_vm3, %v10064_v16  ;;  %v3513_v26 = vpack.c.bf16 %v3491_v47, %v3490_v34  ;;  %v10085_v50 = vld [vmem:[#allocation11_spill] sm:$0xff]  ;;  %v10086_v58 = vld [vmem:[#allocation12_spill] sm:$0xff] }
 0x46d   : > { %v7584_v57 = vpop.f32.mrf.mxu0  ;;  %7648 = vmatprep.subr.bf16.mxu1 %v10064_v16 }
 0x46e   : > { %v3512_v11 = vpack.c.bf16 %v3489_v49, %v3488_v27  ;;  %v3494_v59 = vmul.f32 %v8645_v18, %v7584_v57 }
 0x46f   : > { %v3425_v32 = vpop.f32.mrf.mxu0 }
 0x470   : > { %7643 = vmatpush3.bf16.msra.mxu0 %v3512_v11  ;;  %v3492_v15 = vmul.f32 %v10084_v7, %v3425_v32 }
 0x471   : > { %v7585_v10 = vpop.f32.mrf.mxu0  ;;  %7654 = vmatprep.subr.bf16.mxu0 %v10064_v16 }
 0x472   : > { %v3495_v37 = vmul.f32 %v8643_v3, %v7585_v10 }
 0x473   : > { %v3428_v42 = vpop.f32.mrf.mxu0  ;;  %7639 = vmatmul.mubr.msk.bf16.vlgmr.msra.gmra.mxu1 %vm663_vm2, %v10082_v52  ;;  %7645 = vmatmul.mubr.msk.bf16.vlgmr.msra.gmra.mxu0 %vm663_vm2, %v10083_v33 }
 0x474   : > { %v3493_v53 = vmul.f32 %v10071_v21, %v3428_v42  ;;  %7649 = vmatpush3.bf16.msra.mxu1 %v3513_v26  ;;  %7650 = vmatprep.mubr.msk.bf16.mxu1 %vm8139_vm3, %v10064_v16  ;;  %v3515_v6 = vpack.c.bf16 %v3495_v37, %v3494_v59 }
 0x475   : > { %v7588_v40 = vpop.f32.mrf.mxu0  ;;  %7656 = vmatprep.mubr.msk.bf16.mxu0 %vm8139_vm3, %v10064_v16  ;;  %7660 = vmatprep.subr.bf16.mxu1 %v10064_v16 }
 0x476   : > { %v3514_v63 = vpack.c.bf16 %v3493_v53, %v3492_v15  ;;  %v3498_v34 = vmul.f32 %v8660_v30, %v7588_v40  ;;  %v10087_v15 = vld [vmem:[#allocation13_spill] sm:$0xff]  ;;  %v10088_v53 = vld [vmem:[#allocation14_spill] sm:$0xff] }
 0x477   : > { %v3441_v36 = vpop.f32.mrf.mxu0 }
 0x478   : > { %7655 = vmatpush3.bf16.msra.mxu0 %v3514_v63  ;;  %v3496_v27 = vmul.f32 %v8591_v25, %v3441_v36 }
 0x479   : > { %v7589_v0 = vpop.f32.mrf.mxu0  ;;  %7666 = vmatprep.subr.bf16.mxu0 %v10064_v16 }
 0x47a   : > { %v3499_v47 = vmul.f32 %v8658_v31, %v7589_v0  ;;  %v7982_v0 = vld [vmem:[%s9986_s9 + $0x8] sm:$0xff]  }
 0x47b   : > { %v3444_v51 = vpop.f32.mrf.mxu0  ;;  %7651 = vmatmul.mubr.msk.bf16.vlgmr.msra.gmra.mxu1 %vm663_vm2, %v10085_v50  ;;  %7657 = vmatmul.mubr.msk.bf16.vlgmr.msra.gmra.mxu0 %vm663_vm2, %v10086_v58 }
 0x47c   : > { %v3497_v49 = vmul.f32 %v8593_v5, %v3444_v51  ;;  %7661 = vmatpush3.bf16.msra.mxu1 %v3515_v6  ;;  %7662 = vmatprep.mubr.msk.bf16.mxu1 %vm8139_vm3, %v10064_v16  ;;  %v3517_v26 = vpack.c.bf16 %v3499_v47, %v3498_v34  ;;  %v10089_v51 = vld [vmem:[#allocation15_spill] sm:$0xff] }
 0x47d   : > { %v7592_v57 = vpop.f32.mrf.mxu0  ;;  %7668 = vmatprep.mubr.msk.bf16.mxu0 %vm8139_vm3, %v10064_v16  ;;  %7672 = vmatprep.subr.bf16.mxu1 %v10064_v16 }
 0x47e   : > { %v3516_v11 = vpack.c.bf16 %v3497_v49, %v3496_v27  ;;  %v3502_v59 = vmul.f32 %v8672_v43, %v7592_v57  ;;  %v10090_v27 = vld [vmem:[#allocation16_spill] sm:$0xff]  ;;  %v10091_v57 = vld [vmem:[#allocation17_spill] sm:$0xff] }
 0x47f   : > { %v3457_v32 = vpop.f32.mrf.mxu0  ;;  %v7983_v49 = vld [vmem:[%s9986_s9] sm:$0xff]  }
 0x480   : > { %7667 = vmatpush3.bf16.msra.mxu0 %v3516_v11  ;;  %v3500_v37 = vmul.f32 %v8619_v41, %v3457_v32  ;;  %v9118_v11 = vld [vmem:[%s9985_s8] ss:$0 sm:$0xff] }
 0x481   : > { %v7593_v10 = vpop.f32.mrf.mxu0  ;;  %7678 = vmatprep.subr.bf16.mxu0 %v10064_v16 }
 0x482   : > { %v3503_v40 = vmul.f32 %v8670_v48, %v7593_v10 }
 0x483   : > { %v3460_v42 = vpop.f32.mrf.mxu0  ;;  %7663 = vmatmul.mubr.msk.bf16.vlgmr.msra.gmra.mxu1 %vm663_vm2, %v10087_v15  ;;  %7669 = vmatmul.mubr.msk.bf16.vlgmr.msra.gmra.mxu0 %vm663_vm2, %v10088_v53 }
 0x484   : > { %v3501_v63 = vmul.f32 %v8623_v13, %v3460_v42  ;;  %7673 = vmatpush3.bf16.msra.mxu1 %v3517_v26  ;;  %7674 = vmatprep.mubr.msk.bf16.mxu1 %vm8139_vm3, %v10064_v16  ;;  %v3519_v6 = vpack.c.bf16 %v3503_v40, %v3502_v59 }
 0x485   : > { %7680 = vmatprep.mubr.msk.bf16.mxu0 %vm8139_vm3, %v10064_v16  ;;  %7684 = vmatprep.subr.bf16.mxu1 %v10064_v16 }
 0x486   : > { %v3518_v36 = vpack.c.bf16 %v3501_v63, %v3500_v37 }
 0x488   : > { %7679 = vmatpush3.bf16.msra.mxu0 %v3518_v36 }
 0x489   : > { %7690 = vmatprep.subr.bf16.mxu0 %v7982_v0 }
 0x48b   : > { %7675 = vmatmul.mubr.msk.bf16.vlgmr.msra.gmra.mxu1 %vm663_vm2, %v10089_v51  ;;  %7681 = vmatmul.mubr.msk.bf16.vlgmr.msra.gmra.mxu0 %vm663_vm2, %v10090_v27 }
 0x48c   : > { %7685 = vmatpush3.bf16.msra.mxu1 %v3519_v6  ;;  %7686 = vmatprep.mubr.msk.bf16.mxu1 %vm8139_vm3, %v10064_v16 }
 0x48d   : > { %7691 = vmatpush3.bf16.msra.mxu0 %v7982_v0  ;;  %7726 = vmatprep.subr.bf16.mxu1 %v10064_v16 }
 0x48e   : > { %7692 = vmatprep.subr.bf16.mxu0 %v7983_v49 }
 0x491   : > { %7693 = vmatpush3.bf16.msra.mxu0 %v7983_v49 }
 0x492   : > { %7774 = vmatprep.subr.bf16.mxu0 %v10064_v16 }
 0x493   : > { %7687 = vmatmul.mubr.msk.bf16.vlgmr.msra.gmra.mxu1 %vm663_vm2, %v10091_v57 }
 0x494   : > { %7728 = vmatprep.mubr.msk.bf16.mxu1 %vm8139_vm3, %v10064_v16 }
 0x4fa   : > { %v3554_v47 = vpop.f32.mrf.mxu1 }
 0x4fb   : > { %v4176_v32 = vmul.f32 %v8470_v1, %v3554_v47 }
 0x4fc   : > { %v7598_v34 = vpop.f32.mrf.mxu1 }
 0x4fd   : > { %v4215_v10 = vadd.f32 %v9118_v11, %v4176_v32 }
 0x4fe   : > { %v3557_v26 = vpop.f32.mrf.mxu1 }
 0x4ff   : > { %v4177_v42 = vmul.f32 %v8472_v2, %v3557_v26  ;;  %v4279_v63 = vmul.f32 0.01, %v4215_v10  ;;  %vm4247_vm9 = vcmp.ge.f32.partialorder %v4215_v10, 0.0 }
 0x500   : > { %v7599_v37 = vpop.f32.mrf.mxu1 }
 0x501   : > { %v4216_v40 = vadd.f32 %v9118_v11, %v4177_v42  ;;  %v4311_v49 = vsel %vm4247_vm9, %v4215_v10, %v4279_v63 }
 0x502   : > { %v3595_v36 = vpop.f32.mrf.mxu1 }
 0x503   : > { %vm4248_vm10 = vcmp.ge.f32.partialorder %v4216_v40, 0.0  ;;  %v4280_v59 = vmul.f32 0.01, %v4216_v40  ;;  %v4178_v0 = vmul.f32 %v8478_v12, %v3595_v36 }
 0x504   : > { %v7604_v6 = vpop.f32.mrf.mxu1 }
 0x505   : > { %v4312_v57 = vsel %vm4248_vm10, %v4216_v40, %v4280_v59  ;;  %v4217_v47 = vadd.f32 %v9118_v11, %v4178_v0 }
 0x506   : > { %v3598_v34 = vpop.f32.mrf.mxu1  ;;  %v4343_v32 = vpack.c.bf16 %v4312_v57, %v4311_v49 }
 0x507   : > { %v4179_v27 = vmul.f32 %v8474_v4, %v3598_v34  ;;  %v4281_v37 = vmul.f32 0.01, %v4217_v47  ;;  %vm4249_vm11 = vcmp.ge.f32.partialorder %v4217_v47, 0.0 }
 0x508   : > { %v7605_v26 = vpop.f32.mrf.mxu1  ;;  %7694 = vmatprep.mubr.msk.bf16.mxu0 %vm2150_vm6, %v4343_v32 }
 0x509   : > { %v4218_v42 = vadd.f32 %v9118_v11, %v4179_v27  ;;  %v4313_v63 = vsel %vm4249_vm11, %v4217_v47, %v4281_v37 }
 0x50a   : > { %v3636_v51 = vpop.f32.mrf.mxu1 }
 0x50b   : > { %vm4250_vm12 = vcmp.ge.f32.partialorder %v4218_v42, 0.0  ;;  %v4282_v53 = vmul.f32 0.01, %v4218_v42  ;;  %v4180_v36 = vmul.f32 %v8484_v24, %v3636_v51 }
 0x50c   : > { %v7610_v10 = vpop.f32.mrf.mxu1 }
 0x50d   : > { %v4314_v40 = vsel %vm4250_vm12, %v4218_v42, %v4282_v53  ;;  %v4219_v59 = vadd.f32 %v9118_v11, %v4180_v36 }
 0x50e   : > { %v4344_v57 = vpack.c.bf16 %v4314_v40, %v4313_v63  ;;  %v3639_v0 = vpop.f32.mrf.mxu1 }
 0x50f   : > { %v4181_v6 = vmul.f32 %v8481_v20, %v3639_v0  ;;  %v4283_v34 = vmul.f32 0.01, %v4219_v59  ;;  %vm4251_vm13 = vcmp.ge.f32.partialorder %v4219_v59, 0.0 }
 0x510   : > { %v7611_v49 = vpop.f32.mrf.mxu1  ;;  %7695 = vmatmul.mubr.msk.bf16.vlgmr.msra.gmra.mxu0 %vm2150_vm6, %v4344_v57 }
 0x511   : > { %v4220_v27 = vadd.f32 %v9118_v11, %v4181_v6  ;;  %v4315_v53 = vsel %vm4251_vm13, %v4219_v59, %v4283_v34 }
 0x512   : > { %v3677_v32 = vpop.f32.mrf.mxu1 }
 0x513   : > { %vm4252_vm14 = vcmp.ge.f32.partialorder %v4220_v27, 0.0  ;;  %v4284_v26 = vmul.f32 0.01, %v4220_v27  ;;  %v4182_v51 = vmul.f32 %v8502_v45, %v3677_v32 }
 0x514   : > { %v7616_v47 = vpop.f32.mrf.mxu1 }
 0x515   : > { %v4316_v37 = vsel %vm4252_vm14, %v4220_v27, %v4284_v26  ;;  %v4221_v42 = vadd.f32 %v9118_v11, %v4182_v51 }
 0x516   : > { %v3680_v36 = vpop.f32.mrf.mxu1  ;;  %v4345_v10 = vpack.c.bf16 %v4316_v37, %v4315_v53 }
 0x517   : > { %v4183_v63 = vmul.f32 %v8500_v44, %v3680_v36  ;;  %v4285_v57 = vmul.f32 0.01, %v4221_v42  ;;  %vm4253_vm15 = vcmp.ge.f32.partialorder %v4221_v42, 0.0 }
 0x518   : > { %v7617_v40 = vpop.f32.mrf.mxu1  ;;  %7698 = vmatprep.mubr.msk.bf16.mxu0 %vm2150_vm6, %v4345_v10 }
 0x519   : > { %v4222_v0 = vadd.f32 %v9118_v11, %v4183_v63  ;;  %v4317_v32 = vsel %vm4253_vm15, %v4221_v42, %v4285_v57 }
 0x51a   : > { %v3718_v49 = vpop.f32.mrf.mxu1 }
 0x51b   : > { %vm4254_vm0 = vcmp.ge.f32.partialorder %v4222_v0, 0.0  ;;  %v4286_v6 = vmul.f32 0.01, %v4222_v0  ;;  %v4184_v59 = vmul.f32 %v8520_v62, %v3718_v49 }
 0x51c   : > { %v7622_v27 = vpop.f32.mrf.mxu1 }
 0x51d   : > { %v4318_v47 = vsel %vm4254_vm0, %v4222_v0, %v4286_v6  ;;  %v4223_v26 = vadd.f32 %v9118_v11, %v4184_v59 }
 0x51e   : > { %v4346_v34 = vpack.c.bf16 %v4318_v47, %v4317_v32  ;;  %v3721_v51 = vpop.f32.mrf.mxu1 }
 0x51f   : > { %v4185_v53 = vmul.f32 %v8518_v60, %v3721_v51  ;;  %v4287_v36 = vmul.f32 0.01, %v4223_v26  ;;  %vm4255_vm4 = vcmp.ge.f32.partialorder %v4223_v26, 0.0 }
 0x520   : > { %7699 = vmatmul.mubr.msk.bf16.gmra.mxu0 %vm2150_vm6, %v4346_v34  ;;  %v7623_v37 = vpop.f32.mrf.mxu1 }
 0x521   : > { %v4224_v10 = vadd.f32 %v9118_v11, %v4185_v53  ;;  %v4319_v0 = vsel %vm4255_vm4, %v4223_v26, %v4287_v36 }
 0x522   : > { %v3759_v63 = vpop.f32.mrf.mxu1 }
 0x523   : > { %vm4256_vm5 = vcmp.ge.f32.partialorder %v4224_v10, 0.0  ;;  %v4288_v42 = vmul.f32 0.01, %v4224_v10  ;;  %v4186_v40 = vmul.f32 %v8546_v29, %v3759_v63 }
 0x524   : > { %v7628_v57 = vpop.f32.mrf.mxu1 }
 0x525   : > { %v4320_v6 = vsel %vm4256_vm5, %v4224_v10, %v4288_v42  ;;  %v4225_v49 = vadd.f32 %v9118_v11, %v4186_v40 }
 0x526   : > { %v3762_v32 = vpop.f32.mrf.mxu1  ;;  %v4347_v47 = vpack.c.bf16 %v4320_v6, %v4319_v0 }
 0x527   : > { %v4187_v59 = vmul.f32 %v8543_v22, %v3762_v32  ;;  %v4289_v27 = vmul.f32 0.01, %v4225_v49  ;;  %vm4257_vm7 = vcmp.ge.f32.partialorder %v4225_v49, 0.0 }
 0x528   : > { %v7629_v34 = vpop.f32.mrf.mxu1  ;;  %7702 = vmatprep.mubr.msk.bf16.mxu0 %vm2150_vm6, %v4347_v47 }
 0x529   : > { %v4226_v51 = vadd.f32 %v9118_v11, %v4187_v59  ;;  %v4321_v36 = vsel %vm4257_vm7, %v4225_v49, %v4289_v27 }
 0x52b   : > { %v3800_v53 = vpop.f32.mrf.mxu1  ;;  %vm4258_vm8 = vcmp.ge.f32.partialorder %v4226_v51, 0.0  ;;  %v4290_v37 = vmul.f32 0.01, %v4226_v51 }
 0x52c   : > { %v4188_v63 = vmul.f32 %v8567_v55, %v3800_v53 }
 0x52d   : > { %v7634_v26 = vpop.f32.mrf.mxu1  ;;  %v4322_v10 = vsel %vm4258_vm8, %v4226_v51, %v4290_v37 }
 0x52e   : > { %v4227_v42 = vadd.f32 %v9118_v11, %v4188_v63  ;;  %v4348_v40 = vpack.c.bf16 %v4322_v10, %v4321_v36 }
 0x52f   : > { %v3803_v57 = vpop.f32.mrf.mxu1 }
 0x530   : > { %v4189_v0 = vmul.f32 %v8559_v38, %v3803_v57  ;;  %7703 = vmatmul.mubr.msk.bf16.gmra.mxu0 %vm2150_vm6, %v4348_v40  ;;  %v4291_v32 = vmul.f32 0.01, %v4227_v42  ;;  %vm4259_vm9 = vcmp.ge.f32.partialorder %v4227_v42, 0.0 }
 0x531   : > { %v7635_v6 = vpop.f32.mrf.mxu1 }
 0x532   : > { %v4228_v47 = vadd.f32 %v9118_v11, %v4189_v0  ;;  %v4323_v63 = vsel %vm4259_vm9, %v4227_v42, %v4291_v32 }
 0x533   : > { %v3841_v59 = vpop.f32.mrf.mxu1  ;;  %v3882_v34 = vpop.f32.mrf.mxu0 }
 0x534   : > { %vm4260_vm10 = vcmp.ge.f32.partialorder %v4228_v47, 0.0  ;;  %v4292_v53 = vmul.f32 0.01, %v4228_v47  ;;  %v4190_v49 = vmul.f32 %v8599_v46, %v3841_v59  ;;  %v4192_v27 = vmul.f32 %v10080_v56, %v3882_v34 }
 0x535   : > { %v7640_v51 = vpop.f32.mrf.mxu1  ;;  %v7646_v37 = vpop.f32.mrf.mxu0 }
 0x536   : > { %v4324_v26 = vsel %vm4260_vm10, %v4228_v47, %v4292_v53  ;;  %v4229_v36 = vadd.f32 %v9118_v11, %v4190_v49  ;;  %v4231_v0 = vadd.f32 %v9118_v11, %v4192_v27 }
 0x537   : > { %v3844_v10 = vpop.f32.mrf.mxu1  ;;  %v3885_v40 = vpop.f32.mrf.mxu0  ;;  %v4349_v57 = vpack.c.bf16 %v4324_v26, %v4323_v63 }
 0x538   : > { %v4191_v6 = vmul.f32 %v8596_v39, %v3844_v10  ;;  %v4193_v15 = vmul.f32 %v10081_v61, %v3885_v40  ;;  %vm4261_vm11 = vcmp.ge.f32.partialorder %v4229_v36, 0.0  ;;  %v4293_v59 = vmul.f32 0.01, %v4229_v36 }
 0x539   : > { %v7641_v58 = vpop.f32.mrf.mxu1  ;;  %v7647_v50 = vpop.f32.mrf.mxu0  ;;  %7706 = vmatprep.mubr.msk.bf16.mxu0 %vm2150_vm6, %v4349_v57  ;;  %vm4263_vm12 = vcmp.ge.f32.partialorder %v4231_v0, 0.0  ;;  %v4295_v53 = vmul.f32 0.01, %v4231_v0 }
 0x53a   : > { %v4230_v42 = vadd.f32 %v9118_v11, %v4191_v6  ;;  %v4232_v32 = vadd.f32 %v9118_v11, %v4193_v15  ;;  %v4325_v63 = vsel %vm4261_vm11, %v4229_v36, %v4293_v59 }
 0x53b   : > { %v3923_v47 = vpop.f32.mrf.mxu1  ;;  %v3964_v34 = vpop.f32.mrf.mxu0  ;;  %v4327_v6 = vsel %vm4263_vm12, %v4231_v0, %v4295_v53 }
 0x53c   : > { %v4194_v49 = vmul.f32 %v10068_v17, %v3923_v47  ;;  %v4196_v27 = vmul.f32 %v10084_v7, %v3964_v34  ;;  %vm4262_vm13 = vcmp.ge.f32.partialorder %v4230_v42, 0.0  ;;  %v4294_v51 = vmul.f32 0.01, %v4230_v42 }
 0x53d   : > { %vm4264_vm14 = vcmp.ge.f32.partialorder %v4232_v32, 0.0  ;;  %v4296_v50 = vmul.f32 0.01, %v4232_v32  ;;  %v7652_v58 = vpop.f32.mrf.mxu1  ;;  %v7658_v37 = vpop.f32.mrf.mxu0 }
 0x53e   : > { %v4326_v26 = vsel %vm4262_vm13, %v4230_v42, %v4294_v51  ;;  %v4233_v15 = vadd.f32 %v9118_v11, %v4194_v49  ;;  %v4235_v47 = vadd.f32 %v9118_v11, %v4196_v27 }
 0x53f   : > { %v4328_v10 = vsel %vm4264_vm14, %v4232_v32, %v4296_v50  ;;  %v3926_v40 = vpop.f32.mrf.mxu1  ;;  %v3967_v57 = vpop.f32.mrf.mxu0  ;;  %v4350_v33 = vpack.c.bf16 %v4326_v26, %v4325_v63 }
 0x540   : > { %v4195_v34 = vmul.f32 %v8613_v54, %v3926_v40  ;;  %v4197_v7 = vmul.f32 %v10071_v21, %v3967_v57  ;;  %v4351_v37 = vpack.c.bf16 %v4328_v10, %v4327_v6  ;;  %vm4265_vm15 = vcmp.ge.f32.partialorder %v4233_v15, 0.0 }
 0x541   : > { %v7653_v52 = vpop.f32.mrf.mxu1  ;;  %v7659_v58 = vpop.f32.mrf.mxu0  ;;  %7707 = vmatmul.mubr.msk.bf16.gmra.mxu0 %vm2150_vm6, %v4350_v33  ;;  %v4297_v36 = vmul.f32 0.01, %v4233_v15  ;;  %vm4267_vm0 = vcmp.ge.f32.partialorder %v4235_v47, 0.0  ;;  %v4299_v53 = vmul.f32 0.01, %v4235_v47 }
 0x542   : > { %v4234_v59 = vadd.f32 %v9118_v11, %v4195_v34  ;;  %v4236_v42 = vadd.f32 %v9118_v11, %v4197_v7  ;;  %7710 = vmatprep.mubr.msk.bf16.mxu0 %vm2150_vm6, %v4351_v37 }
 0x543   : > { %v4005_v0 = vpop.f32.mrf.mxu1  ;;  %v4046_v32 = vpop.f32.mrf.mxu0  ;;  %v4329_v63 = vsel %vm4265_vm15, %v4233_v15, %v4297_v36  ;;  %v4331_v6 = vsel %vm4267_vm0, %v4235_v47, %v4299_v53 }
 0x544   : > { %v4198_v49 = vmul.f32 %v8645_v18, %v4005_v0  ;;  %v4200_v52 = vmul.f32 %v8591_v25, %v4046_v32  ;;  %vm4266_vm4 = vcmp.ge.f32.partialorder %v4234_v59, 0.0  ;;  %v4298_v27 = vmul.f32 0.01, %v4234_v59 }
 0x545   : > { %vm4268_vm5 = vcmp.ge.f32.partialorder %v4236_v42, 0.0  ;;  %v4300_v33 = vmul.f32 0.01, %v4236_v42  ;;  %v7664_v51 = vpop.f32.mrf.mxu1  ;;  %v7670_v50 = vpop.f32.mrf.mxu0 }
 0x546   : > { %v4330_v26 = vsel %vm4266_vm4, %v4234_v59, %v4298_v27  ;;  %v4237_v10 = vadd.f32 %v9118_v11, %v4198_v49  ;;  %v4239_v58 = vadd.f32 %v9118_v11, %v4200_v52 }
 0x547   : > { %v4332_v7 = vsel %vm4268_vm5, %v4236_v42, %v4300_v33  ;;  %v4008_v40 = vpop.f32.mrf.mxu1  ;;  %v4049_v57 = vpop.f32.mrf.mxu0  ;;  %v4352_v34 = vpack.c.bf16 %v4330_v26, %v4329_v63 }
 0x548   : > { %v4199_v37 = vmul.f32 %v8643_v3, %v4008_v40  ;;  %v4201_v0 = vmul.f32 %v8593_v5, %v4049_v57  ;;  %v4353_v50 = vpack.c.bf16 %v4332_v7, %v4331_v6  ;;  %vm4269_vm7 = vcmp.ge.f32.partialorder %v4237_v10, 0.0 }
 0x549   : > { %v7665_v32 = vpop.f32.mrf.mxu1  ;;  %v7671_v51 = vpop.f32.mrf.mxu0  ;;  %7711 = vmatmul.mubr.msk.bf16.gmra.mxu0 %vm2150_vm6, %v4352_v34  ;;  %v4301_v15 = vmul.f32 0.01, %v4237_v10  ;;  %vm4271_vm8 = vcmp.ge.f32.partialorder %v4239_v58, 0.0  ;;  %v4303_v53 = vmul.f32 0.01, %v4239_v58 }
 0x54a   : > { %v4238_v36 = vadd.f32 %v9118_v11, %v4199_v37  ;;  %v4240_v59 = vadd.f32 %v9118_v11, %v4201_v0  ;;  %7714 = vmatprep.mubr.msk.bf16.mxu0 %vm2150_vm6, %v4353_v50 }
 0x54b   : > { %v4087_v47 = vpop.f32.mrf.mxu1  ;;  %v4128_v42 = vpop.f32.mrf.mxu0  ;;  %v4333_v7 = vsel %vm4269_vm7, %v4237_v10, %v4301_v15  ;;  %v4335_v0 = vsel %vm4271_vm8, %v4239_v58, %v4303_v53 }
 0x54c   : > { %v4202_v49 = vmul.f32 %v8660_v30, %v4087_v47  ;;  %v4204_v52 = vmul.f32 %v8619_v41, %v4128_v42  ;;  %vm4270_vm9 = vcmp.ge.f32.partialorder %v4238_v36, 0.0  ;;  %v4302_v27 = vmul.f32 0.01, %v4238_v36 }
 0x54d   : > { %vm4272_vm10 = vcmp.ge.f32.partialorder %v4240_v59, 0.0  ;;  %v4304_v33 = vmul.f32 0.01, %v4240_v59  ;;  %v7676_v63 = vpop.f32.mrf.mxu1  ;;  %v7682_v26 = vpop.f32.mrf.mxu0 }
 0x54e   : > { %v4334_v40 = vsel %vm4270_vm9, %v4238_v36, %v4302_v27  ;;  %v4241_v6 = vadd.f32 %v9118_v11, %v4202_v49  ;;  %v4243_v51 = vadd.f32 %v9118_v11, %v4204_v52 }
 0x54f   : > { %v4336_v57 = vsel %vm4272_vm10, %v4240_v59, %v4304_v33  ;;  %v4090_v34 = vpop.f32.mrf.mxu1  ;;  %v4131_v37 = vpop.f32.mrf.mxu0  ;;  %v4354_v32 = vpack.c.bf16 %v4334_v40, %v4333_v7 }
 0x550   : > { %v4203_v50 = vmul.f32 %v8658_v31, %v4090_v34  ;;  %v4205_v47 = vmul.f32 %v8623_v13, %v4131_v37  ;;  %v4355_v63 = vpack.c.bf16 %v4336_v57, %v4335_v0  ;;  %v4305_v10 = vmul.f32 0.01, %v4241_v6 }
 0x551   : > { %v7677_v42 = vpop.f32.mrf.mxu1  ;;  %v7683_v26 = vpop.f32.mrf.mxu0  ;;  %7715 = vmatmul.mubr.msk.bf16.gmra.mxu0 %vm2150_vm6, %v4354_v32  ;;  %vm4273_vm11 = vcmp.ge.f32.partialorder %v4241_v6, 0.0  ;;  %vm4275_vm12 = vcmp.ge.f32.partialorder %v4243_v51, 0.0  ;;  %v4307_v59 = vmul.f32 0.01, %v4243_v51 }
 0x552   : > { %v4242_v15 = vadd.f32 %v9118_v11, %v4203_v50  ;;  %v4244_v36 = vadd.f32 %v9118_v11, %v4205_v47  ;;  %7718 = vmatprep.mubr.msk.bf16.mxu0 %vm2150_vm6, %v4355_v63  ;;  %v4337_v7 = vsel %vm4273_vm11, %v4241_v6, %v4305_v10 }
 0x553   : > { %v4169_v58 = vpop.f32.mrf.mxu1  ;;  %v4339_v37 = vsel %vm4275_vm12, %v4243_v51, %v4307_v59 }
 0x554   : > { %v4206_v53 = vmul.f32 %v8672_v43, %v4169_v58  ;;  %vm4274_vm13 = vcmp.ge.f32.partialorder %v4242_v15, 0.0  ;;  %v4306_v49 = vmul.f32 0.01, %v4242_v15  ;;  %vm4276_vm14 = vcmp.ge.f32.partialorder %v4244_v36, 0.0 }
 0x555   : > { %v4308_v52 = vmul.f32 0.01, %v4244_v36  ;;  %v7688_v27 = vpop.f32.mrf.mxu1 }
 0x556   : > { %v4245_v33 = vadd.f32 %v9118_v11, %v4206_v53  ;;  %v4338_v40 = vsel %vm4274_vm13, %v4242_v15, %v4306_v49 }
 0x557   : > { %v4340_v57 = vsel %vm4276_vm14, %v4244_v36, %v4308_v52  ;;  %v4172_v34 = vpop.f32.mrf.mxu1  ;;  %v4356_v0 = vpack.c.bf16 %v4338_v40, %v4337_v7 }
 0x558   : > { %v4207_v32 = vmul.f32 %v8670_v48, %v4172_v34  ;;  %v4357_v50 = vpack.c.bf16 %v4340_v57, %v4339_v37  ;;  %v4309_v42 = vmul.f32 0.01, %v4245_v33  ;;  %vm4277_vm15 = vcmp.ge.f32.partialorder %v4245_v33, 0.0 }
 0x559   : > { %v7689_v47 = vpop.f32.mrf.mxu1  ;;  %7719 = vmatmul.mubr.msk.bf16.gmra.mxu0 %vm2150_vm6, %v4356_v0 }
 0x55a   : > { %v4246_v63 = vadd.f32 %v9118_v11, %v4207_v32  ;;  %7722 = vmatprep.mubr.msk.bf16.mxu0 %vm2150_vm6, %v4357_v50  ;;  %v4341_v6 = vsel %vm4277_vm15, %v4245_v33, %v4309_v42 }
 0x55c   : > { %vm4278_vm0 = vcmp.ge.f32.partialorder %v4246_v63, 0.0  ;;  %v4310_v26 = vmul.f32 0.01, %v4246_v63 }
 0x55e   : > { %v4342_v10 = vsel %vm4278_vm0, %v4246_v63, %v4310_v26 }
 0x55f   : > { %v4358_v15 = vpack.c.bf16 %v4342_v10, %v4341_v6 }
 0x561   : > { %7723 = vmatmul.mubr.msk.bf16.gmra.mxu0 %vm2150_vm6, %v4358_v15 }
 0x562   : > { %7776 = vmatprep.mubr.msk.bf16.mxu0 %vm8139_vm3, %v10064_v16 }
 0x5d0   : > { %v7696_v51 = vpop.f32.mrf.mxu0 }
 0x5d1   : > { %v4586_v27 = vmul.f32 %v8478_v12, %v7696_v51 }
 0x5d2   : > { %v4457_v36 = vpop.f32.mrf.mxu0 }
 0x5d3   : > { %v4584_v11 = vmul.f32 %v8470_v1, %v4457_v36 }
 0x5d4   : > { %v7697_v58 = vpop.f32.mrf.mxu0 }
 0x5d5   : > { %v4587_v49 = vmul.f32 %v8474_v4, %v7697_v58 }
 0x5d6   : > { %v4460_v59 = vpop.f32.mrf.mxu0 }
 0x5d7   : > { %v4585_v53 = vmul.f32 %v8472_v2, %v4460_v59  ;;  %v4617_v33 = vpack.c.bf16 %v4587_v49, %v4586_v27 }
 0x5d9   : > { %v4616_v52 = vpack.c.bf16 %v4585_v53, %v4584_v11 }
 0x5db   : > { %7727 = vmatpush3.bf16.msra.mxu1 %v4616_v52 }
 0x5dc   : > { %7732 = vmatprep.subr.bf16.mxu1 %v10064_v16 }
 0x5de   : > { %7729 = vmatmul.mubr.msk.bf16.vlgmr.msra.gmra.mxu1 %vm663_vm2, %v8324_v9 }
 0x5df   : > { %7733 = vmatpush3.bf16.msra.mxu1 %v4617_v33  ;;  %7734 = vmatprep.mubr.msk.bf16.mxu1 %vm8139_vm3, %v10064_v16 }
 0x5e0   : > { %v7700_v7 = vpop.f32.mrf.mxu0  ;;  %7738 = vmatprep.subr.bf16.mxu1 %v10064_v16 }
 0x5e1   : > { %v4590_v50 = vmul.f32 %v8502_v45, %v7700_v7 }
 0x5e2   : > { %v4473_v40 = vpop.f32.mrf.mxu0 }
 0x5e3   : > { %v4588_v37 = vmul.f32 %v8484_v24, %v4473_v40 }
 0x5e4   : > { %v7701_v57 = vpop.f32.mrf.mxu0 }
 0x5e5   : > { %v4591_v9 = vmul.f32 %v8500_v44, %v7701_v57 }
 0x5e6   : > { %v4476_v34 = vpop.f32.mrf.mxu0  ;;  %7735 = vmatmul.mubr.msk.bf16.vlgmr.msra.gmra.mxu1 %vm663_vm2, %v8321_v8 }
 0x5e7   : > { %v4589_v0 = vmul.f32 %v8481_v20, %v4476_v34  ;;  %7740 = vmatprep.mubr.msk.bf16.mxu1 %vm8139_vm3, %v10064_v16  ;;  %v4619_v47 = vpack.c.bf16 %v4591_v9, %v4590_v50 }
 0x5e9   : > { %v4618_v32 = vpack.c.bf16 %v4589_v0, %v4588_v37 }
 0x5eb   : > { %7739 = vmatpush3.bf16.msra.mxu1 %v4618_v32 }
 0x5ec   : > { %7744 = vmatprep.subr.bf16.mxu1 %v10064_v16 }
 0x5ee   : > { %7741 = vmatmul.mubr.msk.bf16.vlgmr.msra.gmra.mxu1 %vm663_vm2, %v8331_v14 }
 0x5ef   : > { %7745 = vmatpush3.bf16.msra.mxu1 %v4619_v47  ;;  %7746 = vmatprep.mubr.msk.bf16.mxu1 %vm8139_vm3, %v10064_v16 }
 0x5f0   : > { %7750 = vmatprep.subr.bf16.mxu1 %v10064_v16  ;;  %v7704_v8 = vpop.f32.mrf.mxu0 }
 0x5f1   : > { %v4594_v51 = vmul.f32 %v8546_v29, %v7704_v8 }
 0x5f2   : > { %v4489_v42 = vpop.f32.mrf.mxu0 }
 0x5f3   : > { %v4592_v6 = vmul.f32 %v8520_v62, %v4489_v42 }
 0x5f4   : > { %v7705_v63 = vpop.f32.mrf.mxu0 }
 0x5f5   : > { %v4595_v10 = vmul.f32 %v8543_v22, %v7705_v63  ;;  %v10092_v63 = vld [vmem:[#allocation9_spill] sm:$0xff] }
 0x5f6   : > { %7747 = vmatmul.mubr.msk.bf16.vlgmr.msra.gmra.mxu1 %vm663_vm2, %v8342_v23  ;;  %v4492_v26 = vpop.f32.mrf.mxu0 }
 0x5f7   : > { %7752 = vmatprep.mubr.msk.bf16.mxu1 %vm8139_vm3, %v10064_v16  ;;  %v4593_v14 = vmul.f32 %v8518_v60, %v4492_v26  ;;  %v4621_v36 = vpack.c.bf16 %v4595_v10, %v4594_v51  ;;  %v10093_v26 = vld [vmem:[#allocation10_spill] sm:$0xff] }
 0x5f9   : > { %v4620_v15 = vpack.c.bf16 %v4593_v14, %v4592_v6  ;;  %v10094_v6 = vld [vmem:[#allocation20_spill] sm:$0xff] }
 0x5fb   : > { %7751 = vmatpush3.bf16.msra.mxu1 %v4620_v15 }
 0x5fc   : > { %7756 = vmatprep.subr.bf16.mxu1 %v10064_v16 }
 0x5fe   : > { %7753 = vmatmul.mubr.msk.bf16.vlgmr.msra.gmra.mxu1 %vm663_vm2, %v8351_v28 }
 0x5ff   : > { %7757 = vmatpush3.bf16.msra.mxu1 %v4621_v36  ;;  %7758 = vmatprep.mubr.msk.bf16.mxu1 %vm8139_vm3, %v10064_v16 }
 0x600   : > { %7762 = vmatprep.subr.bf16.mxu1 %v10064_v16 }
 0x601   : > { %v7708_v23 = vpop.f32.mrf.mxu0 }
 0x602   : > { %v4598_v7 = vmul.f32 %v8599_v46, %v7708_v23 }
 0x603   : > { %v4505_v58 = vpop.f32.mrf.mxu0 }
 0x604   : > { %v4596_v53 = vmul.f32 %v8567_v55, %v4505_v58 }
 0x605   : > { %v7709_v59 = vpop.f32.mrf.mxu0 }
 0x606   : > { %7759 = vmatmul.mubr.msk.bf16.vlgmr.msra.gmra.mxu1 %vm663_vm2, %v8360_v35  ;;  %v4599_v52 = vmul.f32 %v8596_v39, %v7709_v59 }
 0x607   : > { %v4508_v11 = vpop.f32.mrf.mxu0  ;;  %7764 = vmatprep.mubr.msk.bf16.mxu1 %vm8139_vm3, %v10064_v16 }
 0x608   : > { %v4597_v28 = vmul.f32 %v8559_v38, %v4508_v11  ;;  %v4623_v35 = vpack.c.bf16 %v4599_v52, %v4598_v7 }
 0x609   : > { %v7712_v49 = vpop.f32.mrf.mxu0 }
 0x60a   : > { %v4622_v27 = vpack.c.bf16 %v4597_v28, %v4596_v53  ;;  %v4602_v47 = vmul.f32 %v10068_v17, %v7712_v49  ;;  %v10095_v28 = vld [vmem:[#allocation11_spill] sm:$0xff]  ;;  %v10096_v49 = vld [vmem:[#allocation12_spill] sm:$0xff] }
 0x60b   : > { %v4521_v33 = vpop.f32.mrf.mxu0 }
 0x60c   : > { %7763 = vmatpush3.bf16.msra.mxu1 %v4622_v27  ;;  %v4600_v34 = vmul.f32 %v10080_v56, %v4521_v33 }
 0x60d   : > { %v7713_v40 = vpop.f32.mrf.mxu0  ;;  %7768 = vmatprep.subr.bf16.mxu1 %v10064_v16 }
 0x60e   : > { %v4603_v9 = vmul.f32 %v8613_v54, %v7713_v40 }
 0x60f   : > { %v4524_v57 = vpop.f32.mrf.mxu0  ;;  %7765 = vmatmul.mubr.msk.bf16.vlgmr.msra.gmra.mxu1 %vm663_vm2, %v10067_v19 }
 0x610   : > { %v4601_v37 = vmul.f32 %v10081_v61, %v4524_v57  ;;  %7769 = vmatpush3.bf16.msra.mxu1 %v4623_v35  ;;  %7770 = vmatprep.mubr.msk.bf16.mxu1 %vm8139_vm3, %v10064_v16  ;;  %v4625_v19 = vpack.c.bf16 %v4603_v9, %v4602_v47  ;;  %v10097_v9 = vld [vmem:[#allocation13_spill] sm:$0xff] }
 0x611   : > { %v7716_v0 = vpop.f32.mrf.mxu0  ;;  %7780 = vmatprep.subr.bf16.mxu1 %v10064_v16 }
 0x612   : > { %v4624_v32 = vpack.c.bf16 %v4601_v37, %v4600_v34  ;;  %v4606_v58 = vmul.f32 %v8645_v18, %v7716_v0 }
 0x613   : > { %v4537_v50 = vpop.f32.mrf.mxu0 }
 0x614   : > { %7775 = vmatpush3.bf16.msra.mxu0 %v4624_v32  ;;  %v4604_v14 = vmul.f32 %v10094_v6, %v4537_v50  ;;  %v10098_v32 = vld [vmem:[#allocation14_spill] sm:$0xff] }
 0x615   : > { %v7717_v8 = vpop.f32.mrf.mxu0  ;;  %7786 = vmatprep.subr.bf16.mxu0 %v10064_v16 }
 0x616   : > { %v4607_v51 = vmul.f32 %v8643_v3, %v7717_v8 }
 0x617   : > { %v4540_v42 = vpop.f32.mrf.mxu0  ;;  %7771 = vmatmul.mubr.msk.bf16.vlgmr.msra.gmra.mxu1 %vm663_vm2, %v10092_v63  ;;  %7777 = vmatmul.mubr.msk.bf16.vlgmr.msra.gmra.mxu0 %vm663_vm2, %v10093_v26  ;;  %v7984_v63 = vld [vmem:[%s9988_s11 + $0x8] sm:$0xff]  }
 0x618   : > { %v4605_v10 = vmul.f32 %v10071_v21, %v4540_v42  ;;  %7781 = vmatpush3.bf16.msra.mxu1 %v4625_v19  ;;  %7782 = vmatprep.mubr.msk.bf16.mxu1 %vm8139_vm3, %v10064_v16  ;;  %v4627_v11 = vpack.c.bf16 %v4607_v51, %v4606_v58  ;;  %v10101_v51 = vld [vmem:[#allocation17_spill] sm:$0xff] }
 0x619   : > { %v7720_v15 = vpop.f32.mrf.mxu0  ;;  %7788 = vmatprep.mubr.msk.bf16.mxu0 %vm8139_vm3, %v10064_v16  ;;  %7792 = vmatprep.subr.bf16.mxu1 %v10064_v16 }
 0x61a   : > { %v4626_v36 = vpack.c.bf16 %v4605_v10, %v4604_v14  ;;  %v4610_v57 = vmul.f32 %v8660_v30, %v7720_v15  ;;  %v10099_v14 = vld [vmem:[#allocation15_spill] sm:$0xff]  ;;  %v10100_v10 = vld [vmem:[#allocation16_spill] sm:$0xff] }
 0x61b   : > { %v4553_v23 = vpop.f32.mrf.mxu0  ;;  %v7985_v15 = vld [vmem:[%s9988_s11] sm:$0xff]  }
 0x61c   : > { %7787 = vmatpush3.bf16.msra.mxu0 %v4626_v36  ;;  %v4608_v52 = vmul.f32 %v8591_v25, %v4553_v23  ;;  %v9323_v23 = vld [vmem:[%s9987_s10] ss:$0 sm:$0xff] }
 0x61d   : > { %v7721_v59 = vpop.f32.mrf.mxu0  ;;  %7798 = vmatprep.subr.bf16.mxu0 %v10064_v16 }
 0x61e   : > { %v4611_v7 = vmul.f32 %v8658_v31, %v7721_v59 }
 0x61f   : > { %v4556_v53 = vpop.f32.mrf.mxu0  ;;  %7783 = vmatmul.mubr.msk.bf16.vlgmr.msra.gmra.mxu1 %vm663_vm2, %v10095_v28  ;;  %7789 = vmatmul.mubr.msk.bf16.vlgmr.msra.gmra.mxu0 %vm663_vm2, %v10096_v49 }
 0x620   : > { %v4609_v27 = vmul.f32 %v8593_v5, %v4556_v53  ;;  %7793 = vmatpush3.bf16.msra.mxu1 %v4627_v11  ;;  %7794 = vmatprep.mubr.msk.bf16.mxu1 %vm8139_vm3, %v10064_v16  ;;  %v4629_v37 = vpack.c.bf16 %v4611_v7, %v4610_v57 }
 0x621   : > { %v7724_v33 = vpop.f32.mrf.mxu0  ;;  %7800 = vmatprep.mubr.msk.bf16.mxu0 %vm8139_vm3, %v10064_v16  ;;  %7804 = vmatprep.subr.bf16.mxu1 %v10064_v16 }
 0x622   : > { %v4628_v40 = vpack.c.bf16 %v4609_v27, %v4608_v52  ;;  %v4614_v42 = vmul.f32 %v8672_v43, %v7724_v33 }
 0x623   : > { %v4569_v35 = vpop.f32.mrf.mxu0 }
 0x624   : > { %7799 = vmatpush3.bf16.msra.mxu0 %v4628_v40  ;;  %v4612_v50 = vmul.f32 %v8619_v41, %v4569_v35 }
 0x625   : > { %v7725_v34 = vpop.f32.mrf.mxu0  ;;  %7810 = vmatprep.subr.bf16.mxu0 %v10064_v16 }
 0x626   : > { %v4615_v8 = vmul.f32 %v8670_v48, %v7725_v34 }
 0x627   : > { %v4572_v0 = vpop.f32.mrf.mxu0  ;;  %7795 = vmatmul.mubr.msk.bf16.vlgmr.msra.gmra.mxu1 %vm663_vm2, %v10097_v9  ;;  %7801 = vmatmul.mubr.msk.bf16.vlgmr.msra.gmra.mxu0 %vm663_vm2, %v10098_v32 }
 0x628   : > { %v4613_v47 = vmul.f32 %v8623_v13, %v4572_v0  ;;  %7805 = vmatpush3.bf16.msra.mxu1 %v4629_v37  ;;  %7806 = vmatprep.mubr.msk.bf16.mxu1 %vm8139_vm3, %v10064_v16  ;;  %v4631_v26 = vpack.c.bf16 %v4615_v8, %v4614_v42 }
 0x629   : > { %7812 = vmatprep.mubr.msk.bf16.mxu0 %vm8139_vm3, %v10064_v16  ;;  %7816 = vmatprep.subr.bf16.mxu1 %v10064_v16 }
 0x62a   : > { %v4630_v19 = vpack.c.bf16 %v4613_v47, %v4612_v50 }
 0x62c   : > { %7811 = vmatpush3.bf16.msra.mxu0 %v4630_v19 }
 0x62d   : > { %7822 = vmatprep.subr.bf16.mxu0 %v7984_v63 }
 0x62f   : > { %7807 = vmatmul.mubr.msk.bf16.vlgmr.msra.gmra.mxu1 %vm663_vm2, %v10099_v14  ;;  %7813 = vmatmul.mubr.msk.bf16.vlgmr.msra.gmra.mxu0 %vm663_vm2, %v10100_v10 }
 0x630   : > { %7817 = vmatpush3.bf16.msra.mxu1 %v4631_v26  ;;  %7818 = vmatprep.mubr.msk.bf16.mxu1 %vm8139_vm3, %v10064_v16 }
 0x631   : > { %7823 = vmatpush3.bf16.msra.mxu0 %v7984_v63 }
 0x632   : > { %7824 = vmatprep.subr.bf16.mxu0 %v7985_v15 }
 0x635   : > { %7825 = vmatpush3.bf16.msra.mxu0 %v7985_v15 }
 0x637   : > { %7819 = vmatmul.mubr.msk.bf16.vlgmr.msra.gmra.mxu1 %vm663_vm2, %v10101_v51 }
 0x69e   : > { %v4666_v36 = vpop.f32.mrf.mxu1 }
 0x69f   : > { %v5288_v58 = vmul.f32 %v8470_v1, %v4666_v36 }
 0x6a0   : > { %v7730_v59 = vpop.f32.mrf.mxu1 }
 0x6a1   : > { %v5327_v16 = vadd.f32 %v9323_v23, %v5288_v58 }
 0x6a2   : > { %v4669_v11 = vpop.f32.mrf.mxu1 }
 0x6a3   : > { %v5289_v53 = vmul.f32 %v8472_v2, %v4669_v11  ;;  %v5391_v49 = vmul.f32 0.01, %v5327_v16  ;;  %vm5359_vm3 = vcmp.ge.f32.partialorder %v5327_v16, 0.0 }
 0x6a4   : > { %v7731_v28 = vpop.f32.mrf.mxu1 }
 0x6a5   : > { %v5328_v52 = vadd.f32 %v9323_v23, %v5289_v53  ;;  %v5423_v35 = vsel %vm5359_vm3, %v5327_v16, %v5391_v49 }
 0x6a6   : > { %v4707_v27 = vpop.f32.mrf.mxu1 }
 0x6a7   : > { %vm5360_vm4 = vcmp.ge.f32.partialorder %v5328_v52, 0.0  ;;  %v5392_v33 = vmul.f32 0.01, %v5328_v52  ;;  %v5290_v7 = vmul.f32 %v8478_v12, %v4707_v27 }
 0x6a8   : > { %v7736_v40 = vpop.f32.mrf.mxu1 }
 0x6a9   : > { %v5424_v57 = vsel %vm5360_vm4, %v5328_v52, %v5392_v33  ;;  %v5329_v1 = vadd.f32 %v9323_v23, %v5290_v7 }
 0x6aa   : > { %v4710_v34 = vpop.f32.mrf.mxu1  ;;  %v5455_v37 = vpack.c.bf16 %v5424_v57, %v5423_v35 }
 0x6ab   : > { %v5291_v0 = vmul.f32 %v8474_v4, %v4710_v34  ;;  %v5393_v9 = vmul.f32 0.01, %v5329_v1  ;;  %vm5361_vm5 = vcmp.ge.f32.partialorder %v5329_v1, 0.0 }
 0x6ac   : > { %v7737_v2 = vpop.f32.mrf.mxu1  ;;  %7826 = vmatprep.mubr.msk.bf16.mxu0 %vm2150_vm6, %v5455_v37 }
 0x6ad   : > { %v5330_v32 = vadd.f32 %v9323_v23, %v5291_v0  ;;  %v5425_v19 = vsel %vm5361_vm5, %v5329_v1, %v5393_v9 }
 0x6ae   : > { %v4748_v50 = vpop.f32.mrf.mxu1 }
 0x6af   : > { %vm5362_vm7 = vcmp.ge.f32.partialorder %v5330_v32, 0.0  ;;  %v5394_v47 = vmul.f32 0.01, %v5330_v32  ;;  %v5292_v12 = vmul.f32 %v8484_v24, %v4748_v50 }
 0x6b0   : > { %v7742_v8 = vpop.f32.mrf.mxu1 }
 0x6b1   : > { %v5426_v42 = vsel %vm5362_vm7, %v5330_v32, %v5394_v47  ;;  %v5331_v63 = vadd.f32 %v9323_v23, %v5292_v12 }
 0x6b2   : > { %v5456_v26 = vpack.c.bf16 %v5426_v42, %v5425_v19  ;;  %v4751_v14 = vpop.f32.mrf.mxu1 }
 0x6b3   : > { %v5293_v4 = vmul.f32 %v8481_v20, %v4751_v14  ;;  %v5395_v15 = vmul.f32 0.01, %v5331_v63  ;;  %vm5363_vm8 = vcmp.ge.f32.partialorder %v5331_v63, 0.0 }
 0x6b4   : > { %v7743_v10 = vpop.f32.mrf.mxu1  ;;  %7827 = vmatmul.mubr.msk.bf16.vlgmr.msra.gmra.mxu0 %vm2150_vm6, %v5456_v26 }
 0x6b5   : > { %v5332_v51 = vadd.f32 %v9323_v23, %v5293_v4  ;;  %v5427_v16 = vsel %vm5363_vm8, %v5331_v63, %v5395_v15 }
 0x6b6   : > { %v4789_v36 = vpop.f32.mrf.mxu1 }
 0x6b7   : > { %vm5364_vm9 = vcmp.ge.f32.partialorder %v5332_v51, 0.0  ;;  %v5396_v58 = vmul.f32 0.01, %v5332_v51  ;;  %v5294_v24 = vmul.f32 %v8502_v45, %v4789_v36 }
 0x6b8   : > { %v7748_v59 = vpop.f32.mrf.mxu1 }
 0x6b9   : > { %v5428_v11 = vsel %vm5364_vm9, %v5332_v51, %v5396_v58  ;;  %v5333_v53 = vadd.f32 %v9323_v23, %v5294_v24 }
 0x6ba   : > { %v4792_v28 = vpop.f32.mrf.mxu1  ;;  %v5457_v49 = vpack.c.bf16 %v5428_v11, %v5427_v16 }
 0x6bb   : > { %v5295_v20 = vmul.f32 %v8500_v44, %v4792_v28  ;;  %v5397_v27 = vmul.f32 0.01, %v5333_v53  ;;  %vm5365_vm10 = vcmp.ge.f32.partialorder %v5333_v53, 0.0 }
 0x6bc   : > { %v7749_v52 = vpop.f32.mrf.mxu1  ;;  %7830 = vmatprep.mubr.msk.bf16.mxu0 %vm2150_vm6, %v5457_v49 }
 0x6bd   : > { %v5334_v33 = vadd.f32 %v9323_v23, %v5295_v20  ;;  %v5429_v45 = vsel %vm5365_vm10, %v5333_v53, %v5397_v27 }
 0x6be   : > { %v4830_v40 = vpop.f32.mrf.mxu1 }
 0x6bf   : > { %vm5366_vm11 = vcmp.ge.f32.partialorder %v5334_v33, 0.0  ;;  %v5398_v7 = vmul.f32 0.01, %v5334_v33  ;;  %v5296_v57 = vmul.f32 %v8520_v62, %v4830_v40 }
 0x6c0   : > { %v7754_v34 = vpop.f32.mrf.mxu1 }
 0x6c1   : > { %v5430_v35 = vsel %vm5366_vm11, %v5334_v33, %v5398_v7  ;;  %v5335_v37 = vadd.f32 %v9323_v23, %v5296_v57 }
 0x6c2   : > { %v5458_v1 = vpack.c.bf16 %v5430_v35, %v5429_v45  ;;  %v4833_v0 = vpop.f32.mrf.mxu1 }
 0x6c3   : > { %v5297_v44 = vmul.f32 %v8518_v60, %v4833_v0  ;;  %v5399_v9 = vmul.f32 0.01, %v5335_v37  ;;  %vm5367_vm12 = vcmp.ge.f32.partialorder %v5335_v37, 0.0 }
 0x6c4   : > { %7831 = vmatmul.mubr.msk.bf16.gmra.mxu0 %vm2150_vm6, %v5458_v1  ;;  %v7755_v2 = vpop.f32.mrf.mxu1 }
 0x6c5   : > { %v5336_v32 = vadd.f32 %v9323_v23, %v5297_v44  ;;  %v5431_v8 = vsel %vm5367_vm12, %v5335_v37, %v5399_v9 }
 0x6c6   : > { %v4871_v50 = vpop.f32.mrf.mxu1 }
 0x6c7   : > { %vm5368_vm13 = vcmp.ge.f32.partialorder %v5336_v32, 0.0  ;;  %v5400_v47 = vmul.f32 0.01, %v5336_v32  ;;  %v5298_v12 = vmul.f32 %v8546_v29, %v4871_v50 }
 0x6c8   : > { %v7760_v62 = vpop.f32.mrf.mxu1 }
 0x6c9   : > { %v5432_v19 = vsel %vm5368_vm13, %v5336_v32, %v5400_v47  ;;  %v5337_v42 = vadd.f32 %v9323_v23, %v5298_v12 }
 0x6ca   : > { %v4874_v63 = vpop.f32.mrf.mxu1  ;;  %v5459_v26 = vpack.c.bf16 %v5432_v19, %v5431_v8 }
 0x6cb   : > { %v5299_v14 = vmul.f32 %v8543_v22, %v4874_v63  ;;  %v5401_v4 = vmul.f32 0.01, %v5337_v42  ;;  %vm5369_vm14 = vcmp.ge.f32.partialorder %v5337_v42, 0.0 }
 0x6cc   : > { %v7761_v60 = vpop.f32.mrf.mxu1  ;;  %7834 = vmatprep.mubr.msk.bf16.mxu0 %vm2150_vm6, %v5459_v26 }
 0x6cd   : > { %v5338_v10 = vadd.f32 %v9323_v23, %v5299_v14  ;;  %v5433_v36 = vsel %vm5369_vm14, %v5337_v42, %v5401_v4 }
 0x6cf   : > { %vm5370_vm15 = vcmp.ge.f32.partialorder %v5338_v10, 0.0  ;;  %v5402_v15 = vmul.f32 0.01, %v5338_v10  ;;  %v4912_v51 = vpop.f32.mrf.mxu1 }
 0x6d0   : > { %v5300_v29 = vmul.f32 %v8567_v55, %v4912_v51 }
 0x6d1   : > { %v5434_v58 = vsel %vm5370_vm15, %v5338_v10, %v5402_v15  ;;  %v7766_v24 = vpop.f32.mrf.mxu1 }
 0x6d2   : > { %v5460_v59 = vpack.c.bf16 %v5434_v58, %v5433_v36  ;;  %v5339_v16 = vadd.f32 %v9323_v23, %v5300_v29 }
 0x6d3   : > { %v4915_v11 = vpop.f32.mrf.mxu1 }
 0x6d4   : > { %v5301_v22 = vmul.f32 %v8559_v38, %v4915_v11  ;;  %7835 = vmatmul.mubr.msk.bf16.gmra.mxu0 %vm2150_vm6, %v5460_v59  ;;  %v5403_v28 = vmul.f32 0.01, %v5339_v16  ;;  %vm5371_vm0 = vcmp.ge.f32.partialorder %v5339_v16, 0.0 }
 0x6d5   : > { %v7767_v53 = vpop.f32.mrf.mxu1 }
 0x6d6   : > { %v5340_v49 = vadd.f32 %v9323_v23, %v5301_v22  ;;  %v5435_v45 = vsel %vm5371_vm0, %v5339_v16, %v5403_v28 }
 0x6d7   : > { %v4953_v20 = vpop.f32.mrf.mxu1  ;;  %v4994_v52 = vpop.f32.mrf.mxu0 }
 0x6d8   : > { %vm5372_vm3 = vcmp.ge.f32.partialorder %v5340_v49, 0.0  ;;  %v5404_v55 = vmul.f32 0.01, %v5340_v49  ;;  %v5302_v27 = vmul.f32 %v8599_v46, %v4953_v20  ;;  %v5304_v33 = vmul.f32 %v10080_v56, %v4994_v52 }
 0x6d9   : > { %v7772_v7 = vpop.f32.mrf.mxu1  ;;  %v7778_v40 = vpop.f32.mrf.mxu0 }
 0x6da   : > { %v5436_v35 = vsel %vm5372_vm3, %v5340_v49, %v5404_v55  ;;  %v5341_v38 = vadd.f32 %v9323_v23, %v5302_v27  ;;  %v5343_v37 = vadd.f32 %v9323_v23, %v5304_v33 }
 0x6db   : > { %v4956_v57 = vpop.f32.mrf.mxu1  ;;  %v4997_v1 = vpop.f32.mrf.mxu0  ;;  %v5461_v34 = vpack.c.bf16 %v5436_v35, %v5435_v45 }
 0x6dc   : > { %v5303_v0 = vmul.f32 %v8596_v39, %v4956_v57  ;;  %v5305_v44 = vmul.f32 %v10081_v61, %v4997_v1  ;;  %vm5373_vm4 = vcmp.ge.f32.partialorder %v5341_v38, 0.0  ;;  %v5405_v46 = vmul.f32 0.01, %v5341_v38 }
 0x6dd   : > { %v7773_v2 = vpop.f32.mrf.mxu1  ;;  %v7779_v9 = vpop.f32.mrf.mxu0  ;;  %7838 = vmatprep.mubr.msk.bf16.mxu0 %vm2150_vm6, %v5461_v34  ;;  %vm5375_vm5 = vcmp.ge.f32.partialorder %v5343_v37, 0.0  ;;  %v5407_v12 = vmul.f32 0.01, %v5343_v37 }
 0x6de   : > { %v5342_v56 = vadd.f32 %v9323_v23, %v5303_v0  ;;  %v5344_v32 = vadd.f32 %v9323_v23, %v5305_v44  ;;  %v5437_v63 = vsel %vm5373_vm4, %v5341_v38, %v5405_v46 }
 0x6df   : > { %v5035_v50 = vpop.f32.mrf.mxu1  ;;  %v5076_v47 = vpop.f32.mrf.mxu0  ;;  %v5439_v15 = vsel %vm5375_vm5, %v5343_v37, %v5407_v12 }
 0x6e0   : > { %v5306_v62 = vmul.f32 %v10068_v17, %v5035_v50  ;;  %v5308_v39 = vmul.f32 %v10094_v6, %v5076_v47  ;;  %vm5374_vm7 = vcmp.ge.f32.partialorder %v5342_v56, 0.0  ;;  %v5406_v61 = vmul.f32 0.01, %v5342_v56 }
 0x6e1   : > { %vm5376_vm8 = vcmp.ge.f32.partialorder %v5344_v32, 0.0  ;;  %v5408_v8 = vmul.f32 0.01, %v5344_v32  ;;  %v7784_v19 = vpop.f32.mrf.mxu1  ;;  %v7790_v42 = vpop.f32.mrf.mxu0 }
 0x6e2   : > { %v5438_v26 = vsel %vm5374_vm7, %v5342_v56, %v5406_v61  ;;  %v5345_v60 = vadd.f32 %v9323_v23, %v5306_v62  ;;  %v5347_v17 = vadd.f32 %v9323_v23, %v5308_v39 }
 0x6e3   : > { %v5440_v14 = vsel %vm5376_vm8, %v5344_v32, %v5408_v8  ;;  %v5038_v4 = vpop.f32.mrf.mxu1  ;;  %v5079_v10 = vpop.f32.mrf.mxu0  ;;  %v5462_v51 = vpack.c.bf16 %v5438_v26, %v5437_v63 }
 0x6e4   : > { %v5307_v6 = vmul.f32 %v8613_v54, %v5038_v4  ;;  %v5309_v29 = vmul.f32 %v10071_v21, %v5079_v10  ;;  %v5463_v24 = vpack.c.bf16 %v5440_v14, %v5439_v15  ;;  %vm5377_vm9 = vcmp.ge.f32.partialorder %v5345_v60, 0.0 }
 0x6e5   : > { %v7785_v36 = vpop.f32.mrf.mxu1  ;;  %v7791_v58 = vpop.f32.mrf.mxu0  ;;  %7839 = vmatmul.mubr.msk.bf16.gmra.mxu0 %vm2150_vm6, %v5462_v51  ;;  %v5409_v59 = vmul.f32 0.01, %v5345_v60  ;;  %vm5379_vm10 = vcmp.ge.f32.partialorder %v5347_v17, 0.0  ;;  %v5411_v28 = vmul.f32 0.01, %v5347_v17 }
 0x6e6   : > { %v5346_v16 = vadd.f32 %v9323_v23, %v5307_v6  ;;  %v5348_v11 = vadd.f32 %v9323_v23, %v5309_v29  ;;  %7842 = vmatprep.mubr.msk.bf16.mxu0 %vm2150_vm6, %v5463_v24 }
 0x6e7   : > { %v5117_v22 = vpop.f32.mrf.mxu1  ;;  %v5158_v53 = vpop.f32.mrf.mxu0  ;;  %v5441_v27 = vsel %vm5377_vm9, %v5345_v60, %v5409_v59  ;;  %v5443_v38 = vsel %vm5379_vm10, %v5347_v17, %v5411_v28 }
 0x6e8   : > { %v5310_v54 = vmul.f32 %v8645_v18, %v5117_v22  ;;  %v5312_v21 = vmul.f32 %v8591_v25, %v5158_v53  ;;  %vm5378_vm11 = vcmp.ge.f32.partialorder %v5346_v16, 0.0  ;;  %v5410_v49 = vmul.f32 0.01, %v5346_v16 }
 0x6e9   : > { %vm5380_vm12 = vcmp.ge.f32.partialorder %v5348_v11, 0.0  ;;  %v5412_v20 = vmul.f32 0.01, %v5348_v11  ;;  %v7796_v52 = vpop.f32.mrf.mxu1  ;;  %v7802_v55 = vpop.f32.mrf.mxu0 }
 0x6ea   : > { %v5442_v33 = vsel %vm5378_vm11, %v5346_v16, %v5410_v49  ;;  %v5349_v40 = vadd.f32 %v9323_v23, %v5310_v54  ;;  %v5351_v18 = vadd.f32 %v9323_v23, %v5312_v21  ;;  %v7986_v49 = vld [vmem:[%s9990_s13 + $0x8] sm:$0xff]  }
 0x6eb   : > { %v5444_v7 = vsel %vm5380_vm12, %v5348_v11, %v5412_v20  ;;  %v5120_v45 = vpop.f32.mrf.mxu1  ;;  %v5161_v35 = vpop.f32.mrf.mxu0  ;;  %v5464_v57 = vpack.c.bf16 %v5442_v33, %v5441_v27  ;;  %7858 = vmatprep.subr.bf16.mxu1 %v7986_v49  ;;  %v7987_v27 = vld [vmem:[%s9990_s13] sm:$0xff]  }
 0x6ec   : > { %v5311_v25 = vmul.f32 %v8643_v3, %v5120_v45  ;;  %v5313_v1 = vmul.f32 %v8593_v5, %v5161_v35  ;;  %v5465_v0 = vpack.c.bf16 %v5444_v7, %v5443_v38  ;;  %vm5381_vm13 = vcmp.ge.f32.partialorder %v5349_v40, 0.0  ;;  %7859 = vmatpush3.bf16.msra.mxu1 %v7986_v49  ;;  %v9420_v45 = vld [vmem:[%s9989_s12] ss:$0 sm:$0xff] }
 0x6ed   : > { %v7797_v34 = vpop.f32.mrf.mxu1  ;;  %v7803_v37 = vpop.f32.mrf.mxu0  ;;  %7843 = vmatmul.mubr.msk.bf16.gmra.mxu0 %vm2150_vm6, %v5464_v57  ;;  %v5413_v44 = vmul.f32 0.01, %v5349_v40  ;;  %vm5383_vm14 = vcmp.ge.f32.partialorder %v5351_v18, 0.0  ;;  %v5415_v32 = vmul.f32 0.01, %v5351_v18  ;;  %7860 = vmatprep.subr.bf16.mxu1 %v7987_v27 }
 0x6ee   : > { %v5350_v2 = vadd.f32 %v9323_v23, %v5311_v25  ;;  %v5352_v9 = vadd.f32 %v9323_v23, %v5313_v1  ;;  %7846 = vmatprep.mubr.msk.bf16.mxu0 %vm2150_vm6, %v5465_v0 }
 0x6ef   : > { %v5199_v46 = vpop.f32.mrf.mxu1  ;;  %v5240_v56 = vpop.f32.mrf.mxu0  ;;  %v5445_v39 = vsel %vm5381_vm13, %v5349_v40, %v5413_v44  ;;  %v5447_v26 = vsel %vm5383_vm14, %v5351_v18, %v5415_v32 }
 0x6f0   : > { %v5314_v3 = vmul.f32 %v8660_v30, %v5199_v46  ;;  %v5316_v5 = vmul.f32 %v8619_v41, %v5240_v56  ;;  %vm5382_vm15 = vcmp.ge.f32.partialorder %v5350_v2, 0.0  ;;  %v5414_v50 = vmul.f32 0.01, %v5350_v2  ;;  %7861 = vmatpush3.bf16.msra.mxu1 %v7987_v27 }
 0x6f1   : > { %vm5384_vm0 = vcmp.ge.f32.partialorder %v5352_v9, 0.0  ;;  %v5416_v47 = vmul.f32 0.01, %v5352_v9  ;;  %v7808_v12 = vpop.f32.mrf.mxu1  ;;  %v7814_v62 = vpop.f32.mrf.mxu0 }
 0x6f2   : > { %v5446_v61 = vsel %vm5382_vm15, %v5350_v2, %v5414_v50  ;;  %v5353_v19 = vadd.f32 %v9323_v23, %v5314_v3  ;;  %v5355_v30 = vadd.f32 %v9323_v23, %v5316_v5 }
 0x6f3   : > { %v5448_v8 = vsel %vm5384_vm0, %v5352_v9, %v5416_v47  ;;  %v5202_v42 = vpop.f32.mrf.mxu1  ;;  %v5243_v63 = vpop.f32.mrf.mxu0  ;;  %v5466_v14 = vpack.c.bf16 %v5446_v61, %v5445_v39 }
 0x6f4   : > { %v5315_v41 = vmul.f32 %v8658_v31, %v5202_v42  ;;  %v5317_v60 = vmul.f32 %v8623_v13, %v5243_v63  ;;  %v5467_v10 = vpack.c.bf16 %v5448_v8, %v5447_v26  ;;  %v5417_v51 = vmul.f32 0.01, %v5353_v19 }
 0x6f5   : > { %v7809_v4 = vpop.f32.mrf.mxu1  ;;  %v7815_v15 = vpop.f32.mrf.mxu0  ;;  %7847 = vmatmul.mubr.msk.bf16.gmra.mxu0 %vm2150_vm6, %v5466_v14  ;;  %vm5385_vm3 = vcmp.ge.f32.partialorder %v5353_v19, 0.0  ;;  %vm5387_vm4 = vcmp.ge.f32.partialorder %v5355_v30, 0.0  ;;  %v5419_v36 = vmul.f32 0.01, %v5355_v30 }
 0x6f6   : > { %v5354_v17 = vadd.f32 %v9323_v23, %v5315_v41  ;;  %v5356_v6 = vadd.f32 %v9323_v23, %v5317_v60  ;;  %7850 = vmatprep.mubr.msk.bf16.mxu0 %vm2150_vm6, %v5467_v10  ;;  %v5449_v16 = vsel %vm5385_vm3, %v5353_v19, %v5417_v51 }
 0x6f7   : > { %v5281_v29 = vpop.f32.mrf.mxu1  ;;  %v5451_v28 = vsel %vm5387_vm4, %v5355_v30, %v5419_v36 }
 0x6f8   : > { %v5318_v31 = vmul.f32 %v8672_v43, %v5281_v29  ;;  %vm5386_vm5 = vcmp.ge.f32.partialorder %v5354_v17, 0.0  ;;  %v5418_v13 = vmul.f32 0.01, %v5354_v17  ;;  %vm5388_vm7 = vcmp.ge.f32.partialorder %v5356_v6, 0.0 }
 0x6f9   : > { %v5420_v58 = vmul.f32 0.01, %v5356_v6  ;;  %v7820_v24 = vpop.f32.mrf.mxu1 }
 0x6fa   : > { %v5357_v59 = vadd.f32 %v9323_v23, %v5318_v31  ;;  %v5450_v11 = vsel %vm5386_vm5, %v5354_v17, %v5418_v13 }
 0x6fb   : > { %v5452_v22 = vsel %vm5388_vm7, %v5356_v6, %v5420_v58  ;;  %v5284_v53 = vpop.f32.mrf.mxu1  ;;  %v5468_v54 = vpack.c.bf16 %v5450_v11, %v5449_v16 }
 0x6fc   : > { %v5319_v21 = vmul.f32 %v8670_v48, %v5284_v53  ;;  %v5469_v43 = vpack.c.bf16 %v5452_v22, %v5451_v28  ;;  %v5421_v52 = vmul.f32 0.01, %v5357_v59  ;;  %vm5389_vm8 = vcmp.ge.f32.partialorder %v5357_v59, 0.0 }
 0x6fd   : > { %v7821_v20 = vpop.f32.mrf.mxu1  ;;  %7851 = vmatmul.mubr.msk.bf16.gmra.mxu0 %vm2150_vm6, %v5468_v54 }
 0x6fe   : > { %v5358_v55 = vadd.f32 %v9323_v23, %v5319_v21  ;;  %7854 = vmatprep.mubr.msk.bf16.mxu0 %vm2150_vm6, %v5469_v43  ;;  %v5453_v33 = vsel %vm5389_vm8, %v5357_v59, %v5421_v52 }
 0x700   : > { %vm5390_vm9 = vcmp.ge.f32.partialorder %v5358_v55, 0.0  ;;  %v5422_v48 = vmul.f32 0.01, %v5358_v55 }
 0x702   : > { %v5454_v7 = vsel %vm5390_vm9, %v5358_v55, %v5422_v48 }
 0x703   : > { %v5470_v40 = vpack.c.bf16 %v5454_v7, %v5453_v33 }
 0x705   : > { %7855 = vmatmul.mubr.msk.bf16.gmra.mxu0 %vm2150_vm6, %v5470_v40 }
 0x774   : > { %v7828_v23 = vpop.f32.mrf.mxu0 }
 0x775   : > { %v5585_v57 = vadd.f32 %v7828_v23, %v9420_v45 }
 0x776   : > { %v5576_v35 = vpop.f32.mrf.mxu0 }
 0x777   : > { %v5577_v38 = vadd.f32 %v9420_v45, %v5576_v35  ;;  %v5737_v44 = vmul.f32 0.01, %v5585_v57  ;;  %vm5705_vm12 = vcmp.ge.f32.partialorder %v5585_v57, 0.0 }
 0x778   : > { %v7829_v18 = vpop.f32.mrf.mxu0 }
 0x779   : > { %v5588_v25 = vadd.f32 %v7829_v18, %v9420_v45  ;;  %v5735_v34 = vmul.f32 0.01, %v5577_v38  ;;  %vm5703_vm11 = vcmp.ge.f32.partialorder %v5577_v38, 0.0  ;;  %v5769_v32 = vsel %vm5705_vm12, %v5585_v57, %v5737_v44 }
 0x77a   : > { %v5579_v1 = vpop.f32.mrf.mxu0 }
 0x77b   : > { %vm5706_vm10 = vcmp.ge.f32.partialorder %v5588_v25, 0.0  ;;  %v5738_v37 = vmul.f32 0.01, %v5588_v25  ;;  %v5580_v0 = vadd.f32 %v9420_v45, %v5579_v1  ;;  %v5767_v46 = vsel %vm5703_vm11, %v5577_v38, %v5735_v34 }
 0x77d   : > { %vm5704_vm13 = vcmp.ge.f32.partialorder %v5580_v0, 0.0  ;;  %v5736_v2 = vmul.f32 0.01, %v5580_v0  ;;  %v5770_v9 = vsel %vm5706_vm10, %v5588_v25, %v5738_v37 }
 0x77e   : > { %v5800_v5 = vpack.c.bf16 %v5770_v9, %v5769_v32 }
 0x77f   : > { %v5768_v56 = vsel %vm5704_vm13, %v5580_v0, %v5736_v2 }
 0x780   : > { %v5799_v3 = vpack.c.bf16 %v5768_v56, %v5767_v46 }
 0x782   : > { %7862 = vmatprep.mubr.msk.bf16.mxu1 %vm2150_vm6, %v5799_v3 }
 0x783   : > { %7863 = vmatmul.mubr.msk.bf16.vlgmr.msra.gmra.mxu1 %vm2150_vm6, %v5800_v5 }
 0x784   : > { %v7832_v50 = vpop.f32.mrf.mxu0 }
 0x785   : > { %v5601_v62 = vadd.f32 %v7832_v50, %v9420_v45 }
 0x786   : > { %v5592_v47 = vpop.f32.mrf.mxu0 }
 0x787   : > { %v5593_v12 = vadd.f32 %v9420_v45, %v5592_v47  ;;  %v5741_v26 = vmul.f32 0.01, %v5601_v62  ;;  %vm5709_vm0 = vcmp.ge.f32.partialorder %v5601_v62, 0.0 }
 0x788   : > { %v7833_v39 = vpop.f32.mrf.mxu0 }
 0x789   : > { %v5604_v61 = vadd.f32 %v7833_v39, %v9420_v45  ;;  %v5739_v19 = vmul.f32 0.01, %v5593_v12  ;;  %vm5707_vm15 = vcmp.ge.f32.partialorder %v5593_v12, 0.0  ;;  %v5773_v4 = vsel %vm5709_vm0, %v5601_v62, %v5741_v26 }
 0x78a   : > { %v5595_v8 = vpop.f32.mrf.mxu0 }
 0x78b   : > { %vm5710_vm14 = vcmp.ge.f32.partialorder %v5604_v61, 0.0  ;;  %v5742_v42 = vmul.f32 0.01, %v5604_v61  ;;  %v5596_v63 = vadd.f32 %v9420_v45, %v5595_v8  ;;  %v5771_v41 = vsel %vm5707_vm15, %v5593_v12, %v5739_v19 }
 0x78d   : > { %vm5708_vm3 = vcmp.ge.f32.partialorder %v5596_v63, 0.0  ;;  %v5740_v14 = vmul.f32 0.01, %v5596_v63  ;;  %v5774_v30 = vsel %vm5710_vm14, %v5604_v61, %v5742_v42 }
 0x78e   : > { %v5802_v15 = vpack.c.bf16 %v5774_v30, %v5773_v4 }
 0x78f   : > { %v5772_v60 = vsel %vm5708_vm3, %v5596_v63, %v5740_v14 }
 0x790   : > { %v5801_v10 = vpack.c.bf16 %v5772_v60, %v5771_v41 }
 0x792   : > { %7866 = vmatprep.mubr.msk.bf16.mxu1 %vm2150_vm6, %v5801_v10 }
 0x793   : > { %7867 = vmatmul.mubr.msk.bf16.gmra.mxu1 %vm2150_vm6, %v5802_v15 }
 0x794   : > { %v7836_v51 = vpop.f32.mrf.mxu0 }
 0x795   : > { %v5617_v29 = vadd.f32 %v7836_v51, %v9420_v45 }
 0x796   : > { %v5608_v17 = vpop.f32.mrf.mxu0 }
 0x797   : > { %v5609_v6 = vadd.f32 %v9420_v45, %v5608_v17  ;;  %v5745_v16 = vmul.f32 0.01, %v5617_v29  ;;  %vm5713_vm7 = vcmp.ge.f32.partialorder %v5617_v29, 0.0 }
 0x798   : > { %v7837_v36 = vpop.f32.mrf.mxu0 }
 0x799   : > { %v5620_v31 = vadd.f32 %v7837_v36, %v9420_v45  ;;  %v5743_v58 = vmul.f32 0.01, %v5609_v6  ;;  %vm5711_vm5 = vcmp.ge.f32.partialorder %v5609_v6, 0.0  ;;  %v5777_v54 = vsel %vm5713_vm7, %v5617_v29, %v5745_v16 }
 0x79a   : > { %v5611_v13 = vpop.f32.mrf.mxu0 }
 0x79b   : > { %vm5714_vm4 = vcmp.ge.f32.partialorder %v5620_v31, 0.0  ;;  %v5746_v24 = vmul.f32 0.01, %v5620_v31  ;;  %v5612_v59 = vadd.f32 %v9420_v45, %v5611_v13  ;;  %v5775_v53 = vsel %vm5711_vm5, %v5609_v6, %v5743_v58 }
 0x79d   : > { %vm5712_vm8 = vcmp.ge.f32.partialorder %v5612_v59, 0.0  ;;  %v5744_v11 = vmul.f32 0.01, %v5612_v59  ;;  %v5778_v22 = vsel %vm5714_vm4, %v5620_v31, %v5746_v24 }
 0x79e   : > { %v5804_v49 = vpack.c.bf16 %v5778_v22, %v5777_v54 }
 0x79f   : > { %v5776_v28 = vsel %vm5712_vm8, %v5612_v59, %v5744_v11 }
 0x7a0   : > { %v5803_v21 = vpack.c.bf16 %v5776_v28, %v5775_v53 }
 0x7a2   : > { %7870 = vmatprep.mubr.msk.bf16.mxu1 %vm2150_vm6, %v5803_v21 }
 0x7a3   : > { %7871 = vmatmul.mubr.msk.bf16.gmra.mxu1 %vm2150_vm6, %v5804_v49 }
 0x7a5   : > { %v7840_v43 = vpop.f32.mrf.mxu0 }
 0x7a6   : > { %v5633_v55 = vadd.f32 %v7840_v43, %v9420_v45 }
 0x7a7   : > { %v5624_v20 = vpop.f32.mrf.mxu0 }
 0x7a8   : > { %v5625_v52 = vadd.f32 %v9420_v45, %v5624_v20  ;;  %v5749_v35 = vmul.f32 0.01, %v5633_v55  ;;  %vm5717_vm11 = vcmp.ge.f32.partialorder %v5633_v55, 0.0 }
 0x7a9   : > { %v7841_v27 = vpop.f32.mrf.mxu0 }
 0x7aa   : > { %v5636_v48 = vadd.f32 %v7841_v27, %v9420_v45  ;;  %v5747_v7 = vmul.f32 0.01, %v5625_v52  ;;  %vm5715_vm10 = vcmp.ge.f32.partialorder %v5625_v52, 0.0  ;;  %v5781_v0 = vsel %vm5717_vm11, %v5633_v55, %v5749_v35 }
 0x7ab   : > { %v5627_v33 = vpop.f32.mrf.mxu0 }
 0x7ac   : > { %vm5718_vm9 = vcmp.ge.f32.partialorder %v5636_v48, 0.0  ;;  %v5750_v40 = vmul.f32 0.01, %v5636_v48  ;;  %v5628_v23 = vadd.f32 %v9420_v45, %v5627_v33  ;;  %v5779_v1 = vsel %vm5715_vm10, %v5625_v52, %v5747_v7 }
 0x7ad   : > { %v7844_v38 = vpop.f32.mrf.mxu0 }
 0x7ae   : > { %vm5716_vm12 = vcmp.ge.f32.partialorder %v5628_v23, 0.0  ;;  %v5748_v57 = vmul.f32 0.01, %v5628_v23  ;;  %v5782_v18 = vsel %vm5718_vm9, %v5636_v48, %v5750_v40  ;;  %v5649_v2 = vadd.f32 %v7844_v38, %v9420_v45 }
 0x7af   : > { %v5640_v25 = vpop.f32.mrf.mxu0  ;;  %v5806_v46 = vpack.c.bf16 %v5782_v18, %v5781_v0 }
 0x7b0   : > { %v5780_v34 = vsel %vm5716_vm12, %v5628_v23, %v5748_v57  ;;  %v5641_v37 = vadd.f32 %v9420_v45, %v5640_v25  ;;  %v5753_v47 = vmul.f32 0.01, %v5649_v2  ;;  %vm5721_vm15 = vcmp.ge.f32.partialorder %v5649_v2, 0.0 }
 0x7b1   : > { %v5805_v44 = vpack.c.bf16 %v5780_v34, %v5779_v1  ;;  %v7845_v9 = vpop.f32.mrf.mxu0 }
 0x7b2   : > { %v5652_v56 = vadd.f32 %v7845_v9, %v9420_v45  ;;  %v5751_v3 = vmul.f32 0.01, %v5641_v37  ;;  %vm5719_vm14 = vcmp.ge.f32.partialorder %v5641_v37, 0.0  ;;  %v5785_v63 = vsel %vm5721_vm15, %v5649_v2, %v5753_v47 }
 0x7b3   : > { %v5643_v32 = vpop.f32.mrf.mxu0  ;;  %7874 = vmatprep.mubr.msk.bf16.mxu1 %vm2150_vm6, %v5805_v44 }
 0x7b4   : > { %vm5722_vm13 = vcmp.ge.f32.partialorder %v5652_v56, 0.0  ;;  %v5754_v5 = vmul.f32 0.01, %v5652_v56  ;;  %v5644_v50 = vadd.f32 %v9420_v45, %v5643_v32  ;;  %7875 = vmatmul.mubr.msk.bf16.gmra.mxu1 %vm2150_vm6, %v5806_v46  ;;  %v5783_v8 = vsel %vm5719_vm14, %v5641_v37, %v5751_v3 }
 0x7b5   : > { %v7848_v12 = vpop.f32.mrf.mxu0 }
 0x7b6   : > { %vm5720_vm0 = vcmp.ge.f32.partialorder %v5644_v50, 0.0  ;;  %v5752_v62 = vmul.f32 0.01, %v5644_v50  ;;  %v5786_v39 = vsel %vm5722_vm13, %v5652_v56, %v5754_v5  ;;  %v5665_v14 = vadd.f32 %v7848_v12, %v9420_v45 }
 0x7b7   : > { %v5656_v61 = vpop.f32.mrf.mxu0  ;;  %v5808_v41 = vpack.c.bf16 %v5786_v39, %v5785_v63 }
 0x7b8   : > { %v5784_v19 = vsel %vm5720_vm0, %v5644_v50, %v5752_v62  ;;  %v5657_v42 = vadd.f32 %v9420_v45, %v5656_v61  ;;  %v5757_v17 = vmul.f32 0.01, %v5665_v14  ;;  %vm5725_vm5 = vcmp.ge.f32.partialorder %v5665_v14, 0.0 }
 0x7b9   : > { %v5807_v26 = vpack.c.bf16 %v5784_v19, %v5783_v8  ;;  %v7849_v30 = vpop.f32.mrf.mxu0  ;;  %v8140_v50 = vmov 0   ;;  %v9480_v8 = vld [vmem:[%s9992_s15] ss:$0 sm:$0xff] }
 0x7ba   : > { %v5668_v60 = vadd.f32 %v7849_v30, %v9420_v45  ;;  %v5755_v10 = vmul.f32 0.01, %v5657_v42  ;;  %vm5723_vm4 = vcmp.ge.f32.partialorder %v5657_v42, 0.0  ;;  %v5789_v59 = vsel %vm5725_vm5, %v5665_v14, %v5757_v17  ;;  %7945 = vset.pattern.permute.xlu0 %v8140_v50 }
 0x7bb   : > { %v5659_v4 = vpop.f32.mrf.mxu0  ;;  %7878 = vmatprep.mubr.msk.bf16.mxu1 %vm2150_vm6, %v5807_v26 }
 0x7bc   : > { %vm5726_vm3 = vcmp.ge.f32.partialorder %v5668_v60, 0.0  ;;  %v5758_v15 = vmul.f32 0.01, %v5668_v60  ;;  %v5660_v51 = vadd.f32 %v9420_v45, %v5659_v4  ;;  %7879 = vmatmul.mubr.msk.bf16.gmra.mxu1 %vm2150_vm6, %v5808_v41  ;;  %v5787_v13 = vsel %vm5723_vm4, %v5657_v42, %v5755_v10 }
 0x7bd   : > { %v7852_v6 = vpop.f32.mrf.mxu0 }
 0x7be   : > { %vm5724_vm7 = vcmp.ge.f32.partialorder %v5660_v51, 0.0  ;;  %v5756_v29 = vmul.f32 0.01, %v5660_v51  ;;  %v5790_v36 = vsel %vm5726_vm3, %v5668_v60, %v5758_v15  ;;  %v5681_v11 = vadd.f32 %v7852_v6, %v9420_v45 }
 0x7bf   : > { %v5672_v31 = vpop.f32.mrf.mxu0  ;;  %v5810_v53 = vpack.c.bf16 %v5790_v36, %v5789_v59 }
 0x7c0   : > { %v5788_v58 = vsel %vm5724_vm7, %v5660_v51, %v5756_v29  ;;  %v5673_v24 = vadd.f32 %v9420_v45, %v5672_v31  ;;  %v5761_v20 = vmul.f32 0.01, %v5681_v11  ;;  %vm5729_vm10 = vcmp.ge.f32.partialorder %v5681_v11, 0.0 }
 0x7c1   : > { %v5809_v16 = vpack.c.bf16 %v5788_v58, %v5787_v13  ;;  %v7853_v22 = vpop.f32.mrf.mxu0 }
 0x7c2   : > { %v5684_v28 = vadd.f32 %v7853_v22, %v9420_v45  ;;  %v5759_v21 = vmul.f32 0.01, %v5673_v24  ;;  %vm5727_vm9 = vcmp.ge.f32.partialorder %v5673_v24, 0.0  ;;  %v5793_v23 = vsel %vm5729_vm10, %v5681_v11, %v5761_v20 }
 0x7c3   : > { %v5675_v54 = vpop.f32.mrf.mxu0  ;;  %7882 = vmatprep.mubr.msk.bf16.mxu1 %vm2150_vm6, %v5809_v16 }
 0x7c4   : > { %vm5730_vm8 = vcmp.ge.f32.partialorder %v5684_v28, 0.0  ;;  %v5762_v49 = vmul.f32 0.01, %v5684_v28  ;;  %v5676_v43 = vadd.f32 %v9420_v45, %v5675_v54  ;;  %7883 = vmatmul.mubr.msk.bf16.gmra.mxu1 %vm2150_vm6, %v5810_v53  ;;  %v5791_v33 = vsel %vm5727_vm9, %v5673_v24, %v5759_v21 }
 0x7c5   : > { %v7856_v52 = vpop.f32.mrf.mxu0 }
 0x7c6   : > { %vm5728_vm11 = vcmp.ge.f32.partialorder %v5676_v43, 0.0  ;;  %v5760_v55 = vmul.f32 0.01, %v5676_v43  ;;  %v5794_v27 = vsel %vm5730_vm8, %v5684_v28, %v5762_v49  ;;  %v5697_v38 = vadd.f32 %v7856_v52, %v9420_v45 }
 0x7c7   : > { %v5688_v48 = vpop.f32.mrf.mxu0  ;;  %v5812_v18 = vpack.c.bf16 %v5794_v27, %v5793_v23 }
 0x7c8   : > { %v5792_v7 = vsel %vm5728_vm11, %v5676_v43, %v5760_v55  ;;  %v5689_v40 = vadd.f32 %v9420_v45, %v5688_v48  ;;  %v5765_v44 = vmul.f32 0.01, %v5697_v38  ;;  %vm5733_vm14 = vcmp.ge.f32.partialorder %v5697_v38, 0.0 }
 0x7c9   : > { %v5811_v35 = vpack.c.bf16 %v5792_v7, %v5791_v33  ;;  %v7857_v57 = vpop.f32.mrf.mxu0 }
 0x7ca   : > { %v5700_v25 = vadd.f32 %v7857_v57, %v9420_v45  ;;  %v5763_v34 = vmul.f32 0.01, %v5689_v40  ;;  %vm5731_vm13 = vcmp.ge.f32.partialorder %v5689_v40, 0.0  ;;  %v5797_v32 = vsel %vm5733_vm14, %v5697_v38, %v5765_v44 }
 0x7cb   : > { %v5691_v1 = vpop.f32.mrf.mxu0  ;;  %7886 = vmatprep.mubr.msk.bf16.mxu1 %vm2150_vm6, %v5811_v35 }
 0x7cc   : > { %vm5734_vm12 = vcmp.ge.f32.partialorder %v5700_v25, 0.0  ;;  %v5766_v37 = vmul.f32 0.01, %v5700_v25  ;;  %v5692_v0 = vadd.f32 %v9420_v45, %v5691_v1  ;;  %7887 = vmatmul.mubr.msk.bf16.gmra.mxu1 %vm2150_vm6, %v5812_v18  ;;  %v5795_v46 = vsel %vm5731_vm13, %v5689_v40, %v5763_v34  ;;  %v9473_v45 = vld [vmem:[%s9991_s14] ss:$0 sm:$0xff] }
 0x7ce   : > { %vm5732_vm15 = vcmp.ge.f32.partialorder %v5692_v0, 0.0  ;;  %v5764_v2 = vmul.f32 0.01, %v5692_v0  ;;  %v5798_v9 = vsel %vm5734_vm12, %v5700_v25, %v5766_v37 }
 0x7cf   : > { %v5814_v5 = vpack.c.bf16 %v5798_v9, %v5797_v32 }
 0x7d0   : > { %v5796_v56 = vsel %vm5732_vm15, %v5692_v0, %v5764_v2 }
 0x7d1   : > { %v5813_v3 = vpack.c.bf16 %v5796_v56, %v5795_v46 }
 0x7d3   : > { %7890 = vmatprep.mubr.msk.bf16.mxu1 %vm2150_vm6, %v5813_v3 }
 0x7d4   : > { %7891 = vmatmul.mubr.msk.bf16.gmra.mxu1 %vm2150_vm6, %v5814_v5 }
 0x843   : > { %v7864_v47 = vpop.f32.mrf.mxu1 }
 0x844   : > { %v5929_v12 = vadd.f32 %v7864_v47, %v9473_v45 }
 0x845   : > { %v5920_v62 = vpop.f32.mrf.mxu1 }
 0x846   : > { %vm6049_vm0 = vcmp.ge.f32.partialorder %v5929_v12, 0.0  ;;  %v6081_v39 = vmul.f32 0.01, %v5929_v12  ;;  %v5921_v61 = vadd.f32 %v9473_v45, %v5920_v62 }
 0x847   : > { %v7865_v19 = vpop.f32.mrf.mxu1 }
 0x848   : > { %vm6047_vm6 = vcmp.ge.f32.partialorder %v5921_v61, 0.0  ;;  %v6079_v42 = vmul.f32 0.01, %v5921_v61  ;;  %v5932_v63 = vadd.f32 %v7865_v19, %v9473_v45  ;;  %v6113_v26 = vsel %vm6049_vm0, %v5929_v12, %v6081_v39 }
 0x849   : > { %v5923_v14 = vpop.f32.mrf.mxu1  ;;  %v6152_v30 = vmul.f32 %v9480_v8, %v6113_v26 }
 0x84a   : > { %vm6050_vm3 = vcmp.ge.f32.partialorder %v5932_v63, 0.0  ;;  %v6082_v41 = vmul.f32 0.01, %v5932_v63  ;;  %v5924_v60 = vadd.f32 %v9473_v45, %v5923_v14  ;;  %v6111_v4 = vsel %vm6047_vm6, %v5921_v61, %v6079_v42 }
 0x84b   : > { %v6188_v10 = vsel %vm905_vm1, %v6152_v30, 0.0  ;;  %v6150_v15 = vmul.f32 %v9480_v8, %v6111_v4 }
 0x84c   : > { %vm6048_vm4 = vcmp.ge.f32.partialorder %v5924_v60, 0.0  ;;  %v6080_v51 = vmul.f32 0.01, %v5924_v60  ;;  %6189 = vadd.xlane.f32.xlu0 %v6188_v10  ;;  %v6114_v17 = vsel %vm6050_vm3, %v5932_v63, %v6082_v41 }
 0x84d   : > { %v6153_v6 = vmul.f32 %v9480_v8, %v6114_v17  ;;  %v6182_v31 = vsel %vm905_vm1, %v6150_v15, 0.0 }
 0x84e   : > { %v6112_v29 = vsel %vm6048_vm4, %v5924_v60, %v6080_v51 }
 0x84f   : > { %v6191_v36 = vsel %vm905_vm1, %v6153_v6, 0.0  ;;  %v6151_v13 = vmul.f32 %v9480_v8, %v6112_v29 }
 0x850   : > { %6192 = vadd.xlane.f32.xlu1 %v6191_v36  ;;  %6183 = vadd.xlane.f32.xlu0 %v6182_v31 }
 0x851   : > { %v6185_v24 = vsel %vm905_vm1, %v6151_v13, 0.0 }
 0x853   : > { %v7868_v58 = vpop.f32.mrf.mxu1 }
 0x854   : > { %v5945_v59 = vadd.f32 %v7868_v58, %v9473_v45  ;;  %6186 = vadd.xlane.f32.xlu1 %v6185_v24 }
 0x855   : > { %v5936_v16 = vpop.f32.mrf.mxu1 }
 0x856   : > { %vm6053_vm5 = vcmp.ge.f32.partialorder %v5945_v59, 0.0  ;;  %v6085_v11 = vmul.f32 0.01, %v5945_v59  ;;  %v5937_v22 = vadd.f32 %v9473_v45, %v5936_v16 }
 0x857   : > { %v7869_v53 = vpop.f32.mrf.mxu1 }
 0x858   : > { %vm6051_vm7 = vcmp.ge.f32.partialorder %v5937_v22, 0.0  ;;  %v6083_v28 = vmul.f32 0.01, %v5937_v22  ;;  %v5948_v54 = vadd.f32 %v7869_v53, %v9473_v45  ;;  %v6117_v21 = vsel %vm6053_vm5, %v5945_v59, %v6085_v11 }
 0x859   : > { %v5939_v49 = vpop.f32.mrf.mxu1  ;;  %v6156_v43 = vmul.f32 %v9480_v8, %v6117_v21 }
 0x85a   : > { %vm6054_vm8 = vcmp.ge.f32.partialorder %v5948_v54, 0.0  ;;  %v6086_v20 = vmul.f32 0.01, %v5948_v54  ;;  %v5940_v52 = vadd.f32 %v9473_v45, %v5939_v49  ;;  %v6115_v55 = vsel %vm6051_vm7, %v5937_v22, %v6083_v28 }
 0x85b   : > { %v6200_v27 = vsel %vm905_vm1, %v6156_v43, 0.0  ;;  %v6154_v48 = vmul.f32 %v9480_v8, %v6115_v55 }
 0x85c   : > { %vm6052_vm9 = vcmp.ge.f32.partialorder %v5940_v52, 0.0  ;;  %v6084_v33 = vmul.f32 0.01, %v5940_v52  ;;  %6201 = vadd.xlane.f32.xlu0 %v6200_v27  ;;  %v6118_v7 = vsel %vm6054_vm8, %v5948_v54, %v6086_v20 }
 0x85d   : > { %v6157_v40 = vmul.f32 %v9480_v8, %v6118_v7  ;;  %v6194_v38 = vsel %vm905_vm1, %v6154_v48, 0.0 }
 0x85e   : > { %v6116_v23 = vsel %vm6052_vm9, %v5940_v52, %v6084_v33 }
 0x85f   : > { %v6203_v35 = vsel %vm905_vm1, %v6157_v40, 0.0  ;;  %v6155_v57 = vmul.f32 %v9480_v8, %v6116_v23 }
 0x860   : > { %6204 = vadd.xlane.f32.xlu1 %v6203_v35  ;;  %6195 = vadd.xlane.f32.xlu0 %v6194_v38 }
 0x861   : > { %v6197_v18 = vsel %vm905_vm1, %v6155_v57, 0.0 }
 0x863   : > { %v7872_v25 = vpop.f32.mrf.mxu1 }
 0x864   : > { %6198 = vadd.xlane.f32.xlu1 %v6197_v18  ;;  %v5961_v1 = vadd.f32 %v7872_v25, %v9473_v45 }
 0x865   : > { %v5952_v34 = vpop.f32.mrf.mxu1 }
 0x866   : > { %vm6057_vm10 = vcmp.ge.f32.partialorder %v5961_v1, 0.0  ;;  %v6089_v37 = vmul.f32 0.01, %v5961_v1  ;;  %v5953_v0 = vadd.f32 %v9473_v45, %v5952_v34 }
 0x867   : > { %v7873_v44 = vpop.f32.mrf.mxu1 }
 0x868   : > { %vm6055_vm11 = vcmp.ge.f32.partialorder %v5953_v0, 0.0  ;;  %v6087_v2 = vmul.f32 0.01, %v5953_v0  ;;  %v5964_v9 = vadd.f32 %v7873_v44, %v9473_v45  ;;  %v6121_v46 = vsel %vm6057_vm10, %v5961_v1, %v6089_v37 }
 0x869   : > { %v5955_v56 = vpop.f32.mrf.mxu1  ;;  %v6160_v32 = vmul.f32 %v9480_v8, %v6121_v46 }
 0x86a   : > { %vm6058_vm12 = vcmp.ge.f32.partialorder %v5964_v9, 0.0  ;;  %v6090_v3 = vmul.f32 0.01, %v5964_v9  ;;  %v5956_v5 = vadd.f32 %v9473_v45, %v5955_v56  ;;  %v6119_v50 = vsel %vm6055_vm11, %v5953_v0, %v6087_v2 }
 0x86b   : > { %v6212_v47 = vsel %vm905_vm1, %v6160_v32, 0.0  ;;  %v6158_v12 = vmul.f32 %v9480_v8, %v6119_v50 }
 0x86c   : > { %vm6056_vm13 = vcmp.ge.f32.partialorder %v5956_v5, 0.0  ;;  %v6088_v62 = vmul.f32 0.01, %v5956_v5  ;;  %6213 = vadd.xlane.f32.xlu0 %v6212_v47  ;;  %v6122_v39 = vsel %vm6058_vm12, %v5964_v9, %v6090_v3 }
 0x86d   : > { %v6161_v61 = vmul.f32 %v9480_v8, %v6122_v39  ;;  %v6206_v63 = vsel %vm905_vm1, %v6158_v12, 0.0 }
 0x86e   : > { %v6120_v19 = vsel %vm6056_vm13, %v5956_v5, %v6088_v62 }
 0x86f   : > { %v6215_v42 = vsel %vm905_vm1, %v6161_v61, 0.0  ;;  %v6159_v26 = vmul.f32 %v9480_v8, %v6120_v19 }
 0x870   : > { %6216 = vadd.xlane.f32.xlu1 %v6215_v42  ;;  %6207 = vadd.xlane.f32.xlu0 %v6206_v63 }
 0x871   : > { %v6209_v14 = vsel %vm905_vm1, %v6159_v26, 0.0 }
 0x874   : > { %6210 = vadd.xlane.f32.xlu1 %v6209_v14  ;;  %v7876_v30 = vpop.f32.mrf.mxu1 }
 0x875   : > { %v5977_v41 = vadd.f32 %v7876_v30, %v9473_v45 }
 0x876   : > { %v5968_v60 = vpop.f32.mrf.mxu1 }
 0x877   : > { %vm6061_vm14 = vcmp.ge.f32.partialorder %v5977_v41, 0.0  ;;  %v6093_v4 = vmul.f32 0.01, %v5977_v41  ;;  %v5969_v10 = vadd.f32 %v9473_v45, %v5968_v60 }
 0x878   : > { %v7877_v15 = vpop.f32.mrf.mxu1 }
 0x879   : > { %vm6059_vm15 = vcmp.ge.f32.partialorder %v5969_v10, 0.0  ;;  %v6091_v51 = vmul.f32 0.01, %v5969_v10  ;;  %v5980_v17 = vadd.f32 %v7877_v15, %v9473_v45  ;;  %v6125_v6 = vsel %vm6061_vm14, %v5977_v41, %v6093_v4 }
 0x87a   : > { %v5971_v29 = vpop.f32.mrf.mxu1  ;;  %v6164_v36 = vmul.f32 %v9480_v8, %v6125_v6 }
 0x87b   : > { %vm6062_vm0 = vcmp.ge.f32.partialorder %v5980_v17, 0.0  ;;  %v6094_v31 = vmul.f32 0.01, %v5980_v17  ;;  %v5972_v13 = vadd.f32 %v9473_v45, %v5971_v29  ;;  %v6123_v58 = vsel %vm6059_vm15, %v5969_v10, %v6091_v51 }
 0x87c   : > { %v7880_v24 = vpop.f32.mrf.mxu1  ;;  %v6224_v59 = vsel %vm905_vm1, %v6164_v36, 0.0  ;;  %v6162_v16 = vmul.f32 %v9480_v8, %v6123_v58 }
 0x87d   : > { %vm6060_vm6 = vcmp.ge.f32.partialorder %v5972_v13, 0.0  ;;  %v6092_v11 = vmul.f32 0.01, %v5972_v13  ;;  %v5993_v22 = vadd.f32 %v7880_v24, %v9473_v45  ;;  %6225 = vadd.xlane.f32.xlu0 %v6224_v59  ;;  %v6126_v53 = vsel %vm6062_vm0, %v5980_v17, %v6094_v31 }
 0x87e   : > { %v5984_v28 = vpop.f32.mrf.mxu1  ;;  %v6165_v54 = vmul.f32 %v9480_v8, %v6126_v53  ;;  %v6218_v55 = vsel %vm905_vm1, %v6162_v16, 0.0 }
 0x87f   : > { %vm6065_vm3 = vcmp.ge.f32.partialorder %v5993_v22, 0.0  ;;  %v6097_v21 = vmul.f32 0.01, %v5993_v22  ;;  %v5985_v49 = vadd.f32 %v9473_v45, %v5984_v28  ;;  %v6124_v43 = vsel %vm6060_vm6, %v5972_v13, %v6092_v11 }
 0x880   : > { %v7881_v20 = vpop.f32.mrf.mxu1  ;;  %v6227_v52 = vsel %vm905_vm1, %v6165_v54, 0.0  ;;  %v6163_v27 = vmul.f32 %v9480_v8, %v6124_v43 }
 0x881   : > { %vm6063_vm4 = vcmp.ge.f32.partialorder %v5985_v49, 0.0  ;;  %v6095_v48 = vmul.f32 0.01, %v5985_v49  ;;  %v5996_v33 = vadd.f32 %v7881_v20, %v9473_v45  ;;  %6228 = vadd.xlane.f32.xlu1 %v6227_v52  ;;  %6219 = vadd.xlane.f32.xlu0 %v6218_v55  ;;  %v6129_v7 = vsel %vm6065_vm3, %v5993_v22, %v6097_v21 }
 0x882   : > { %v5987_v40 = vpop.f32.mrf.mxu1  ;;  %v6168_v23 = vmul.f32 %v9480_v8, %v6129_v7  ;;  %v6221_v25 = vsel %vm905_vm1, %v6163_v27, 0.0 }
 0x883   : > { %vm6066_vm5 = vcmp.ge.f32.partialorder %v5996_v33, 0.0  ;;  %v6098_v35 = vmul.f32 0.01, %v5996_v33  ;;  %v5988_v38 = vadd.f32 %v9473_v45, %v5987_v40  ;;  %v6127_v57 = vsel %vm6063_vm4, %v5985_v49, %v6095_v48 }
 0x884   : > { %v7884_v18 = vpop.f32.mrf.mxu1  ;;  %v6236_v1 = vsel %vm905_vm1, %v6168_v23, 0.0  ;;  %v6166_v34 = vmul.f32 %v9480_v8, %v6127_v57 }
 0x885   : > { %vm6064_vm7 = vcmp.ge.f32.partialorder %v5988_v38, 0.0  ;;  %v6096_v37 = vmul.f32 0.01, %v5988_v38  ;;  %v6009_v0 = vadd.f32 %v7884_v18, %v9473_v45  ;;  %6222 = vadd.xlane.f32.xlu1 %v6221_v25  ;;  %6237 = vadd.xlane.f32.xlu0 %v6236_v1  ;;  %v6130_v44 = vsel %vm6066_vm5, %v5996_v33, %v6098_v35 }
 0x886   : > { %v6000_v2 = vpop.f32.mrf.mxu1  ;;  %v6169_v9 = vmul.f32 %v9480_v8, %v6130_v44  ;;  %v6230_v50 = vsel %vm905_vm1, %v6166_v34, 0.0  ;;  %vm6504_vm5 = vcmask 1041409  }
 0x887   : > { %vm6069_vm8 = vcmp.ge.f32.partialorder %v6009_v0, 0.0  ;;  %v6101_v46 = vmul.f32 0.01, %v6009_v0  ;;  %v6001_v56 = vadd.f32 %v9473_v45, %v6000_v2  ;;  %v6128_v32 = vsel %vm6064_vm7, %v5988_v38, %v6096_v37 }
 0x888   : > { %v7885_v3 = vpop.f32.mrf.mxu1  ;;  %v6239_v5 = vsel %vm905_vm1, %v6169_v9, 0.0  ;;  %v6167_v47 = vmul.f32 %v9480_v8, %v6128_v32  ;;  %vm6506_vm7 = vcmask 1042434  }
 0x889   : > { %vm6067_vm9 = vcmp.ge.f32.partialorder %v6001_v56, 0.0  ;;  %v6099_v12 = vmul.f32 0.01, %v6001_v56  ;;  %v6012_v62 = vadd.f32 %v7885_v3, %v9473_v45  ;;  %6240 = vadd.xlane.f32.xlu1 %v6239_v5  ;;  %6231 = vadd.xlane.f32.xlu0 %v6230_v50  ;;  %v6133_v39 = vsel %vm6069_vm8, %v6009_v0, %v6101_v46 }
 0x88a   : > { %v6003_v61 = vpop.f32.mrf.mxu1  ;;  %v6172_v19 = vmul.f32 %v9480_v8, %v6133_v39  ;;  %v6233_v30 = vsel %vm905_vm1, %v6167_v47, 0.0  ;;  %vm6508_vm8 = vcmask 1043459  }
 0x88b   : > { %vm6070_vm10 = vcmp.ge.f32.partialorder %v6012_v62, 0.0  ;;  %v6102_v42 = vmul.f32 0.01, %v6012_v62  ;;  %v6004_v63 = vadd.f32 %v9473_v45, %v6003_v61  ;;  %v6131_v26 = vsel %vm6067_vm9, %v6001_v56, %v6099_v12 }
 0x88c   : > { %v7888_v14 = vpop.f32.mrf.mxu1  ;;  %v6248_v41 = vsel %vm905_vm1, %v6172_v19, 0.0  ;;  %v6170_v60 = vmul.f32 %v9480_v8, %v6131_v26  ;;  %v7053_v19 = vld [vmem:[#allocation2] ss:$0 sm:$0xff]  ;;  %vm6510_vm9 = vcmask 1044484  }
 0x88d   : > { %vm6068_vm11 = vcmp.ge.f32.partialorder %v6004_v63, 0.0  ;;  %v6100_v4 = vmul.f32 0.01, %v6004_v63  ;;  %v6025_v10 = vadd.f32 %v7888_v14, %v9473_v45  ;;  %6234 = vadd.xlane.f32.xlu1 %v6233_v30  ;;  %6249 = vadd.xlane.f32.xlu0 %v6248_v41  ;;  %v6134_v15 = vsel %vm6070_vm10, %v6012_v62, %v6102_v42 }
 0x88e   : > { %v6016_v51 = vpop.f32.mrf.mxu1  ;;  %v6173_v17 = vmul.f32 %v9480_v8, %v6134_v15  ;;  %v6242_v58 = vsel %vm905_vm1, %v6170_v60, 0.0  ;;  %vm6512_vm10 = vcmask 1045509  }
 0x88f   : > { %vm6073_vm12 = vcmp.ge.f32.partialorder %v6025_v10, 0.0  ;;  %v6105_v6 = vmul.f32 0.01, %v6025_v10  ;;  %v6017_v29 = vadd.f32 %v9473_v45, %v6016_v51  ;;  %v6132_v36 = vsel %vm6068_vm11, %v6004_v63, %v6100_v4 }
 0x890   : > { %v7889_v31 = vpop.f32.mrf.mxu1  ;;  %v6251_v13 = vsel %vm905_vm1, %v6173_v17, 0.0  ;;  %v6171_v24 = vmul.f32 %v9480_v8, %v6132_v36  ;;  %vm6514_vm11 = vcmask 1046534  }
 0x891   : > { %vm6071_vm13 = vcmp.ge.f32.partialorder %v6017_v29, 0.0  ;;  %v6103_v59 = vmul.f32 0.01, %v6017_v29  ;;  %v6028_v16 = vadd.f32 %v7889_v31, %v9473_v45  ;;  %6252 = vadd.xlane.f32.xlu1 %v6251_v13  ;;  %6243 = vadd.xlane.f32.xlu0 %v6242_v58  ;;  %v6137_v11 = vsel %vm6073_vm12, %v6025_v10, %v6105_v6 }
 0x892   : > { %v6019_v22 = vpop.f32.mrf.mxu1  ;;  %v6176_v53 = vmul.f32 %v9480_v8, %v6137_v11  ;;  %v6245_v43 = vsel %vm905_vm1, %v6171_v24, 0.0 }
 0x893   : > { %vm6074_vm14 = vcmp.ge.f32.partialorder %v6028_v16, 0.0  ;;  %v6106_v28 = vmul.f32 0.01, %v6028_v16  ;;  %v6020_v54 = vadd.f32 %v9473_v45, %v6019_v22  ;;  %v6135_v21 = vsel %vm6071_vm13, %v6017_v29, %v6103_v59 }
 0x894   : > { %v7892_v49 = vpop.f32.mrf.mxu1  ;;  %v6260_v20 = vsel %vm905_vm1, %v6176_v53, 0.0  ;;  %v6174_v52 = vmul.f32 %v9480_v8, %v6135_v21  ;;  %v6356_v53 = vlaneseq  ;;  %vm6516_vm13 = vcmask 1047559  }
 0x895   : > { %vm6072_vm15 = vcmp.ge.f32.partialorder %v6020_v54, 0.0  ;;  %v6104_v55 = vmul.f32 0.01, %v6020_v54  ;;  %v6041_v27 = vadd.f32 %v7892_v49, %v9473_v45  ;;  %6246 = vadd.xlane.f32.xlu1 %v6245_v43  ;;  %6261 = vadd.xlane.f32.xlu0 %v6260_v20  ;;  %v6138_v48 = vsel %vm6074_vm14, %v6028_v16, %v6106_v28 }
 0x896   : > { %v6032_v33 = vpop.f32.mrf.mxu1  ;;  %v6177_v7 = vmul.f32 %v9480_v8, %v6138_v48  ;;  %v6254_v18 = vsel %vm905_vm1, %v6174_v52, 0.0  ;;  %v6357_v21 = vand.u32 127, %v6356_v53  ;;  %v9601_v43 = vshrl.u32 %v6356_v53, 7 }
 0x897   : > { %vm6077_vm0 = vcmp.ge.f32.partialorder %v6041_v27, 0.0  ;;  %v6109_v40 = vmul.f32 0.01, %v6041_v27  ;;  %v6033_v23 = vadd.f32 %v9473_v45, %v6032_v33  ;;  %v6136_v35 = vsel %vm6072_vm15, %v6020_v54, %v6104_v55 }
 0x898   : > { %v7893_v38 = vpop.f32.mrf.mxu1  ;;  %v6263_v57 = vsel %vm905_vm1, %v6177_v7, 0.0  ;;  %v6175_v25 = vmul.f32 %v9480_v8, %v6136_v35  ;;  %v6362_v52 = vadd.s32 4294967288, %v6357_v21  ;;  %v9606_v55 = vsub.s32 %v6357_v21, %v9601_v43 }
 0x899   : > { %vm6075_vm6 = vcmp.ge.f32.partialorder %v6033_v23, 0.0  ;;  %v6107_v1 = vmul.f32 0.01, %v6033_v23  ;;  %v6044_v34 = vadd.f32 %v7893_v38, %v9473_v45  ;;  %6264 = vadd.xlane.f32.xlu1 %v6263_v57  ;;  %6255 = vadd.xlane.f32.xlu0 %v6254_v18  ;;  %v6141_v37 = vsel %vm6077_vm0, %v6041_v27, %v6109_v40 }
 0x89a   : > { %v6035_v0 = vpop.f32.mrf.mxu1  ;;  %v6180_v44 = vmul.f32 %v9480_v8, %v6141_v37  ;;  %v6257_v56 = vsel %vm905_vm1, %v6175_v25, 0.0  ;;  %v9616_v48 = vsub.s32 %v6362_v52, %v9601_v43  ;;  %vm9739_vm15 = vcmp.lt.s32.totalorder %v6356_v53, 16 }
 0x89b   : > { %v6110_v2 = vmul.f32 0.01, %v6044_v34  ;;  %v6036_v9 = vadd.f32 %v9473_v45, %v6035_v0  ;;  %v6139_v46 = vsel %vm6075_vm6, %v6033_v23, %v6107_v1  ;;  %vm6078_vm3 = vcmp.ge.f32.partialorder %v6044_v34, 0.0 }
 0x89c   : > { %v6272_v32 = vsel %vm905_vm1, %v6180_v44, 0.0  ;;  %v6178_v3 = vmul.f32 %v9480_v8, %v6139_v46  ;;  %v6320_v44 = vld [vmem:[%s9613_s23] sm:$0xff]  ;;  %vm9759_vm0 = vcmp.lt.s32.totalorder %v6356_v53, 32 }
 0x89d   : > { %vm6076_vm4 = vcmp.ge.f32.partialorder %v6036_v9, 0.0  ;;  %v6108_v5 = vmul.f32 0.01, %v6036_v9  ;;  %6258 = vadd.xlane.f32.xlu1 %v6257_v56  ;;  %6273 = vadd.xlane.f32.xlu0 %v6272_v32  ;;  %v6142_v47 = vsel %vm6078_vm3, %v6044_v34, %v6110_v2  ;;  %vm6322_vm12 = vcmp.ne.s32.totalorder %v6320_v44, 0 }
 0x89e   : > { %v6266_v12 = vsel %vm905_vm1, %v6178_v3, 0.0  ;;  %v6181_v39 = vmul.f32 %v9480_v8, %v6142_v47  ;;  %vm9768_vm3 = vcmp.ge.s32.totalorder %v6356_v53, 32 }
 0x89f   : > { %v6140_v50 = vsel %vm6076_vm4, %v6036_v9, %v6108_v5  ;;  %vm9773_vm4 = vcmp.lt.s32.totalorder %v6356_v53, 48 }
 0x8a0   : > { %v6179_v62 = vmul.f32 %v9480_v8, %v6140_v50  ;;  %v6275_v61 = vsel %vm905_vm1, %v6181_v39, 0.0 }
 0x8a1   : > { %6267 = vadd.xlane.f32.xlu0 %v6266_v12 }
 0x8a2   : > { %v6269_v45 = vsel %vm905_vm1, %v6179_v62, 0.0  ;;  %vm6367_vm1 = vcmask 130112  }
 0x8a3   : > { %6270 = vadd.xlane.f32.xlu1 %v6269_v45 }
 0x8a7   : > { %6276 = vadd.xlane.f32.xlu1 %v6275_v61 }
 0x8b7   : > { %6285 = vperm.xlu0 %7945, %v7053_v19  }
 0x8d5   : > { %v6190_v42 = vpop.xlane.xlu0 %6189 }
 0x8d9   : > { %v6184_v63 = vpop.xlane.xlu0 %6183  ;;  %v6193_v26 = vpop.xlane.xlu1 %6192 }
 0x8dd   : > { %v6187_v30 = vpop.xlane.xlu1 %6186 }
 0x8e5   : > { %v6202_v14 = vpop.xlane.xlu0 %6201 }
 0x8e9   : > { %v6196_v41 = vpop.xlane.xlu0 %6195  ;;  %v6205_v60 = vpop.xlane.xlu1 %6204 }
 0x8ed   : > { %v6199_v10 = vpop.xlane.xlu1 %6198 }
 0x8f5   : > { %v6214_v4 = vpop.xlane.xlu0 %6213 }
 0x8f9   : > { %v6208_v15 = vpop.xlane.xlu0 %6207  ;;  %v6217_v51 = vpop.xlane.xlu1 %6216 }
 0x8fd   : > { %v6211_v6 = vpop.xlane.xlu1 %6210 }
 0x906   : > { %v6226_v17 = vpop.xlane.xlu0 %6225 }
 0x90a   : > { %v6220_v8 = vpop.xlane.xlu0 %6219  ;;  %v6229_v36 = vpop.xlane.xlu1 %6228 }
 0x90e   : > { %v9576_v29 = vpop.xlane.xlu0 %6237  ;;  %v6223_v13 = vpop.xlane.xlu1 %6222 }
 0x912   : > { %v9578_v31 = vpop.xlane.xlu0 %6231  ;;  %v9584_v59 = vpop.xlane.xlu1 %6240 }
 0x916   : > { %v9580_v58 = vpop.xlane.xlu0 %6249  ;;  %v9588_v11 = vpop.xlane.xlu1 %6234 }
 0x91a   : > { %v9582_v24 = vpop.xlane.xlu0 %6243  ;;  %v9593_v28 = vpop.xlane.xlu1 %6252 }
 0x91e   : > { %v9586_v16 = vpop.xlane.xlu0 %6261  ;;  %v9598_v49 = vpop.xlane.xlu1 %6246 }
 0x922   : > { %v9590_v22 = vpop.xlane.xlu0 %6255  ;;  %v9618_v33 = vpop.xlane.xlu1 %6264 }
 0x926   : > { %v9595_v54 = vpop.xlane.xlu0 %6273  ;;  %v6259_v39 = vpop.xlane.xlu1 %6258 }
 0x92a   : > { %v9603_v20 = vpop.xlane.xlu0 %6267 }
 0x932   : > { %v9608_v27 = vpop.permute.xlu0 %6285 }
 0x933   : > { %v6288_v7 = vadd.f32 %v9608_v27, %v6184_v63  ;;  %v6289_v40 = vadd.f32 %v9608_v27, %v6187_v30  ;;  %v6290_v23 = vadd.f32 %v9608_v27, %v6190_v42  ;;  %v6291_v35 = vadd.f32 %v9608_v27, %v6193_v26 }
 0x934   : > { %v6292_v38 = vadd.f32 %v9608_v27, %v6196_v41  ;;  %v6293_v57 = vadd.f32 %v9608_v27, %v6199_v10  ;;  %v6294_v18 = vadd.f32 %v9608_v27, %v6202_v14  ;;  %v6295_v25 = vadd.f32 %v9608_v27, %v6205_v60 }
 0x935   : > { %v6296_v1 = vadd.f32 %v9608_v27, %v6208_v15  ;;  %v6297_v34 = vadd.f32 %v9608_v27, %v6211_v6  ;;  %v6298_v37 = vadd.f32 %v9608_v27, %v6214_v4  ;;  %v6299_v0 = vadd.f32 %v9608_v27, %v6217_v51  ;;  %v6271_v6 = vpop.xlane.xlu1 %6270 }
 0x936   : > { %v6300_v2 = vadd.f32 %v9608_v27, %v6220_v8  ;;  %v6301_v9 = vadd.f32 %v9608_v27, %v6223_v13  ;;  %v6302_v46 = vadd.f32 %v9608_v27, %v6226_v17  ;;  %v6303_v56 = vadd.f32 %v9608_v27, %v6229_v36 }
 0x937   : > { %v6361_v32 = vrot.slane %v6288_v7, %v9606_v55  ;;  %v6366_v3 = vrot.slane %v6289_v40, %v9616_v48  ;;  %v6372_v5 = vrot.slane %v6290_v23, %v9606_v55  ;;  %v6376_v50 = vrot.slane %v6291_v35, %v9616_v48 }
 0x938   : > { %v6381_v47 = vrot.slane %v6292_v38, %v9606_v55  ;;  %v6385_v12 = vrot.slane %v6293_v57, %v9616_v48  ;;  %v6390_v62 = vrot.slane %v6294_v18, %v9606_v55  ;;  %v6394_v45 = vrot.slane %v6295_v25, %v9616_v48 }
 0x939   : > { %v6368_v61 = vsel %vm6367_vm1, %v6366_v3, %v6361_v32  ;;  %v6377_v19 = vsel %vm6367_vm1, %v6376_v50, %v6372_v5  ;;  %v6399_v42 = vrot.slane %v6296_v1, %v9606_v55  ;;  %v6403_v63 = vrot.slane %v6297_v34, %v9616_v48 }
 0x93a   : > { %v6386_v26 = vsel %vm6367_vm1, %v6385_v12, %v6381_v47  ;;  %v6408_v14 = vrot.slane %v6298_v37, %v9606_v55  ;;  %v6412_v30 = vrot.slane %v6299_v0, %v9616_v48  ;;  %v6395_v41 = vsel %vm6367_vm1, %v6394_v45, %v6390_v62  ;;  %v6277_v0 = vpop.xlane.xlu1 %6276 }
 0x93b   : > { %v6417_v60 = vrot.slane %v6300_v2, %v9606_v55  ;;  %v6421_v4 = vrot.slane %v6301_v9, %v9616_v48  ;;  %v6426_v10 = vrot.slane %v6302_v46, %v9606_v55  ;;  %v6404_v15 = vsel %vm6367_vm1, %v6403_v63, %v6399_v42 }
 0x93c   : > { %v6413_v51 = vsel %vm6367_vm1, %v6412_v30, %v6408_v14  ;;  %v6430_v17 = vrot.slane %v6303_v56, %v9616_v48  ;;  %v6505_v8 = vsel %vm6504_vm5, %v6377_v19, %v6368_v61  ;;  %v6304_v21 = vadd.f32 %v9608_v27, %v9578_v31  ;;  %v6321_v19 = vld [vmem:[%s9613_s23 + $0x8] sm:$0xff]  ;;  %s8147_s23 = smov 96  }
 0x93d   : > { %v6422_v36 = vsel %vm6367_vm1, %v6421_v4, %v6417_v60  ;;  %v6507_v13 = vsel %vm6506_vm7, %v6386_v26, %v6505_v8  ;;  %v6305_v52 = vadd.f32 %v9608_v27, %v9588_v11  ;;  %v6306_v23 = vadd.f32 %v9608_v27, %v9576_v29 }
 0x93e   : > { %v6431_v7 = vsel %vm6367_vm1, %v6430_v17, %v6426_v10  ;;  %v6509_v40 = vsel %vm6508_vm8, %v6395_v41, %v6507_v13  ;;  %v6307_v35 = vadd.f32 %v9608_v27, %v9584_v59  ;;  %v6308_v57 = vadd.f32 %v9608_v27, %v9582_v24 }
 0x93f   : > { %v6511_v38 = vsel %vm6510_vm9, %v6404_v15, %v6509_v40  ;;  %v6309_v31 = vadd.f32 %v9608_v27, %v9598_v49  ;;  %v6310_v11 = vadd.f32 %v9608_v27, %v9580_v58  ;;  %v6311_v25 = vadd.f32 %v9608_v27, %v9593_v28 }
 0x940   : > { %v6513_v18 = vsel %vm6512_vm10, %v6413_v51, %v6511_v38  ;;  %v6312_v29 = vadd.f32 %v9608_v27, %v9590_v22  ;;  %v6313_v59 = vadd.f32 %v9608_v27, %v6259_v39  ;;  %v6314_v24 = vadd.f32 %v9608_v27, %v9586_v16 }
 0x941   : > { %v6515_v1 = vsel %vm6514_vm11, %v6422_v36, %v6513_v18  ;;  %v6315_v49 = vadd.f32 %v9608_v27, %v9618_v33  ;;  %v6316_v58 = vadd.f32 %v9608_v27, %v9603_v20  ;;  %v6317_v28 = vadd.f32 %v9608_v27, %v6271_v6 }
 0x942   : > { %v6517_v34 = vsel %vm6516_vm13, %v6431_v7, %v6515_v1  ;;  %v6318_v22 = vadd.f32 %v9608_v27, %v9595_v54  ;;  %v6435_v37 = vrot.slane %v6304_v21, %v9606_v55  ;;  %v6439_v16 = vrot.slane %v6305_v52, %v9616_v48 }
 0x943   : > { %v6527_v2 = vsel %vm6322_vm12, %v6517_v34, -1e+30  ;;  %v6444_v9 = vrot.slane %v6306_v23, %v9606_v55  ;;  %v6448_v33 = vrot.slane %v6307_v35, %v9616_v48  ;;  %v6319_v46 = vadd.f32 %v9608_v27, %v6277_v0 }
 0x944   : > { %v6529_v20 = vsel %vm663_vm2, %v6527_v2, -inf  ;;  %v6453_v56 = vrot.slane %v6308_v57, %v9606_v55  ;;  %v6457_v54 = vrot.slane %v6309_v31, %v9616_v48  ;;  %v6440_v32 = vsel %vm6367_vm1, %v6439_v16, %v6435_v37 }
 0x945   : > { %6530 = vmax.xlane.f32.xlu1 %v6529_v20  ;;  %v6449_v44 = vsel %vm6367_vm1, %v6448_v33, %v6444_v9  ;;  %v6462_v3 = vrot.slane %v6310_v11, %v9606_v55  ;;  %v6466_v5 = vrot.slane %v6311_v25, %v9616_v48  ;;  %v6471_v47 = vrot.slane %v6312_v29, %v9606_v55 }
 0x946   : > { %v6458_v50 = vsel %vm6367_vm1, %v6457_v54, %v6453_v56  ;;  %v6475_v27 = vrot.slane %v6313_v59, %v9616_v48  ;;  %v6480_v12 = vrot.slane %v6314_v24, %v9606_v55  ;;  %v6484_v62 = vrot.slane %v6315_v49, %v9616_v48 }
 0x947   : > { %v6489_v45 = vrot.slane %v6316_v58, %v9606_v55  ;;  %v6493_v39 = vrot.slane %v6317_v28, %v9616_v48  ;;  %v6518_v61 = vsel %vm6504_vm5, %v6449_v44, %v6440_v32  ;;  %v6467_v42 = vsel %vm6367_vm1, %v6466_v5, %v6462_v3 }
 0x948   : > { %v6498_v63 = vrot.slane %v6318_v22, %v9606_v55  ;;  %v6502_v26 = vrot.slane %v6319_v46, %v9616_v48  ;;  %v6519_v14 = vsel %vm6506_vm7, %v6458_v50, %v6518_v61  ;;  %v6476_v30 = vsel %vm6367_vm1, %v6475_v27, %v6471_v47 }
 0x949   : > { %v6520_v41 = vsel %vm6508_vm8, %v6467_v42, %v6519_v14  ;;  %v6485_v60 = vsel %vm6367_vm1, %v6484_v62, %v6480_v12  ;;  %vm6323_vm14 = vcmp.ne.s32.totalorder %v6321_v19, 0  ;;  %v6494_v10 = vsel %vm6367_vm1, %v6493_v39, %v6489_v45 }
 0x94a   : > { %v6521_v4 = vsel %vm6510_vm9, %v6476_v30, %v6520_v41  ;;  %v6503_v51 = vsel %vm6367_vm1, %v6502_v26, %v6498_v63  ;;  %v8141_v31 = vmov 1966171168   ;;  %vm9778_vm1 = vcmp.ge.s32.totalorder %v6356_v53, 48  ;;  %vm10034_vm9 = vmand %vm9768_vm3, %vm9773_vm4 }
 0x94b   : > { %v6522_v15 = vsel %vm6512_vm10, %v6485_v60, %v6521_v4  ;;  %v6558_v11 = vunpack.c.l.s4 %v8141_v31  ;;  %vm9783_vm5 = vcmp.lt.s32.totalorder %v6356_v53, 64  ;;  %vm9794_vm7 = vcmp.ge.s32.totalorder %v6356_v53, 64 }
 0x94c   : > { %v6523_v55 = vsel %vm6514_vm11, %v6494_v10, %v6522_v15  ;;  %vm9799_vm8 = vcmp.lt.s32.totalorder %v6356_v53, 80  ;;  %vm10032_vm10 = vmand %vm9778_vm1, %vm9783_vm5  ;;  %vm9812_vm11 = vcmp.ge.s32.totalorder %v6356_v53, 80  ;;  %vm9817_vm12 = vcmp.lt.s32.totalorder %v6356_v53, 96 }
 0x94d   : > { %v6524_v48 = vsel %vm6516_vm13, %v6503_v51, %v6523_v55  ;;  %v6559_v18 = vunpack.c.0.s8 %v6558_v11  ;;  %v10123_v51 = vmov 0  ;;  %vm10033_vm13 = vmand %vm9794_vm7, %vm9799_vm8 }
 0x94e   : > { %v6528_v17 = vsel %vm6323_vm14, %v6524_v48, -1e+30  ;;  %v10124_v51 = vsel %vm9817_vm12, 4294967295, %v10123_v51  ;;  %vm10036_vm14 = vmand %vm9812_vm11, %vm9817_vm12 }
 0x94f   : > { %v6532_v8 = vsel %vm663_vm2, %v6528_v17, -inf  ;;  %v6562_v29 = vsub.s32 %v6559_v18, %v9601_v43 }
 0x950   : > { %6533 = vmax.xlane.f32.xlu1 %v6532_v8 }
 0x9ce   : > { %v6531_v6 = vpop.xlane.xlu1 %6530 }
 0x9cf   : > { %v6535_v36 = vsub.f32 %v6527_v2, %v6531_v6 }
 0x9d1   : > { %v6537_v13 = vmul.f32 1.442695, %v6535_v36 }
 0x9d3   : > { %8068 = vpow2.f32 %v6537_v13 }
 0x9d9   : > { %v6534_v21 = vpop.xlane.xlu1 %6533 }
 0x9da   : > { %v6536_v52 = vsub.f32 %v6528_v17, %v6534_v21 }
 0x9dc   : > { %v6539_v7 = vmul.f32 1.442695, %v6536_v52 }
 0x9de   : > { %8070 = vpow2.f32 %v6539_v7 }
 0x9e0   : > { %v8069_v40 = vpop.eup %8068 }
 0x9e1   : > { %v6541_v23 = vsel %vm663_vm2, %v8069_v40, 0.0 }
 0x9e2   : > { %6542 = vadd.xlane.f32.xlu1 %v6541_v23 }
 0x9eb   : > { %v8071_v35 = vpop.eup %8070 }
 0x9ec   : > { %v6544_v38 = vsel %vm663_vm2, %v8071_v35, 0.0  ;;  %vm9754_vm2 = vcmp.ge.s32.totalorder %v6356_v53, 16 }
 0x9ed   : > { %6545 = vadd.xlane.f32.xlu1 %v6544_v38  ;;  %vm10035_vm6 = vmand %vm9754_vm2, %vm9759_vm0 }
 0xa6b   : > { %v6543_v57 = vpop.xlane.xlu1 %6542 }
 0xa6c   : > { %8072 = vrcp.f32 %v6543_v57 }
 0xa76   : > { %v6546_v25 = vpop.xlane.xlu1 %6545 }
 0xa77   : > { %8074 = vrcp.f32 %v6546_v25 }
 0xa79   : > { %v8073_v59 = vpop.eup %8072 }
 0xa7a   : > { %v6548_v24 = vmul.f32 %v8073_v59, %v8069_v40 }
 0xa7c   : > { %v6602_v49 = vcombine.high %v6548_v24, %v6548_v24  ;;  %v6563_v58 = vrot.slane %v6548_v24, %v6562_v29  ;;  %6555 = vst.msk [vmem:[%s9743_s25] sm:$0x1] %vm9739_vm15, %v6548_v24 }
 0xa7e   : > { %v6609_v34 = vrot.slane %v6602_v49, %v6562_v29  ;;  %v6564_v28 = vcombine.high %v6563_v58, %v6563_v58  ;;  %v6571_v43 = vrot.slane %v6563_v58, %v6562_v29 }
 0xa80   : > { %v6616_v22 = vrot.slane %v6609_v34, %v6562_v29  ;;  %v6578_v37 = vrot.slane %v6564_v28, %v6562_v29  ;;  %v6586_v0 = vcombine.high %v6571_v43, %v6571_v43  ;;  %v6624_v16 = vcombine.high %v6609_v34, %v6609_v34 }
 0xa82   : > { %6617 = vrot.lane.b32.xlu0 %v6616_v22, %s8142_s19  ;;  %6579 = vrot.lane.b32.xlu1 %v6578_v37, %s8143_s22  ;;  %v6594_v2 = vcombine.high %v6578_v37, %v6578_v37  ;;  %v6631_v20 = vrot.slane %v6624_v16, %v6562_v29  ;;  %v6639_v32 = vcombine.high %v6616_v22, %v6616_v22 }
 0xa84   : > { %v8075_v9 = vpop.eup %8074  ;;  %v6647_v50 = vcombine.high %v6631_v20, %v6631_v20 }
 0xa85   : > { %v6550_v33 = vmul.f32 %v8075_v9, %v8071_v35 }
 0xa86   : > { %6587 = vrot.lane.b32.xlu1 %v6586_v0, %s8144_s1  ;;  %6595 = vrot.lane.b32.xlu0 %v6594_v2, %s8145_s16 }
 0xa87   : > { %v6663_v46 = vrot.slane %v6550_v33, %v6562_v29  ;;  %6655 = vst.msk [vmem:[%s9743_s25 + $0x1] sm:$0x1] %vm9739_vm15, %v6550_v33  ;;  %v6693_v3 = vcombine.high %v6550_v33, %v6550_v33  ;;  %vm9848_vm15 = vcmp.ge.s32.totalorder %v6356_v53, 96 }
 0xa89   : > { %v6664_v56 = vcombine.high %v6663_v46, %v6663_v46  ;;  %v6671_v44 = vrot.slane %v6663_v46, %v6562_v29  ;;  %v6700_v47 = vrot.slane %v6693_v3, %v6562_v29 }
 0xa8a   : > { %6632 = vrot.lane.b32.xlu0 %v6631_v20, %s8146_s28 }
 0xa8b   : > { %v6678_v54 = vrot.slane %v6664_v56, %v6562_v29  ;;  %v6683_v5 = vcombine.high %v6671_v44, %v6671_v44  ;;  %v6707_v27 = vrot.slane %v6700_v47, %v6562_v29  ;;  %v6712_v62 = vcombine.high %v6700_v47, %v6700_v47 }
 0xa8d   : > { %6679 = vrot.lane.b32.xlu1 %v6678_v54, %s8143_s22  ;;  %v6688_v12 = vcombine.high %v6678_v54, %v6678_v54  ;;  %v6719_v45 = vrot.slane %v6712_v62, %v6562_v29  ;;  %v6724_v39 = vcombine.high %v6707_v27, %v6707_v27 }
 0xa8e   : > { %6640 = vrot.lane.b32.xlu0 %v6639_v32, %s8147_s23 }
 0xa8f   : > { %v6729_v61 = vcombine.high %v6719_v45, %v6719_v45 }
 0xa91   : > { %6684 = vrot.lane.b32.xlu1 %v6683_v5, %s8144_s1 }
 0xa92   : > { %6648 = vrot.lane.b32.xlu0 %v6647_v50, %s8148_s18 }
 0xa95   : > { %6708 = vrot.lane.b32.xlu1 %v6707_v27, %s8142_s19  ;;  %s6749_s19 = sshll.u32 %s9743_s25, 4  ;;  %s6750_s19 = int_to_ptr.vmem [resolvable:$true] %s6749_s19 }
 0xa99   : > { %6689 = vrot.lane.b32.xlu1 %v6688_v12, %s8145_s16  ;;  %s9934_s16 = scalar_lea.hbm %s9994_s17, %s8295_s24 }
 0xa9d   : > { %6720 = vrot.lane.b32.xlu1 %v6719_v45, %s8146_s28  ;;  %s6735_s28 = scalar_lea.sflag [#allocation4], %s576_s0 }
 0xaa1   : > { %6725 = vrot.lane.b32.xlu1 %v6724_v39, %s8147_s23  ;;  %s8076_s23 = scalar_lea.vmem %s6750_s19, 32 }
 0xaa2   : > { %p8077_p13 = scmp.ne.s32.totalorder %s6750_s19, %s8076_s23 }
 0xaa4   : > { %p8078_p0 = pnand %p8077_p13, %p8281_p5 }
 0xaa5   : > { %6730 = vrot.lane.b32.xlu1 %v6729_v61, %s8148_s18  ;;  %s8149_s18 = smov [#allocation3]  }
 0xaa6   : > { %p8079_p1 = pneg %p8078_p0  ;;  %s8080_s2 = sshll.u32 %s8149_s18, 4  ;;  %s8081_s2 = int_to_ptr.vmem [resolvable:$false] %s8080_s2 }
 0xaa7   : > { %s8082_s24 = scalar_lea.vmem %s8081_s2, 64  ;;  %p8083_p2 = scmp.lt.s32.totalorder %s6750_s19, %s8081_s2 }
 0xaa8   : > { %p8084_p3 = scmp.lt.s32.totalorder %s8082_s24, %s8076_s23 }
 0xaaa   : > { %p8085_p4 = por %p8084_p3, %p8083_p2 }
 0xaac   : > { %p8086_p7 = pnand %p8085_p4, %p8079_p1 }
 0xaf4   : > { %v6618_v14 = vpop.permute.xlu0 %6617  ;;  %v6580_v30 = vpop.permute.xlu1 %6579 }
 0xaf5   : > { %6585 = vst.msk [vmem:[%s9743_s25] sm:$0x1] %vm10035_vm6, %v6580_v30  ;;  %vm9873_vm6 = vcmp.lt.s32.totalorder %v6356_v53, 128 }
 0xaf8   : > { %v6596_v55 = vpop.permute.xlu0 %6595  ;;  %v6588_v48 = vpop.permute.xlu1 %6587 }
 0xaf9   : > { %6593 = vst.msk [vmem:[%s9743_s25] sm:$0x1] %vm10034_vm9, %v6588_v48  ;;  %vm9868_vm9 = vcmp.ge.s32.totalorder %v6356_v53, 112 }
 0xafa   : > { %6601 = vst.msk [vmem:[%s9743_s25] sm:$0x1] %vm10032_vm10, %v6596_v55  ;;  %vm9853_vm10 = vcmp.lt.s32.totalorder %v6356_v53, 112  ;;  %vm6653_vm12 = vmand %vm9868_vm9, %vm9873_vm6 }
 0xafb   : > { %6623 = vst.msk [vmem:[%s9743_s25] sm:$0x1] %vm10033_vm13, %v6618_v14  ;;  %vm6645_vm13 = vmand %vm9848_vm15, %vm9853_vm10 }
 0xafc   : > { %v6633_v6 = vpop.permute.xlu0 %6632 }
 0xafd   : > { %6638 = vst.msk [vmem:[%s9743_s25] sm:$0x1] %vm10036_vm14, %v6633_v6  ;;  %vm10133_vm14 = vmand %vm9754_vm2, %vm9759_vm0 }
 0xafe   : > { %vm10134_vm2 = vmand %vm9768_vm3, %vm9773_vm4  ;;  %vm10137_vm4 = vnez %v10124_v51 }
 0xaff   : > { %v6680_v21 = vpop.permute.xlu1 %6679  ;;  %vm10135_vm0 = vmand %vm9778_vm1, %vm9783_vm5 }
 0xb00   : > { %v6641_v52 = vpop.permute.xlu0 %6640  ;;  %6682 = vst.msk [vmem:[%s9743_s25 + $0x1] sm:$0x1] %vm10133_vm14, %v6680_v21  ;;  %vm10136_vm3 = vmand %vm9794_vm7, %vm9799_vm8 }
 0xb01   : > { %6646 = vst.msk [vmem:[%s9743_s25] sm:$0x1] %vm6645_vm13, %v6641_v52  ;;  %vm10138_vm14 = vmand %vm9812_vm11, %vm10137_vm4 }
 0xb03   : > { %v6685_v53 = vpop.permute.xlu1 %6684 }
 0xb04   : > { %v6649_v7 = vpop.permute.xlu0 %6648  ;;  %6687 = vst.msk [vmem:[%s9743_s25 + $0x1] sm:$0x1] %vm10134_vm2, %v6685_v53 }
 0xb05   : > { %6654 = vst.msk [vmem:[%s9743_s25] sm:$0x1] %vm6653_vm12, %v6649_v7 }
 0xb07   : > { %v6709_v40 = vpop.permute.xlu1 %6708 }
 0xb0b   : > { %v6690_v23 = vpop.permute.xlu1 %6689 }
 0xb0c   : > { %6692 = vst.msk [vmem:[%s9743_s25 + $0x1] sm:$0x1] %vm10135_vm0, %v6690_v23 }
 0xb0d   : > { %6711 = vst.msk [vmem:[%s9743_s25 + $0x1] sm:$0x1] %vm10136_vm3, %v6709_v40 }
 0xb0f   : > { %v6721_v35 = vpop.permute.xlu1 %6720 }
 0xb10   : > { %6723 = vst.msk [vmem:[%s9743_s25 + $0x1] sm:$0x1] %vm10138_vm14, %v6721_v35 }
 0xb13   : > { %v6726_v38 = vpop.permute.xlu1 %6725 }
 0xb14   : > { %6728 = vst.msk [vmem:[%s9743_s25 + $0x1] sm:$0x1] %vm6645_vm13, %v6726_v38 }
 0xb17   : > { %v6731_v57 = vpop.permute.xlu1 %6730 }
 0xb18   : > { %6733 = vst.msk [vmem:[%s9743_s25 + $0x1] sm:$0x1] %vm6653_vm12, %v6731_v57 }
 0xb19   : > { %8089 = shalt.err (!%p8086_p7)
}
 0xb1a   : > { %s8090_s25 = scalar_lea.hbm %s9934_s16, 32  ;;  %s8094_s1 = scalar_lea.hbm %s9994_s17, 64 }
 0xb1b   : > { %p8091_p8 = scmp.ne.s32.totalorder %s9934_s16, %s8090_s25  ;;  %p8095_p11 = scmp.lt.s32.totalorder %s9934_s16, %s9994_s17 }
 0xb1c   : > { %p8096_p12 = scmp.lt.s32.totalorder %s8094_s1, %s8090_s25 }
 0xb1d   : > { %p8092_p9 = pnand %p8091_p8, %p8281_p5 }
 0xb1e   : > { %p8097_p13 = por %p8096_p12, %p8095_p11 }
 0xb1f   : > { %p8093_p10 = pneg %p8092_p9 }
 0xb21   : > { %p8098_p0 = pnand %p8097_p13, %p8093_p10 }
 0xb23   : > { %8101 = shalt.err (!%p8098_p0)
}
 0xb24   : > { %7895 = dma.vmem_to_hbm [thread:$0]  (%p8281_p5), %s6750_s19, 32, %s9934_s16, %s6735_s28  }
 0xb25 PF: > { %p7901_p1 = scmp.ge.s32.totalorder %s8136_s29, 2  ;;  %s6761_s2 = sand.u32 1, %s8124_s26  }
 0xb26   : > { %s6762_s23 = scalar_lea.sflag [#allocation4], %s6761_s2 }
 0xb27   : > { %p7898_p2 = pnand %p7901_p1, %p8285_p6 }
 0xb29   : > { %p7899_p3 = pneg %p7898_p2 }
 0xb2b   : > { %8119 = dma.done.wait (%p7899_p3), %s6762_s23, 32  }
 0xb2c   : > { %8121 = vsyncadd (%p7899_p3), %s6762_s23, 4294967264  ;;  %s10139_s3 = sld [smem:[#allocation6_spill]]  ;;  %p29_p4 = scmp.ge.s32.totalorder %s8268_s30, 4  }
 0xb2d   : > { %s10140_s28 = sld [smem:[#allocation7_spill]]  ;;  %s10141_s26 = smov %s8128_s27 }
 0xb2e   : > { %s10143_s29 = smov %s8268_s30  ;;  %31 = sbr.rel (!%p29_p4) target bundleno = 8 (0x8), region = 129 }
 0xb32   : > { %s10142_s27 = smov %s10139_s3 }
 0xb33   :  { %6767 = vsyncpa [#allocation4], 1 }
 0xb34   :  { %6769 = vsyncpa [#allocation4 + $0x1], 1 }

</bundles_post_ra>
